<compile_context>
chip_gen: v5e
topology: v5e:2x2
jax: 0.10.0
libtpu: 0.0.40
codegen_flags: <defaults>
</compile_context>

<pallas_src>
import functools

import jax
import jax.numpy as jnp
from jax import lax
from jax.experimental import pallas as pl
from jax.experimental.pallas import tpu as pltpu


def _decoder_kernel(concept_pad_idx, rel_nil_idx, rel_pad_idx, mxu_dtype,
                    x_ref, aw_ref, arc_ref, trel_ref, tgt_ref, idx_ref,
                    wt_ref, bt_ref, wdg_ref, bdg_ref, out_ref):
    S, TB, E = x_ref.shape
    L = aw_ref.shape[2]
    V = wdg_ref.shape[1] - 3
    R = S * TB                      # rows (matmul M dimension) per grid step
    f32 = jnp.float32

    # ---- transfer + fused diverter|generator matmuls (bf16 in, f32 accumulate)
    x = x_ref[...].reshape(R, E).astype(mxu_dtype)
    h = jnp.tanh(jnp.dot(x, wt_ref[...], preferred_element_type=f32) + bt_ref[...])
    # TODO(synk): stochastic dropout (training-time RNG) not implemented; p=0.0 identity.
    logits = (jnp.dot(h.astype(mxu_dtype), wdg_ref[...],
                      preferred_element_type=f32) + bdg_ref[...])    # (R, V+3)

    gen = jax.nn.softmax(logits[:, :V], axis=-1)                     # (R, V)  f32
    div = jax.nn.softmax(logits[:, V:], axis=-1)                     # (R, 3)  f32
    gen_gate = div[:, 0:1]
    map_gate = div[:, 1:2]
    copy_gate = div[:, 2:3]
    probs = gen_gate * gen                                           # (R, V)

    # ---- scatter_add over the vocab as one block-diagonal one-hot matmul:
    #   probs[(s,t), v] += sum_l aw[s,t,l] * (copy_gate[s,t]*[idx[t,0,l]==v]
    #                                          + map_gate[s,t]*[idx[t,1,l]==v])
    # rows r = s*TB + t; contraction columns c = g*TB*L + t2*L + l, masked to t == t2.
    aw = aw_ref[...].reshape(R, L)
    w_copy = (aw * copy_gate).astype(mxu_dtype)                      # (R, L)
    w_map = (aw * map_gate).astype(mxu_dtype)
    row_t = lax.broadcasted_iota(jnp.int32, (R, 1), 0) % TB          # batch id per row
    w_pieces = ([jnp.where(row_t == t, w_copy, 0.0) for t in range(TB)]
                + [jnp.where(row_t == t, w_map, 0.0) for t in range(TB)])
    w_bd = jnp.concatenate(w_pieces, axis=1)                         # (R, 2*TB*L)

    idx = idx_ref[...]                                               # (TB, 2, L) int32
    iota_tlv = lax.broadcasted_iota(jnp.int32, (TB, L, V), 2)
    oh_copy = (idx[:, 0, :][:, :, None] == iota_tlv).astype(mxu_dtype).reshape(TB * L, V)
    oh_map = (idx[:, 1, :][:, :, None] == iota_tlv).astype(mxu_dtype).reshape(TB * L, V)
    oh_all = jnp.concatenate([oh_copy, oh_map], axis=0)              # (2*TB*L, V)
    # TODO(synk): extended copy vocabulary (indices >= vocab_size) not implemented.
    probs = probs + jnp.dot(w_bd, oh_all, preferred_element_type=f32)

    # ---- concept NLL: gather target prob, log only an (R,1) vector.
    tgt = tgt_ref[...].reshape(R, 1)                                 # (R, 1) int32
    iota_rv = lax.broadcasted_iota(jnp.int32, (R, V), 1)
    tgt_prob = jnp.sum(jnp.where(iota_rv == tgt, probs, 0.0), axis=-1, keepdims=True)
    closs_row = -jnp.log(tgt_prob + 1e-12)                           # (R, 1)
    not_pad = tgt != concept_pad_idx                                 # (R, 1)

    # argmax on probs (log is monotone -> same argmax, same first-max tie-break).
    row_max = jnp.max(probs, axis=-1, keepdims=True)
    pred = jnp.min(jnp.where(probs == row_max, iota_rv, V), axis=-1, keepdims=True)
    correct = jnp.logical_and(pred == tgt, not_pad)

    # ---- arc binary cross-entropy (f32, matches F.binary_cross_entropy clamp).
    p = arc_ref[...]                                                 # (S, TB, H) f32
    trel = trel_ref[...]                                             # (S, TB, H) int32
    t_arc = (trel != rel_nil_idx).astype(f32)
    logp = jnp.maximum(jnp.log(p), -100.0)
    log1mp = jnp.maximum(jnp.log(1.0 - p), -100.0)
    bce = -(t_arc * logp + (1.0 - t_arc) * log1mp)
    bce = jnp.where(trel == rel_pad_idx, 0.0, bce)
    arc_row = jnp.sum(bce, axis=2, keepdims=True).reshape(R, 1)      # (R, 1)

    # ---- per-batch reductions -> single (TB, 4) output block.
    stats = jnp.concatenate([
        jnp.where(not_pad, closs_row, 0.0),
        correct.astype(f32),
        not_pad.astype(f32),
        arc_row,
    ], axis=1)                                                       # (R, 4)
    sel = (lax.broadcasted_iota(jnp.int32, (TB, R), 0) ==
           lax.broadcasted_iota(jnp.int32, (TB, R), 1) % TB).astype(f32)
    out_ref[...] = jnp.dot(sel, stats, preferred_element_type=f32)   # (TB, 4)


def _pick_batch_tile(B, S):
    """Largest batch tile <= ~256 matmul rows that divides B and is sublane-aligned."""
    want = max(8, (((256 + S - 1) // S) + 7) // 8 * 8)
    for tb in range(min(B, want), 0, -1):
        if B % tb == 0 and (tb % 8 == 0 or tb == B):
            return tb
    return B


def arc_concept_decoder_forward(params, alignment_weight, arc_weight, concept_outs,
                                copy_seq, target, target_rel,
                                concept_pad_idx, rel_nil_idx, rel_pad_idx,
                                batch_tile=None, mxu_dtype=jnp.bfloat16,
                                validate=False):
    """Mirrors ArcConceptDecoder.forward (training path, joint_rel=False).

    Returns ((concept_loss[B], acc, tot), arc_loss[B], None).  acc / tot are 0-d
    device arrays (no host sync inside the wrapper).
    """
    if arc_weight.ndim == 4:
        arc_weight = jnp.max(arc_weight, axis=0)                     # glue

    S, B, E = concept_outs.shape
    L = alignment_weight.shape[-1]
    H = arc_weight.shape[-1]
    C = params['Wt'].shape[1]
    V = params['Wg'].shape[1]

    copy_seq = copy_seq[:L]                                          # snt_len truncation
    if validate:  # debug only: forces a device->host sync
        assert int(jnp.max(copy_seq)) < V, "extended copy vocabulary unsupported"
    # TODO(synk): extended copy vocabulary (copy indices >= vocab_size) not implemented.
    # TODO(synk): separate_rel / joint_rel branches are disabled by this config.

    TB = batch_tile if batch_tile is not None else _pick_batch_tile(B, S)
    assert B % TB == 0 and (TB % 8 == 0 or TB == B), (B, TB)

    # small glue only (no transposes / copies of the large (S,B,*) tensors):
    tgt3 = target[..., None]                                         # (S, B, 1)
    idx_b = jnp.transpose(copy_seq, (1, 2, 0)).astype(jnp.int32)     # (B, 2, L)  tiny
    wt = params['Wt'].astype(mxu_dtype)                              # (E, C)    bf16
    wdg = jnp.concatenate([params['Wg'], params['Wd']],
                          axis=1).astype(mxu_dtype)                  # (C, V+3)  bf16
    bdg = jnp.concatenate([params['bg'], params['bd']], axis=1).astype(jnp.float32)
    bt = params['bt'].astype(jnp.float32)

    kernel = functools.partial(_decoder_kernel, concept_pad_idx, rel_nil_idx,
                               rel_pad_idx, mxu_dtype)

    in_specs = [
        pl.BlockSpec((S, TB, E), lambda b: (0, b, 0)),               # concept_outs
        pl.BlockSpec((S, TB, L), lambda b: (0, b, 0)),               # alignment_weight
        pl.BlockSpec((S, TB, H), lambda b: (0, b, 0)),               # arc_weight
        pl.BlockSpec((S, TB, H), lambda b: (0, b, 0)),               # target_rel
        pl.BlockSpec((S, TB, 1), lambda b: (0, b, 0)),               # target
        pl.BlockSpec((TB, 2, L), lambda b: (b, 0, 0)),               # copy indices
        pl.BlockSpec((E, C), lambda b: (0, 0)),                      # Wt (bf16)
        pl.BlockSpec((1, C), lambda b: (0, 0)),                      # bt
        pl.BlockSpec((C, V + 3), lambda b: (0, 0)),                  # [Wg|Wd] (bf16)
        pl.BlockSpec((1, V + 3), lambda b: (0, 0)),                  # [bg|bd]
    ]
    out_spec = pl.BlockSpec((TB, 4), lambda b: (b, 0))

    out = pl.pallas_call(
        kernel,
        out_shape=jax.ShapeDtypeStruct((B, 4), jnp.float32),
        grid_spec=pltpu.PrefetchScalarGridSpec(
            num_scalar_prefetch=0,
            grid=(B // TB,),
            in_specs=in_specs,
            out_specs=out_spec),
        compiler_params=pltpu.CompilerParams(
            dimension_semantics=("parallel",),       # batch groups are independent
            vmem_limit_bytes=32 * 1024 * 1024),
    )(concept_outs, alignment_weight, arc_weight, target_rel, tgt3, idx_b,
      wt, bt, wdg, bdg)

    concept_loss = out[:, 0]
    acc = jnp.sum(out[:, 1])
    tot = jnp.sum(out[:, 2])
    arc_loss = out[:, 3]
    return (concept_loss, acc, tot), arc_loss, None


def reference_forward(params, alignment_weight, arc_weight, concept_outs, copy_seq,
                      target, target_rel, concept_pad_idx, rel_nil_idx, rel_pad_idx,
                      mxu_dtype=jnp.bfloat16):
    """Pure-JAX mirror of the PyTorch forward (same bf16 MXU-operand casts)."""
    S, B, _ = concept_outs.shape
    L = alignment_weight.shape[-1]
    V = params['Wg'].shape[1]
    f32 = jnp.float32
    copy_seq = copy_seq[:L]

    Wt = params['Wt'].astype(mxu_dtype)
    Wd = params['Wd'].astype(mxu_dtype)
    Wg = params['Wg'].astype(mxu_dtype)

    h = jnp.tanh(jnp.einsum('sbe,ec->sbc', concept_outs.astype(mxu_dtype), Wt,
                            preferred_element_type=f32) + params['bt'])
    hq = h.astype(mxu_dtype)
    div = jax.nn.softmax(jnp.einsum('sbc,cd->sbd', hq, Wd,
                                    preferred_element_type=f32) + params['bd'], -1)
    gen = jax.nn.softmax(jnp.einsum('sbc,cv->sbv', hq, Wg,
                                    preferred_element_type=f32) + params['bg'], -1)
    gen_gate, map_gate, copy_gate = div[..., 0:1], div[..., 1:2], div[..., 2:3]
    probs = gen_gate * gen

    cg = jnp.concatenate([copy_gate, map_gate], -1)                  # (S,B,2)
    copy_probs = (cg[:, :, None, :] * alignment_weight[..., None]
                  ).reshape(S, B, L * 2).astype(mxu_dtype)
    index = jnp.broadcast_to(
        jnp.transpose(copy_seq, (1, 0, 2)).reshape(1, B, L * 2), (S, B, L * 2))
    onehot = jax.nn.one_hot(index, V, dtype=mxu_dtype)
    probs = probs + jnp.einsum('sbk,sbkv->sbv', copy_probs, onehot,
                               preferred_element_type=f32)

    tgt_prob = jnp.take_along_axis(probs, target[..., None], axis=-1)[..., 0]
    closs_per = -jnp.log(tgt_prob + 1e-12)
    concept_loss = jnp.where(target == concept_pad_idx, 0.0, closs_per).sum(0)
    pred = jnp.argmax(probs, -1)
    total_mask = target != concept_pad_idx
    acc = jnp.sum(jnp.where(total_mask, pred == target, False))
    tot = jnp.sum(total_mask)

    t_arc = (target_rel != rel_nil_idx).astype(f32)
    logp = jnp.maximum(jnp.log(arc_weight), -100.0)
    log1mp = jnp.maximum(jnp.log(1.0 - arc_weight), -100.0)
    bce = -(t_arc * logp + (1.0 - t_arc) * log1mp)
    bce = jnp.where(target_rel == rel_pad_idx, 0.0, bce)
    arc_loss = bce.sum((0, 2))
    return (concept_loss, acc, tot), arc_loss


if __name__ == "__main__":
    # src_len, bsz, embed_dim, conc_size, vocab, snt_len
    S, B, E, C, V, L = 8, 16, 32, 32, 16, 8
    H = S                                     # head dim of arc/rel tensors
    TB = 8                                    # batch tile (2 grid steps)
    concept_pad_idx, rel_pad_idx, rel_nil_idx = 0, 0, 1

    key = jax.random.PRNGKey(0)
    ks = jax.random.split(key, 10)

    params = {
        'Wt': 0.02 * jax.random.normal(ks[0], (E, C), jnp.float32),
        'bt': jnp.zeros((1, C), jnp.float32),
        'Wd': 0.02 * jax.random.normal(ks[1], (C, 3), jnp.float32),
        'bd': jnp.zeros((1, 3), jnp.float32),
        'Wg': 0.02 * jax.random.normal(ks[2], (C, V), jnp.float32),
        'bg': jnp.zeros((1, V), jnp.float32),
    }

    concept_outs = jax.random.normal(ks[3], (S, B, E), jnp.float32)
    alignment_weight = jax.nn.softmax(jax.random.normal(ks[4], (S, B, L), jnp.float32), -1)
    arc_weight = jax.nn.sigmoid(jax.random.normal(ks[5], (S, B, H), jnp.float32))
    copy_seq = jax.random.randint(ks[6], (L, B, 2), 0, V, jnp.int32)
    target = jax.random.randint(ks[7], (S, B), 0, V, jnp.int32)
    target_rel = jax.random.randint(ks[8], (S, B, H), 0, 8, jnp.int32)

    (closs, acc, tot), arc_loss, _ = arc_concept_decoder_forward(
        params, alignment_weight, arc_weight, concept_outs, copy_seq,
        target, target_rel, concept_pad_idx, rel_nil_idx, rel_pad_idx,
        batch_tile=TB)
    jax.block_until_ready((closs, acc, tot, arc_loss))

    (rcl, racc, rtot), rarc = reference_forward(
        params, alignment_weight, arc_weight, concept_outs, copy_seq,
        target, target_rel, concept_pad_idx, rel_nil_idx, rel_pad_idx)

    assert jnp.allclose(closs, rcl, rtol=1e-3, atol=1e-3), (closs, rcl)
    assert jnp.allclose(arc_loss, rarc, rtol=1e-3, atol=1e-3), (arc_loss, rarc)
    assert abs(float(acc) - float(racc)) < 0.5, (acc, racc)
    assert int(tot) == int(rtot), (tot, rtot)
    print("KERNEL_OK")
</pallas_src>

<mosaic_0001>
module attributes {stable_mosaic.version = 11 : i64} {
  func.func @_decoder_kernel(%arg0: i32, %arg1: memref<8x8x32xf32, #tpu.memory_space<vmem>>, %arg2: memref<8x8x8xf32, #tpu.memory_space<vmem>>, %arg3: memref<8x8x8xf32, #tpu.memory_space<vmem>>, %arg4: memref<8x8x8xi32, #tpu.memory_space<vmem>>, %arg5: memref<8x8x1xi32, #tpu.memory_space<vmem>>, %arg6: memref<8x2x8xi32, #tpu.memory_space<vmem>>, %arg7: memref<32x32xbf16, #tpu.memory_space<vmem>>, %arg8: memref<1x32xf32, #tpu.memory_space<vmem>>, %arg9: memref<32x19xbf16, #tpu.memory_space<vmem>>, %arg10: memref<1x19xf32, #tpu.memory_space<vmem>>, %arg11: memref<8x4xf32, #tpu.memory_space<vmem>>) attributes {dimension_semantics = [#tpu.dimension_semantics<parallel>], iteration_bounds = array<i64: 2>, scalar_prefetch = 0 : i64, scratch_operands = 0 : i64, tpu.core_type = #tpu.core_type<tc>, window_params = [{transform_indices = @transform_0, window_bounds = array<i64: 8, 8, 32>}, {transform_indices = @transform_1, window_bounds = array<i64: 8, 8, 8>}, {transform_indices = @transform_2, window_bounds = array<i64: 8, 8, 8>}, {transform_indices = @transform_3, window_bounds = array<i64: 8, 8, 8>}, {transform_indices = @transform_4, window_bounds = array<i64: 8, 8, 1>}, {transform_indices = @transform_5, window_bounds = array<i64: 8, 2, 8>}, {pipeline_mode = #tpu.pipeline_mode<synchronous>, transform_indices = @transform_6, window_bounds = array<i64: 32, 32>}, {pipeline_mode = #tpu.pipeline_mode<synchronous>, transform_indices = @transform_7, window_bounds = array<i64: 1, 32>}, {pipeline_mode = #tpu.pipeline_mode<synchronous>, transform_indices = @transform_8, window_bounds = array<i64: 32, 19>}, {pipeline_mode = #tpu.pipeline_mode<synchronous>, transform_indices = @transform_9, window_bounds = array<i64: 1, 19>}, {transform_indices = @transform_10, window_bounds = array<i64: 8, 4>}]} {
    %c0 = arith.constant 0 : index
    %c0_0 = arith.constant 0 : index
    %c0_1 = arith.constant 0 : index
    %0 = vector.load %arg1[%c0, %c0_0, %c0_1] : memref<8x8x32xf32, #tpu.memory_space<vmem>>, vector<8x8x32xf32>
    %1 = vector.shape_cast %0 : vector<8x8x32xf32> to vector<64x32xf32>
    %2 = arith.truncf %1 : vector<64x32xf32> to vector<64x32xbf16>
    %c0_2 = arith.constant 0 : index
    %c0_3 = arith.constant 0 : index
    %3 = vector.load %arg7[%c0_2, %c0_3] : memref<32x32xbf16, #tpu.memory_space<vmem>>, vector<32x32xbf16>
    %cst = arith.constant dense<0.000000e+00> : vector<64x32xf32>
    %4 = tpu.matmul %2, %3, %cst {dimension_numbers = #tpu.dot_dimension_numbers<[1], [0], [0], [1], [0, 0, 1, 1], [], []>} : vector<64x32xbf16>, vector<32x32xbf16>, vector<64x32xf32> -> vector<64x32xf32>
    %c0_4 = arith.constant 0 : index
    %c0_5 = arith.constant 0 : index
    %5 = vector.load %arg8[%c0_4, %c0_5] : memref<1x32xf32, #tpu.memory_space<vmem>>, vector<1x32xf32>
    %6 = vector.broadcast %5 : vector<1x32xf32> to vector<64x32xf32>
    %7 = arith.addf %4, %6 : vector<64x32xf32>
    %8 = math.tanh %7 : vector<64x32xf32>
    %9 = arith.truncf %8 : vector<64x32xf32> to vector<64x32xbf16>
    %c0_6 = arith.constant 0 : index
    %c0_7 = arith.constant 0 : index
    %10 = vector.load %arg9[%c0_6, %c0_7] : memref<32x19xbf16, #tpu.memory_space<vmem>>, vector<32x19xbf16>
    %cst_8 = arith.constant dense<0.000000e+00> : vector<64x19xf32>
    %11 = tpu.matmul %9, %10, %cst_8 {dimension_numbers = #tpu.dot_dimension_numbers<[1], [0], [0], [1], [0, 0, 1, 1], [], []>} : vector<64x32xbf16>, vector<32x19xbf16>, vector<64x19xf32> -> vector<64x19xf32>
    %c0_9 = arith.constant 0 : index
    %c0_10 = arith.constant 0 : index
    %12 = vector.load %arg10[%c0_9, %c0_10] : memref<1x19xf32, #tpu.memory_space<vmem>>, vector<1x19xf32>
    %13 = vector.broadcast %12 : vector<1x19xf32> to vector<64x19xf32>
    %14 = arith.addf %11, %13 : vector<64x19xf32>
    %15 = vector.extract_strided_slice %14 {offsets = [0, 0], sizes = [64, 16], strides = [1, 1]} : vector<64x19xf32> to vector<64x16xf32>
    %cst_11 = arith.constant dense<0xFF800000> : vector<64xf32>
    %16 = vector.multi_reduction <maximumf>, %15, %cst_11 [1] : vector<64x16xf32> to vector<64xf32>
    %cst_12 = arith.constant 0xFF800000 : f32
    %17 = vector.broadcast %cst_12 : f32 to vector<64xf32>
    %18 = arith.maximumf %17, %16 : vector<64xf32>
    %19 = vector.shape_cast %18 : vector<64xf32> to vector<64x1xf32>
    %20 = vector.broadcast %19 : vector<64x1xf32> to vector<64x16xf32>
    %21 = arith.subf %15, %20 : vector<64x16xf32>
    %22 = math.exp %21 : vector<64x16xf32>
    %cst_13 = arith.constant dense<0.000000e+00> : vector<64xf32>
    %23 = vector.multi_reduction <add>, %22, %cst_13 [1] : vector<64x16xf32> to vector<64xf32>
    %24 = vector.shape_cast %23 : vector<64xf32> to vector<64x1xf32>
    %25 = vector.broadcast %24 : vector<64x1xf32> to vector<64x16xf32>
    %26 = arith.divf %22, %25 : vector<64x16xf32>
    %27 = vector.extract_strided_slice %14 {offsets = [0, 16], sizes = [64, 3], strides = [1, 1]} : vector<64x19xf32> to vector<64x3xf32>
    %cst_14 = arith.constant dense<0xFF800000> : vector<64xf32>
    %28 = vector.multi_reduction <maximumf>, %27, %cst_14 [1] : vector<64x3xf32> to vector<64xf32>
    %cst_15 = arith.constant 0xFF800000 : f32
    %29 = vector.broadcast %cst_15 : f32 to vector<64xf32>
    %30 = arith.maximumf %29, %28 : vector<64xf32>
    %31 = vector.shape_cast %30 : vector<64xf32> to vector<64x1xf32>
    %32 = vector.broadcast %31 : vector<64x1xf32> to vector<64x3xf32>
    %33 = arith.subf %27, %32 : vector<64x3xf32>
    %34 = math.exp %33 : vector<64x3xf32>
    %cst_16 = arith.constant dense<0.000000e+00> : vector<64xf32>
    %35 = vector.multi_reduction <add>, %34, %cst_16 [1] : vector<64x3xf32> to vector<64xf32>
    %36 = vector.shape_cast %35 : vector<64xf32> to vector<64x1xf32>
    %37 = vector.broadcast %36 : vector<64x1xf32> to vector<64x3xf32>
    %38 = arith.divf %34, %37 : vector<64x3xf32>
    %39 = vector.extract_strided_slice %38 {offsets = [0, 0], sizes = [64, 1], strides = [1, 1]} : vector<64x3xf32> to vector<64x1xf32>
    %40 = vector.extract_strided_slice %38 {offsets = [0, 1], sizes = [64, 1], strides = [1, 1]} : vector<64x3xf32> to vector<64x1xf32>
    %41 = vector.extract_strided_slice %38 {offsets = [0, 2], sizes = [64, 1], strides = [1, 1]} : vector<64x3xf32> to vector<64x1xf32>
    %42 = vector.broadcast %39 : vector<64x1xf32> to vector<64x16xf32>
    %43 = arith.mulf %42, %26 : vector<64x16xf32>
    %c0_17 = arith.constant 0 : index
    %c0_18 = arith.constant 0 : index
    %c0_19 = arith.constant 0 : index
    %44 = vector.load %arg2[%c0_17, %c0_18, %c0_19] : memref<8x8x8xf32, #tpu.memory_space<vmem>>, vector<8x8x8xf32>
    %45 = vector.shape_cast %44 : vector<8x8x8xf32> to vector<64x8xf32>
    %46 = vector.broadcast %41 : vector<64x1xf32> to vector<64x8xf32>
    %47 = arith.mulf %45, %46 : vector<64x8xf32>
    %48 = arith.truncf %47 : vector<64x8xf32> to vector<64x8xbf16>
    %49 = vector.broadcast %40 : vector<64x1xf32> to vector<64x8xf32>
    %50 = arith.mulf %45, %49 : vector<64x8xf32>
    %51 = arith.truncf %50 : vector<64x8xf32> to vector<64x8xbf16>
    %52 = tpu.iota {dimensions = array<i32: 0>} : vector<64x1xi32>
    %c8_i32 = arith.constant 8 : i32
    %c0_i32 = arith.constant 0 : i32
    %53 = arith.cmpi eq, %c8_i32, %c0_i32 : i32
    %c1_i32 = arith.constant 1 : i32
    %54 = arith.select %53, %c1_i32, %c8_i32 : i32
    %55 = vector.broadcast %54 : i32 to vector<64x1xi32>
    %56 = arith.remsi %52, %55 : vector<64x1xi32>
    %c0_i32_20 = arith.constant 0 : i32
    %57 = vector.broadcast %c0_i32_20 : i32 to vector<64x1xi32>
    %58 = arith.cmpi ne, %56, %57 : vector<64x1xi32>
    %c0_i32_21 = arith.constant 0 : i32
    %59 = vector.broadcast %c0_i32_21 : i32 to vector<64x1xi32>
    %60 = arith.cmpi slt, %56, %59 : vector<64x1xi32>
    %c0_i32_22 = arith.constant 0 : i32
    %61 = arith.cmpi slt, %54, %c0_i32_22 : i32
    %62 = vector.broadcast %61 : i1 to vector<64x1xi1>
    %63 = vector.broadcast %62 : vector<64x1xi1> to vector<64x1xi1>
    %64 = arith.xori %60, %63 : vector<64x1xi1>
    %65 = arith.andi %64, %58 : vector<64x1xi1>
    %66 = vector.broadcast %54 : i32 to vector<64x1xi32>
    %67 = arith.addi %56, %66 : vector<64x1xi32>
    %68 = arith.select %65, %67, %56 : vector<64x1xi1>, vector<64x1xi32>
    %c0_i32_23 = arith.constant 0 : i32
    %69 = vector.broadcast %c0_i32_23 : i32 to vector<64x1xi32>
    %70 = arith.cmpi eq, %68, %69 : vector<64x1xi32>
    %cst_24 = arith.constant 0.000000e+00 : f32
    %71 = arith.truncf %cst_24 : f32 to bf16
    %72 = vector.shape_cast %70 : vector<64x1xi1> to vector<64x1xi1>
    %73 = vector.broadcast %72 : vector<64x1xi1> to vector<64x8xi1>
    %74 = vector.broadcast %71 : bf16 to vector<64x8xbf16>
    %75 = arith.select %73, %48, %74 : vector<64x8xi1>, vector<64x8xbf16>
    %c1_i32_25 = arith.constant 1 : i32
    %76 = vector.broadcast %c1_i32_25 : i32 to vector<64x1xi32>
    %77 = arith.cmpi eq, %68, %76 : vector<64x1xi32>
    %cst_26 = arith.constant 0.000000e+00 : f32
    %78 = arith.truncf %cst_26 : f32 to bf16
    %79 = vector.shape_cast %77 : vector<64x1xi1> to vector<64x1xi1>
    %80 = vector.broadcast %79 : vector<64x1xi1> to vector<64x8xi1>
    %81 = vector.broadcast %78 : bf16 to vector<64x8xbf16>
    %82 = arith.select %80, %48, %81 : vector<64x8xi1>, vector<64x8xbf16>
    %c2_i32 = arith.constant 2 : i32
    %83 = vector.broadcast %c2_i32 : i32 to vector<64x1xi32>
    %84 = arith.cmpi eq, %68, %83 : vector<64x1xi32>
    %cst_27 = arith.constant 0.000000e+00 : f32
    %85 = arith.truncf %cst_27 : f32 to bf16
    %86 = vector.shape_cast %84 : vector<64x1xi1> to vector<64x1xi1>
    %87 = vector.broadcast %86 : vector<64x1xi1> to vector<64x8xi1>
    %88 = vector.broadcast %85 : bf16 to vector<64x8xbf16>
    %89 = arith.select %87, %48, %88 : vector<64x8xi1>, vector<64x8xbf16>
    %c3_i32 = arith.constant 3 : i32
    %90 = vector.broadcast %c3_i32 : i32 to vector<64x1xi32>
    %91 = arith.cmpi eq, %68, %90 : vector<64x1xi32>
    %cst_28 = arith.constant 0.000000e+00 : f32
    %92 = arith.truncf %cst_28 : f32 to bf16
    %93 = vector.shape_cast %91 : vector<64x1xi1> to vector<64x1xi1>
    %94 = vector.broadcast %93 : vector<64x1xi1> to vector<64x8xi1>
    %95 = vector.broadcast %92 : bf16 to vector<64x8xbf16>
    %96 = arith.select %94, %48, %95 : vector<64x8xi1>, vector<64x8xbf16>
    %c4_i32 = arith.constant 4 : i32
    %97 = vector.broadcast %c4_i32 : i32 to vector<64x1xi32>
    %98 = arith.cmpi eq, %68, %97 : vector<64x1xi32>
    %cst_29 = arith.constant 0.000000e+00 : f32
    %99 = arith.truncf %cst_29 : f32 to bf16
    %100 = vector.shape_cast %98 : vector<64x1xi1> to vector<64x1xi1>
    %101 = vector.broadcast %100 : vector<64x1xi1> to vector<64x8xi1>
    %102 = vector.broadcast %99 : bf16 to vector<64x8xbf16>
    %103 = arith.select %101, %48, %102 : vector<64x8xi1>, vector<64x8xbf16>
    %c5_i32 = arith.constant 5 : i32
    %104 = vector.broadcast %c5_i32 : i32 to vector<64x1xi32>
    %105 = arith.cmpi eq, %68, %104 : vector<64x1xi32>
    %cst_30 = arith.constant 0.000000e+00 : f32
    %106 = arith.truncf %cst_30 : f32 to bf16
    %107 = vector.shape_cast %105 : vector<64x1xi1> to vector<64x1xi1>
    %108 = vector.broadcast %107 : vector<64x1xi1> to vector<64x8xi1>
    %109 = vector.broadcast %106 : bf16 to vector<64x8xbf16>
    %110 = arith.select %108, %48, %109 : vector<64x8xi1>, vector<64x8xbf16>
    %c6_i32 = arith.constant 6 : i32
    %111 = vector.broadcast %c6_i32 : i32 to vector<64x1xi32>
    %112 = arith.cmpi eq, %68, %111 : vector<64x1xi32>
    %cst_31 = arith.constant 0.000000e+00 : f32
    %113 = arith.truncf %cst_31 : f32 to bf16
    %114 = vector.shape_cast %112 : vector<64x1xi1> to vector<64x1xi1>
    %115 = vector.broadcast %114 : vector<64x1xi1> to vector<64x8xi1>
    %116 = vector.broadcast %113 : bf16 to vector<64x8xbf16>
    %117 = arith.select %115, %48, %116 : vector<64x8xi1>, vector<64x8xbf16>
    %c7_i32 = arith.constant 7 : i32
    %118 = vector.broadcast %c7_i32 : i32 to vector<64x1xi32>
    %119 = arith.cmpi eq, %68, %118 : vector<64x1xi32>
    %cst_32 = arith.constant 0.000000e+00 : f32
    %120 = arith.truncf %cst_32 : f32 to bf16
    %121 = vector.shape_cast %119 : vector<64x1xi1> to vector<64x1xi1>
    %122 = vector.broadcast %121 : vector<64x1xi1> to vector<64x8xi1>
    %123 = vector.broadcast %120 : bf16 to vector<64x8xbf16>
    %124 = arith.select %122, %48, %123 : vector<64x8xi1>, vector<64x8xbf16>
    %c0_i32_33 = arith.constant 0 : i32
    %125 = vector.broadcast %c0_i32_33 : i32 to vector<64x1xi32>
    %126 = arith.cmpi eq, %68, %125 : vector<64x1xi32>
    %cst_34 = arith.constant 0.000000e+00 : f32
    %127 = arith.truncf %cst_34 : f32 to bf16
    %128 = vector.shape_cast %126 : vector<64x1xi1> to vector<64x1xi1>
    %129 = vector.broadcast %128 : vector<64x1xi1> to vector<64x8xi1>
    %130 = vector.broadcast %127 : bf16 to vector<64x8xbf16>
    %131 = arith.select %129, %51, %130 : vector<64x8xi1>, vector<64x8xbf16>
    %c1_i32_35 = arith.constant 1 : i32
    %132 = vector.broadcast %c1_i32_35 : i32 to vector<64x1xi32>
    %133 = arith.cmpi eq, %68, %132 : vector<64x1xi32>
    %cst_36 = arith.constant 0.000000e+00 : f32
    %134 = arith.truncf %cst_36 : f32 to bf16
    %135 = vector.shape_cast %133 : vector<64x1xi1> to vector<64x1xi1>
    %136 = vector.broadcast %135 : vector<64x1xi1> to vector<64x8xi1>
    %137 = vector.broadcast %134 : bf16 to vector<64x8xbf16>
    %138 = arith.select %136, %51, %137 : vector<64x8xi1>, vector<64x8xbf16>
    %c2_i32_37 = arith.constant 2 : i32
    %139 = vector.broadcast %c2_i32_37 : i32 to vector<64x1xi32>
    %140 = arith.cmpi eq, %68, %139 : vector<64x1xi32>
    %cst_38 = arith.constant 0.000000e+00 : f32
    %141 = arith.truncf %cst_38 : f32 to bf16
    %142 = vector.shape_cast %140 : vector<64x1xi1> to vector<64x1xi1>
    %143 = vector.broadcast %142 : vector<64x1xi1> to vector<64x8xi1>
    %144 = vector.broadcast %141 : bf16 to vector<64x8xbf16>
    %145 = arith.select %143, %51, %144 : vector<64x8xi1>, vector<64x8xbf16>
    %c3_i32_39 = arith.constant 3 : i32
    %146 = vector.broadcast %c3_i32_39 : i32 to vector<64x1xi32>
    %147 = arith.cmpi eq, %68, %146 : vector<64x1xi32>
    %cst_40 = arith.constant 0.000000e+00 : f32
    %148 = arith.truncf %cst_40 : f32 to bf16
    %149 = vector.shape_cast %147 : vector<64x1xi1> to vector<64x1xi1>
    %150 = vector.broadcast %149 : vector<64x1xi1> to vector<64x8xi1>
    %151 = vector.broadcast %148 : bf16 to vector<64x8xbf16>
    %152 = arith.select %150, %51, %151 : vector<64x8xi1>, vector<64x8xbf16>
    %c4_i32_41 = arith.constant 4 : i32
    %153 = vector.broadcast %c4_i32_41 : i32 to vector<64x1xi32>
    %154 = arith.cmpi eq, %68, %153 : vector<64x1xi32>
    %cst_42 = arith.constant 0.000000e+00 : f32
    %155 = arith.truncf %cst_42 : f32 to bf16
    %156 = vector.shape_cast %154 : vector<64x1xi1> to vector<64x1xi1>
    %157 = vector.broadcast %156 : vector<64x1xi1> to vector<64x8xi1>
    %158 = vector.broadcast %155 : bf16 to vector<64x8xbf16>
    %159 = arith.select %157, %51, %158 : vector<64x8xi1>, vector<64x8xbf16>
    %c5_i32_43 = arith.constant 5 : i32
    %160 = vector.broadcast %c5_i32_43 : i32 to vector<64x1xi32>
    %161 = arith.cmpi eq, %68, %160 : vector<64x1xi32>
    %cst_44 = arith.constant 0.000000e+00 : f32
    %162 = arith.truncf %cst_44 : f32 to bf16
    %163 = vector.shape_cast %161 : vector<64x1xi1> to vector<64x1xi1>
    %164 = vector.broadcast %163 : vector<64x1xi1> to vector<64x8xi1>
    %165 = vector.broadcast %162 : bf16 to vector<64x8xbf16>
    %166 = arith.select %164, %51, %165 : vector<64x8xi1>, vector<64x8xbf16>
    %c6_i32_45 = arith.constant 6 : i32
    %167 = vector.broadcast %c6_i32_45 : i32 to vector<64x1xi32>
    %168 = arith.cmpi eq, %68, %167 : vector<64x1xi32>
    %cst_46 = arith.constant 0.000000e+00 : f32
    %169 = arith.truncf %cst_46 : f32 to bf16
    %170 = vector.shape_cast %168 : vector<64x1xi1> to vector<64x1xi1>
    %171 = vector.broadcast %170 : vector<64x1xi1> to vector<64x8xi1>
    %172 = vector.broadcast %169 : bf16 to vector<64x8xbf16>
    %173 = arith.select %171, %51, %172 : vector<64x8xi1>, vector<64x8xbf16>
    %c7_i32_47 = arith.constant 7 : i32
    %174 = vector.broadcast %c7_i32_47 : i32 to vector<64x1xi32>
    %175 = arith.cmpi eq, %68, %174 : vector<64x1xi32>
    %cst_48 = arith.constant 0.000000e+00 : f32
    %176 = arith.truncf %cst_48 : f32 to bf16
    %177 = vector.shape_cast %175 : vector<64x1xi1> to vector<64x1xi1>
    %178 = vector.broadcast %177 : vector<64x1xi1> to vector<64x8xi1>
    %179 = vector.broadcast %176 : bf16 to vector<64x8xbf16>
    %180 = arith.select %178, %51, %179 : vector<64x8xi1>, vector<64x8xbf16>
    %181 = tpu.concatenate %75, %82, %89, %96, %103, %110, %117, %124, %131, %138, %145, %152, %159, %166, %173, %180 in 1 : vector<64x8xbf16>, vector<64x8xbf16>, vector<64x8xbf16>, vector<64x8xbf16>, vector<64x8xbf16>, vector<64x8xbf16>, vector<64x8xbf16>, vector<64x8xbf16>, vector<64x8xbf16>, vector<64x8xbf16>, vector<64x8xbf16>, vector<64x8xbf16>, vector<64x8xbf16>, vector<64x8xbf16>, vector<64x8xbf16>, vector<64x8xbf16> -> vector<64x128xbf16>
    %c0_49 = arith.constant 0 : index
    %c0_50 = arith.constant 0 : index
    %c0_51 = arith.constant 0 : index
    %182 = vector.load %arg6[%c0_49, %c0_50, %c0_51] : memref<8x2x8xi32, #tpu.memory_space<vmem>>, vector<8x2x8xi32>
    %183 = tpu.iota {dimensions = array<i32: 2>} : vector<8x8x16xi32>
    %184 = vector.extract_strided_slice %182 {offsets = [0, 0, 0], sizes = [8, 1, 8], strides = [1, 1, 1]} : vector<8x2x8xi32> to vector<8x1x8xi32>
    %185 = vector.shape_cast %184 : vector<8x1x8xi32> to vector<8x8xi32>
    %186 = vector.shape_cast %185 : vector<8x8xi32> to vector<8x8x1xi32>
    %187 = vector.broadcast %186 : vector<8x8x1xi32> to vector<8x8x16xi32>
    %188 = arith.cmpi eq, %187, %183 : vector<8x8x16xi32>
    %189 = arith.extui %188 : vector<8x8x16xi1> to vector<8x8x16xi32>
    %190 = arith.sitofp %189 : vector<8x8x16xi32> to vector<8x8x16xf32>
    %191 = arith.truncf %190 : vector<8x8x16xf32> to vector<8x8x16xbf16>
    %192 = vector.shape_cast %191 : vector<8x8x16xbf16> to vector<64x16xbf16>
    %193 = vector.extract_strided_slice %182 {offsets = [0, 1, 0], sizes = [8, 1, 8], strides = [1, 1, 1]} : vector<8x2x8xi32> to vector<8x1x8xi32>
    %194 = vector.shape_cast %193 : vector<8x1x8xi32> to vector<8x8xi32>
    %195 = vector.shape_cast %194 : vector<8x8xi32> to vector<8x8x1xi32>
    %196 = vector.broadcast %195 : vector<8x8x1xi32> to vector<8x8x16xi32>
    %197 = arith.cmpi eq, %196, %183 : vector<8x8x16xi32>
    %198 = arith.extui %197 : vector<8x8x16xi1> to vector<8x8x16xi32>
    %199 = arith.sitofp %198 : vector<8x8x16xi32> to vector<8x8x16xf32>
    %200 = arith.truncf %199 : vector<8x8x16xf32> to vector<8x8x16xbf16>
    %201 = vector.shape_cast %200 : vector<8x8x16xbf16> to vector<64x16xbf16>
    %202 = tpu.concatenate %192, %201 in 0 : vector<64x16xbf16>, vector<64x16xbf16> -> vector<128x16xbf16>
    %cst_52 = arith.constant dense<0.000000e+00> : vector<64x16xf32>
    %203 = tpu.matmul %181, %202, %cst_52 {dimension_numbers = #tpu.dot_dimension_numbers<[1], [0], [0], [1], [0, 0, 1, 1], [], []>} : vector<64x128xbf16>, vector<128x16xbf16>, vector<64x16xf32> -> vector<64x16xf32>
    %204 = arith.addf %43, %203 : vector<64x16xf32>
    %c0_53 = arith.constant 0 : index
    %c0_54 = arith.constant 0 : index
    %c0_55 = arith.constant 0 : index
    %205 = vector.load %arg5[%c0_53, %c0_54, %c0_55] : memref<8x8x1xi32, #tpu.memory_space<vmem>>, vector<8x8x1xi32>
    %206 = vector.shape_cast %205 : vector<8x8x1xi32> to vector<64x1xi32>
    %207 = tpu.iota {dimensions = array<i32: 1>} : vector<64x16xi32>
    %208 = vector.broadcast %206 : vector<64x1xi32> to vector<64x16xi32>
    %209 = arith.cmpi eq, %207, %208 : vector<64x16xi32>
    %cst_56 = arith.constant 0.000000e+00 : f32
    %210 = vector.broadcast %cst_56 : f32 to vector<64x16xf32>
    %211 = arith.select %209, %204, %210 : vector<64x16xi1>, vector<64x16xf32>
    %cst_57 = arith.constant dense<0.000000e+00> : vector<64xf32>
    %212 = vector.multi_reduction <add>, %211, %cst_57 [1] : vector<64x16xf32> to vector<64xf32>
    %213 = vector.shape_cast %212 : vector<64xf32> to vector<64x1xf32>
    %cst_58 = arith.constant 9.99999996E-13 : f32
    %214 = vector.broadcast %cst_58 : f32 to vector<64x1xf32>
    %215 = arith.addf %213, %214 : vector<64x1xf32>
    %216 = math.log %215 : vector<64x1xf32>
    %cst_59 = arith.constant 0.000000e+00 : f32
    %217 = vector.broadcast %cst_59 : f32 to vector<64x1xf32>
    %218 = arith.subf %217, %216 : vector<64x1xf32>
    %c0_i32_60 = arith.constant 0 : i32
    %219 = vector.broadcast %c0_i32_60 : i32 to vector<64x1xi32>
    %220 = arith.cmpi ne, %206, %219 : vector<64x1xi32>
    %cst_61 = arith.constant dense<0xFF800000> : vector<64xf32>
    %221 = vector.multi_reduction <maximumf>, %204, %cst_61 [1] : vector<64x16xf32> to vector<64xf32>
    %222 = vector.shape_cast %221 : vector<64xf32> to vector<64x1xf32>
    %223 = vector.broadcast %222 : vector<64x1xf32> to vector<64x16xf32>
    %224 = arith.cmpf oeq, %204, %223 : vector<64x16xf32>
    %c16_i32 = arith.constant 16 : i32
    %225 = vector.broadcast %c16_i32 : i32 to vector<64x16xi32>
    %226 = arith.select %224, %207, %225 : vector<64x16xi1>, vector<64x16xi32>
    %cst_62 = arith.constant dense<2147483647> : vector<64xi32>
    %227 = vector.multi_reduction <minsi>, %226, %cst_62 [1] : vector<64x16xi32> to vector<64xi32>
    %228 = vector.shape_cast %227 : vector<64xi32> to vector<64x1xi32>
    %229 = arith.cmpi eq, %228, %206 : vector<64x1xi32>
    %230 = arith.andi %229, %220 : vector<64x1xi1>
    %c0_63 = arith.constant 0 : index
    %c0_64 = arith.constant 0 : index
    %c0_65 = arith.constant 0 : index
    %231 = vector.load %arg3[%c0_63, %c0_64, %c0_65] : memref<8x8x8xf32, #tpu.memory_space<vmem>>, vector<8x8x8xf32>
    %c0_66 = arith.constant 0 : index
    %c0_67 = arith.constant 0 : index
    %c0_68 = arith.constant 0 : index
    %232 = vector.load %arg4[%c0_66, %c0_67, %c0_68] : memref<8x8x8xi32, #tpu.memory_space<vmem>>, vector<8x8x8xi32>
    %c1_i32_69 = arith.constant 1 : i32
    %233 = vector.broadcast %c1_i32_69 : i32 to vector<8x8x8xi32>
    %234 = arith.cmpi ne, %232, %233 : vector<8x8x8xi32>
    %235 = arith.extui %234 : vector<8x8x8xi1> to vector<8x8x8xi32>
    %236 = arith.sitofp %235 : vector<8x8x8xi32> to vector<8x8x8xf32>
    %237 = math.log %231 : vector<8x8x8xf32>
    %cst_70 = arith.constant -1.000000e+02 : f32
    %238 = vector.broadcast %cst_70 : f32 to vector<8x8x8xf32>
    %239 = arith.maximumf %237, %238 : vector<8x8x8xf32>
    %cst_71 = arith.constant 1.000000e+00 : f32
    %240 = vector.broadcast %cst_71 : f32 to vector<8x8x8xf32>
    %241 = arith.subf %240, %231 : vector<8x8x8xf32>
    %242 = math.log %241 : vector<8x8x8xf32>
    %cst_72 = arith.constant -1.000000e+02 : f32
    %243 = vector.broadcast %cst_72 : f32 to vector<8x8x8xf32>
    %244 = arith.maximumf %242, %243 : vector<8x8x8xf32>
    %245 = arith.mulf %236, %239 : vector<8x8x8xf32>
    %cst_73 = arith.constant 1.000000e+00 : f32
    %246 = vector.broadcast %cst_73 : f32 to vector<8x8x8xf32>
    %247 = arith.subf %246, %236 : vector<8x8x8xf32>
    %248 = arith.mulf %247, %244 : vector<8x8x8xf32>
    %249 = arith.addf %245, %248 : vector<8x8x8xf32>
    %cst_74 = arith.constant 0.000000e+00 : f32
    %250 = vector.broadcast %cst_74 : f32 to vector<8x8x8xf32>
    %251 = arith.subf %250, %249 : vector<8x8x8xf32>
    %c0_i32_75 = arith.constant 0 : i32
    %252 = vector.broadcast %c0_i32_75 : i32 to vector<8x8x8xi32>
    %253 = arith.cmpi eq, %232, %252 : vector<8x8x8xi32>
    %cst_76 = arith.constant 0.000000e+00 : f32
    %254 = vector.broadcast %cst_76 : f32 to vector<8x8x8xf32>
    %255 = arith.select %253, %254, %251 : vector<8x8x8xi1>, vector<8x8x8xf32>
    %cst_77 = arith.constant dense<0.000000e+00> : vector<8x8xf32>
    %256 = vector.multi_reduction <add>, %255, %cst_77 [2] : vector<8x8x8xf32> to vector<8x8xf32>
    %257 = vector.shape_cast %256 : vector<8x8xf32> to vector<8x8x1xf32>
    %258 = vector.shape_cast %257 : vector<8x8x1xf32> to vector<64x1xf32>
    %cst_78 = arith.constant 0.000000e+00 : f32
    %259 = vector.broadcast %cst_78 : f32 to vector<64x1xf32>
    %260 = arith.select %220, %218, %259 : vector<64x1xi1>, vector<64x1xf32>
    %261 = arith.extui %230 : vector<64x1xi1> to vector<64x1xi32>
    %262 = arith.sitofp %261 : vector<64x1xi32> to vector<64x1xf32>
    %263 = arith.extui %220 : vector<64x1xi1> to vector<64x1xi32>
    %264 = arith.sitofp %263 : vector<64x1xi32> to vector<64x1xf32>
    %265 = tpu.concatenate %260, %262, %264, %258 in 1 : vector<64x1xf32>, vector<64x1xf32>, vector<64x1xf32>, vector<64x1xf32> -> vector<64x4xf32>
    %266 = tpu.iota {dimensions = array<i32: 0>} : vector<8x64xi32>
    %267 = tpu.iota {dimensions = array<i32: 1>} : vector<8x64xi32>
    %c8_i32_79 = arith.constant 8 : i32
    %c0_i32_80 = arith.constant 0 : i32
    %268 = arith.cmpi eq, %c8_i32_79, %c0_i32_80 : i32
    %c1_i32_81 = arith.constant 1 : i32
    %269 = arith.select %268, %c1_i32_81, %c8_i32_79 : i32
    %270 = vector.broadcast %269 : i32 to vector<8x64xi32>
    %271 = arith.remsi %267, %270 : vector<8x64xi32>
    %c0_i32_82 = arith.constant 0 : i32
    %272 = vector.broadcast %c0_i32_82 : i32 to vector<8x64xi32>
    %273 = arith.cmpi ne, %271, %272 : vector<8x64xi32>
    %c0_i32_83 = arith.constant 0 : i32
    %274 = vector.broadcast %c0_i32_83 : i32 to vector<8x64xi32>
    %275 = arith.cmpi slt, %271, %274 : vector<8x64xi32>
    %c0_i32_84 = arith.constant 0 : i32
    %276 = arith.cmpi slt, %269, %c0_i32_84 : i32
    %277 = vector.broadcast %276 : i1 to vector<8x64xi1>
    %278 = vector.broadcast %277 : vector<8x64xi1> to vector<8x64xi1>
    %279 = arith.xori %275, %278 : vector<8x64xi1>
    %280 = arith.andi %279, %273 : vector<8x64xi1>
    %281 = vector.broadcast %269 : i32 to vector<8x64xi32>
    %282 = arith.addi %271, %281 : vector<8x64xi32>
    %283 = arith.select %280, %282, %271 : vector<8x64xi1>, vector<8x64xi32>
    %284 = arith.cmpi eq, %266, %283 : vector<8x64xi32>
    %285 = arith.extui %284 : vector<8x64xi1> to vector<8x64xi32>
    %286 = arith.sitofp %285 : vector<8x64xi32> to vector<8x64xf32>
    %cst_85 = arith.constant dense<0.000000e+00> : vector<8x4xf32>
    %287 = tpu.matmul %286, %265, %cst_85 {dimension_numbers = #tpu.dot_dimension_numbers<[1], [0], [0], [1], [0, 0, 1, 1], [], []>} : vector<8x64xf32>, vector<64x4xf32>, vector<8x4xf32> -> vector<8x4xf32>
    %c0_86 = arith.constant 0 : index
    %c0_87 = arith.constant 0 : index
    %288 = vector.load %arg11[%c0_86, %c0_87] : memref<8x4xf32, #tpu.memory_space<vmem>>, vector<8x4xf32>
    tpu.vector_store %arg11[%c0_86, %c0_87], %287 {strides = array<i32>} : memref<8x4xf32, #tpu.memory_space<vmem>>, vector<8x4xf32>,
    return
  }
  func.func @transform_0(%arg0: i32) -> (i32, i32, i32) {
    %c0_i32 = arith.constant 0 : i32
    %c0_i32_0 = arith.constant 0 : i32
    %c0_i32_1 = arith.constant 0 : i32
    return %c0_i32, %arg0, %c0_i32_0 : i32, i32, i32
  }
  func.func @transform_1(%arg0: i32) -> (i32, i32, i32) {
    %c0_i32 = arith.constant 0 : i32
    %c0_i32_0 = arith.constant 0 : i32
    %c0_i32_1 = arith.constant 0 : i32
    return %c0_i32, %arg0, %c0_i32_0 : i32, i32, i32
  }
  func.func @transform_2(%arg0: i32) -> (i32, i32, i32) {
    %c0_i32 = arith.constant 0 : i32
    %c0_i32_0 = arith.constant 0 : i32
    %c0_i32_1 = arith.constant 0 : i32
    return %c0_i32, %arg0, %c0_i32_0 : i32, i32, i32
  }
  func.func @transform_3(%arg0: i32) -> (i32, i32, i32) {
    %c0_i32 = arith.constant 0 : i32
    %c0_i32_0 = arith.constant 0 : i32
    %c0_i32_1 = arith.constant 0 : i32
    return %c0_i32, %arg0, %c0_i32_0 : i32, i32, i32
  }
  func.func @transform_4(%arg0: i32) -> (i32, i32, i32) {
    %c0_i32 = arith.constant 0 : i32
    %c0_i32_0 = arith.constant 0 : i32
    %c0_i32_1 = arith.constant 0 : i32
    return %c0_i32, %arg0, %c0_i32_0 : i32, i32, i32
  }
  func.func @transform_5(%arg0: i32) -> (i32, i32, i32) {
    %c0_i32 = arith.constant 0 : i32
    %c0_i32_0 = arith.constant 0 : i32
    %c0_i32_1 = arith.constant 0 : i32
    return %arg0, %c0_i32, %c0_i32_0 : i32, i32, i32
  }
  func.func @transform_6(%arg0: i32) -> (i32, i32) {
    %c0_i32 = arith.constant 0 : i32
    %c0_i32_0 = arith.constant 0 : i32
    %c0_i32_1 = arith.constant 0 : i32
    return %c0_i32, %c0_i32_0 : i32, i32
  }
  func.func @transform_7(%arg0: i32) -> (i32, i32) {
    %c0_i32 = arith.constant 0 : i32
    %c0_i32_0 = arith.constant 0 : i32
    %c0_i32_1 = arith.constant 0 : i32
    return %c0_i32, %c0_i32_0 : i32, i32
  }
  func.func @transform_8(%arg0: i32) -> (i32, i32) {
    %c0_i32 = arith.constant 0 : i32
    %c0_i32_0 = arith.constant 0 : i32
    %c0_i32_1 = arith.constant 0 : i32
    return %c0_i32, %c0_i32_0 : i32, i32
  }
  func.func @transform_9(%arg0: i32) -> (i32, i32) {
    %c0_i32 = arith.constant 0 : i32
    %c0_i32_0 = arith.constant 0 : i32
    %c0_i32_1 = arith.constant 0 : i32
    return %c0_i32, %c0_i32_0 : i32, i32
  }
  func.func @transform_10(%arg0: i32) -> (i32, i32) {
    %c0_i32 = arith.constant 0 : i32
    %c0_i32_0 = arith.constant 0 : i32
    return %arg0, %c0_i32 : i32, i32
  }
}

</mosaic_0001>

<bundles_post_ra>
// kernel: tpu_custom_call.1
= control target key start
LH: loop header
LB: loop body
LE: loop exit
PB: predicated region body
PF: predicated region fallthrough
CT: control target
= control target key end

     0   :  { %s4065_s13 = smov 0   ;;  %s4067_s14 = smov 0   ;;  %s6017_s0 = inlined_call_operand.vmem [shape: f32[8,16,32], index: 0, kind: input, shape index: {}]   ;;  %s6018_s1 = inlined_call_operand.vmem [shape: f32[8,16,8], index: 1, kind: input, shape index: {}]   ;;  %s6019_s2 = inlined_call_operand.vmem [shape: f32[8,16,8], index: 2, kind: input, shape index: {}]   ;;  %s6020_s3 = inlined_call_operand.vmem [shape: s32[8,16,8], index: 3, kind: input, shape index: {}]   ;;  %s6021_s4 = inlined_call_operand.vmem [shape: s32[8,16,1], index: 4, kind: input, shape index: {}]   ;;  %s6022_s5 = inlined_call_operand.vmem [shape: s32[16,2,8], index: 5, kind: input, shape index: {}]   ;;  %s6023_s6 = inlined_call_operand.vmem [shape: bf16[32,32], index: 6, kind: input, shape index: {}]   ;;  %s6024_s7 = inlined_call_operand.vmem [shape: f32[1,32], index: 7, kind: input, shape index: {}]   ;;  %s6025_s8 = inlined_call_operand.vmem [shape: bf16[32,19], index: 8, kind: input, shape index: {}]   ;;  %s6026_s9 = inlined_call_operand.vmem [shape: f32[1,19], index: 9, kind: input, shape index: {}]   ;;  %s6027_s10 = inlined_call_operand.vmem [shape: f32[16,4], index: 10, kind: output, shape index: {}]  }
   0x1   :  { %s4069_s15 = smov 0  }
   0x2 LB: > { %s4081_s16 = sadd.s32 4294967295, %s3986_s15   ;;  %s4084_s17 = sadd.s32 1, %s3986_s15   ;;  %s3986_s15 = sphi %s4069_s15, %s6297_s15   ;;  %s3982_s14 = sphi %s4067_s14, %s6296_s14   ;;  %s3978_s13 = sphi %s4065_s13, %s6295_s13  }
   0x3   : > { %s24_s18 = ssub.s32 %s3986_s15, %s4084_s17  ;;  %s27_s19 = sadd.s32 1, %s3982_s14 }
   0x4   : > { %p25_p0 = scmp.eq.s32.totalorder %s24_s18, 0  ;;  %p34_p1 = scmp.ne.s32.totalorder %s3982_s14, %s3978_s13 }
   0x5   : > { %p35_p2 = scmp.eq.s32.totalorder %s3986_s15, 0  ;;  %p3615_p4 = scmp.ge.s32.totalorder %s3986_s15, 2 }
   0x6   : > { %s4093_s20 = scalar_select %p25_p0, %s3982_s14, %s27_s19  }
   0x7   : > { %p4095_p3 = por %p35_p2, %p34_p1  ;;  %312 = sbr.rel (%p3615_p4) target bundleno = 72 (0x48), region = 32 }
   0xc   : > { %315 = sbr.rel (!%p4095_p3) target bundleno = 24 (0x18), region = 36  ;;  %s317_s22 = sand.u32 (%p4095_p3), 1, %s3982_s14  }
   0xd   : > { %s3617_s23 = sshll.u32 (%p4095_p3), %s3986_s15, 3  ;;  %s3616_s24 = sshll.u32 (%p4095_p3), %s317_s22, 6 }
   0xe   : > { %s321_s27 = scalar_lea.vmem (%p4095_p3), %s6017_s0, %s3617_s23  ;;  %s319_s28 = scalar_lea.vmem (%p4095_p3), [#allocation2], %s3616_s24 }
   0xf   : > { %v364_v0 = vld [vmem:[%s321_s27] sm:$0xff] (%p4095_p3)  ;;  %v366_v1 = vld [vmem:[%s321_s27 + $0x10] sm:$0xff] (%p4095_p3) }
  0x10   : > { %v368_v2 = vld [vmem:[%s321_s27 + $0x20] sm:$0xff] (%p4095_p3)  ;;  %365 = vst [vmem:[%s319_s28] sm:$0xff] (%p4095_p3), %v364_v0  ;;  %v370_v3 = vld [vmem:[%s321_s27 + $0x30] sm:$0xff] (%p4095_p3) }
  0x11   : > { %367 = vst [vmem:[%s319_s28 + $0x8] sm:$0xff] %v366_v1  ;;  %v372_v4 = vld [vmem:[%s321_s27 + $0x40] sm:$0xff]  ;;  %v374_v5 = vld [vmem:[%s321_s27 + $0x50] sm:$0xff] }
  0x12   : > { %369 = vst [vmem:[%s319_s28 + $0x10] sm:$0xff] %v368_v2  ;;  %v376_v6 = vld [vmem:[%s321_s27 + $0x60] sm:$0xff]  ;;  %v378_v7 = vld [vmem:[%s321_s27 + $0x70] sm:$0xff] }
  0x13   : > { %371 = vst [vmem:[%s319_s28 + $0x18] sm:$0xff] %v370_v3 }
  0x14   : > { %373 = vst [vmem:[%s319_s28 + $0x20] sm:$0xff] %v372_v4 }
  0x15   : > { %375 = vst [vmem:[%s319_s28 + $0x28] sm:$0xff] %v374_v5 }
  0x16   : > { %377 = vst [vmem:[%s319_s28 + $0x30] sm:$0xff] %v376_v6 }
  0x17   : > { %379 = vst [vmem:[%s319_s28 + $0x38] sm:$0xff] %v378_v7 }
  0x18 PF: > { %385 = sbr.rel (!%p4095_p3) target bundleno = 36 (0x24), region = 74  ;;  %s387_s29 = sand.u32 (%p4095_p3), 1, %s3982_s14  }
  0x19   : > { %s3619_s30 = sshll.u32 (%p4095_p3), %s3986_s15, 3  ;;  %s3618_s11 = sshll.u32 (%p4095_p3), %s387_s29, 6 }
  0x1a   : > { %s391_s19 = scalar_lea.vmem (%p4095_p3), %s6018_s1, %s3619_s30  ;;  %s389_s22 = scalar_lea.vmem (%p4095_p3), [#allocation3], %s3618_s11 }
  0x1b   : > { %v434_v8 = vld [vmem:[%s391_s19] sm:$0xff] (%p4095_p3)  ;;  %v436_v9 = vld [vmem:[%s391_s19 + $0x10] sm:$0xff] (%p4095_p3) }
  0x1c   : > { %v438_v10 = vld [vmem:[%s391_s19 + $0x20] sm:$0xff] (%p4095_p3)  ;;  %435 = vst [vmem:[%s389_s22] sm:$0xff] (%p4095_p3), %v434_v8  ;;  %v440_v11 = vld [vmem:[%s391_s19 + $0x30] sm:$0xff] (%p4095_p3) }
  0x1d   : > { %437 = vst [vmem:[%s389_s22 + $0x8] sm:$0xff] %v436_v9  ;;  %v442_v12 = vld [vmem:[%s391_s19 + $0x40] sm:$0xff]  ;;  %v444_v13 = vld [vmem:[%s391_s19 + $0x50] sm:$0xff] }
  0x1e   : > { %439 = vst [vmem:[%s389_s22 + $0x10] sm:$0xff] %v438_v10  ;;  %v446_v14 = vld [vmem:[%s391_s19 + $0x60] sm:$0xff]  ;;  %v448_v15 = vld [vmem:[%s391_s19 + $0x70] sm:$0xff] }
  0x1f   : > { %441 = vst [vmem:[%s389_s22 + $0x18] sm:$0xff] %v440_v11 }
  0x20   : > { %443 = vst [vmem:[%s389_s22 + $0x20] sm:$0xff] %v442_v12 }
  0x21   : > { %445 = vst [vmem:[%s389_s22 + $0x28] sm:$0xff] %v444_v13 }
  0x22   : > { %447 = vst [vmem:[%s389_s22 + $0x30] sm:$0xff] %v446_v14 }
  0x23   : > { %449 = vst [vmem:[%s389_s22 + $0x38] sm:$0xff] %v448_v15 }
  0x24 PF: > { %455 = sbr.rel (!%p4095_p3) target bundleno = 48 (0x30), region = 112  ;;  %s457_s23 = sand.u32 (%p4095_p3), 1, %s3982_s14  }
  0x25   : > { %s3621_s24 = sshll.u32 (%p4095_p3), %s3986_s15, 3  ;;  %s3620_s25 = sshll.u32 (%p4095_p3), %s457_s23, 6 }
  0x26   : > { %s461_s28 = scalar_lea.vmem (%p4095_p3), %s6019_s2, %s3621_s24  ;;  %s459_s29 = scalar_lea.vmem (%p4095_p3), [#allocation4], %s3620_s25 }
  0x27   : > { %v504_v16 = vld [vmem:[%s461_s28] sm:$0xff] (%p4095_p3)  ;;  %v506_v17 = vld [vmem:[%s461_s28 + $0x10] sm:$0xff] (%p4095_p3) }
  0x28   : > { %v508_v18 = vld [vmem:[%s461_s28 + $0x20] sm:$0xff] (%p4095_p3)  ;;  %505 = vst [vmem:[%s459_s29] sm:$0xff] (%p4095_p3), %v504_v16  ;;  %v510_v19 = vld [vmem:[%s461_s28 + $0x30] sm:$0xff] (%p4095_p3) }
  0x29   : > { %507 = vst [vmem:[%s459_s29 + $0x8] sm:$0xff] %v506_v17  ;;  %v512_v20 = vld [vmem:[%s461_s28 + $0x40] sm:$0xff]  ;;  %v514_v21 = vld [vmem:[%s461_s28 + $0x50] sm:$0xff] }
  0x2a   : > { %509 = vst [vmem:[%s459_s29 + $0x10] sm:$0xff] %v508_v18  ;;  %v516_v22 = vld [vmem:[%s461_s28 + $0x60] sm:$0xff]  ;;  %v518_v23 = vld [vmem:[%s461_s28 + $0x70] sm:$0xff] }
  0x2b   : > { %511 = vst [vmem:[%s459_s29 + $0x18] sm:$0xff] %v510_v19 }
  0x2c   : > { %513 = vst [vmem:[%s459_s29 + $0x20] sm:$0xff] %v512_v20 }
  0x2d   : > { %515 = vst [vmem:[%s459_s29 + $0x28] sm:$0xff] %v514_v21 }
  0x2e   : > { %517 = vst [vmem:[%s459_s29 + $0x30] sm:$0xff] %v516_v22 }
  0x2f   : > { %519 = vst [vmem:[%s459_s29 + $0x38] sm:$0xff] %v518_v23 }
  0x30 PF: > { %525 = sbr.rel (!%p4095_p3) target bundleno = 60 (0x3c), region = 150  ;;  %s527_s30 = sand.u32 (%p4095_p3), 1, %s3982_s14  }
  0x31   : > { %s3623_s11 = sshll.u32 (%p4095_p3), %s3986_s15, 3  ;;  %s3622_s12 = sshll.u32 (%p4095_p3), %s527_s30, 6 }
  0x32   : > { %s531_s22 = scalar_lea.vmem (%p4095_p3), %s6020_s3, %s3623_s11  ;;  %s529_s23 = scalar_lea.vmem (%p4095_p3), [#allocation5], %s3622_s12 }
  0x33   : > { %v574_v24 = vld [vmem:[%s531_s22] sm:$0xff] (%p4095_p3)  ;;  %v576_v25 = vld [vmem:[%s531_s22 + $0x10] sm:$0xff] (%p4095_p3) }
  0x34   : > { %v578_v26 = vld [vmem:[%s531_s22 + $0x20] sm:$0xff] (%p4095_p3)  ;;  %575 = vst [vmem:[%s529_s23] sm:$0xff] (%p4095_p3), %v574_v24  ;;  %v580_v27 = vld [vmem:[%s531_s22 + $0x30] sm:$0xff] (%p4095_p3) }
  0x35   : > { %577 = vst [vmem:[%s529_s23 + $0x8] sm:$0xff] %v576_v25  ;;  %v582_v28 = vld [vmem:[%s531_s22 + $0x40] sm:$0xff]  ;;  %v584_v29 = vld [vmem:[%s531_s22 + $0x50] sm:$0xff] }
  0x36   : > { %579 = vst [vmem:[%s529_s23 + $0x10] sm:$0xff] %v578_v26  ;;  %v586_v30 = vld [vmem:[%s531_s22 + $0x60] sm:$0xff]  ;;  %v588_v31 = vld [vmem:[%s531_s22 + $0x70] sm:$0xff] }
  0x37   : > { %581 = vst [vmem:[%s529_s23 + $0x18] sm:$0xff] %v580_v27 }
  0x38   : > { %583 = vst [vmem:[%s529_s23 + $0x20] sm:$0xff] %v582_v28 }
  0x39   : > { %585 = vst [vmem:[%s529_s23 + $0x28] sm:$0xff] %v584_v29 }
  0x3a   : > { %587 = vst [vmem:[%s529_s23 + $0x30] sm:$0xff] %v586_v30 }
  0x3b   : > { %589 = vst [vmem:[%s529_s23 + $0x38] sm:$0xff] %v588_v31 }
  0x3c PF: > { %595 = sbr.rel (!%p4095_p3) target bundleno = 72 (0x48), region = 188  ;;  %s597_s24 = sand.u32 (%p4095_p3), 1, %s3982_s14  }
  0x3d   : > { %s3625_s25 = sshll.u32 (%p4095_p3), %s3986_s15, 3  ;;  %s3624_s26 = sshll.u32 (%p4095_p3), %s597_s24, 6 }
  0x3e   : > { %s601_s29 = scalar_lea.vmem (%p4095_p3), %s6021_s4, %s3625_s25  ;;  %s599_s30 = scalar_lea.vmem (%p4095_p3), [#allocation6], %s3624_s26 }
  0x3f   : > { %v644_v32 = vld [vmem:[%s601_s29] sm:$0xff] (%p4095_p3)  ;;  %v646_v33 = vld [vmem:[%s601_s29 + $0x10] sm:$0xff] (%p4095_p3) }
  0x40   : > { %v648_v34 = vld [vmem:[%s601_s29 + $0x20] sm:$0xff] (%p4095_p3)  ;;  %645 = vst [vmem:[%s599_s30] sm:$0xff] (%p4095_p3), %v644_v32  ;;  %v650_v35 = vld [vmem:[%s601_s29 + $0x30] sm:$0xff] (%p4095_p3) }
  0x41   : > { %647 = vst [vmem:[%s599_s30 + $0x8] sm:$0xff] %v646_v33  ;;  %v652_v36 = vld [vmem:[%s601_s29 + $0x40] sm:$0xff]  ;;  %v654_v37 = vld [vmem:[%s601_s29 + $0x50] sm:$0xff] }
  0x42   : > { %649 = vst [vmem:[%s599_s30 + $0x10] sm:$0xff] %v648_v34  ;;  %v656_v38 = vld [vmem:[%s601_s29 + $0x60] sm:$0xff]  ;;  %v658_v39 = vld [vmem:[%s601_s29 + $0x70] sm:$0xff] }
  0x43   : > { %651 = vst [vmem:[%s599_s30 + $0x18] sm:$0xff] %v650_v35 }
  0x44   : > { %653 = vst [vmem:[%s599_s30 + $0x20] sm:$0xff] %v652_v36 }
  0x45   : > { %655 = vst [vmem:[%s599_s30 + $0x28] sm:$0xff] %v654_v37 }
  0x46   : > { %657 = vst [vmem:[%s599_s30 + $0x30] sm:$0xff] %v656_v38 }
  0x47   : > { %659 = vst [vmem:[%s599_s30 + $0x38] sm:$0xff] %v658_v39 }
  0x48 PF: > { %p3626_p5 = scmp.ge.s32.totalorder %s3986_s15, 1  ;;  %p673_p6 = scmp.lt.s32.totalorder %s3986_s15, 3 }
  0x4a   : > { %p674_p7 = pnand %p3626_p5, %p673_p6 }
  0x4c   : > { %677 = sbr.rel (%p674_p7) target bundleno = 2074 (0x81a), region = 230 }
  0x51   : > { %v3704_v40 = vld [vmem:[%s6023_s6 + $0x8] sm:$0xff]  ;;  %s680_s12 = sand.u32 1, %s3978_s13   ;;  %v3703_v41 = vld [vmem:[%s6023_s6] sm:$0xff]  ;;  %vm6029_vm0 = vcmask 261120   ;;  %s3632_s13 = sshll.u32 %s4081_s16, 3  ;;  %v1494_v56 = vlaneseq  ;;  %vm1116_vm15 = vcmask 154752  }
  0x52   : > { %s4141_s18 = sshll.u32 %s680_s12, 6  ;;  %827 = vmatpush.bf16.msra.mxu0 %v3704_v40  ;;  %p766_p8 = scmp.lt.s32.totalorder %s3632_s13, 15  ;;  %v3706_v54 = vld [vmem:[%s6025_s8 + $0x8] sm:$0xff]  ;;  %v3705_v55 = vld [vmem:[%s6025_s8] sm:$0xff] }
  0x53   : > { %s682_s23 = scalar_lea.vmem [#allocation2], %s4141_s18  ;;  %900 = vmatpush.bf16.msra.mxu1 %v3706_v54  ;;  %v4159_v57 = vshrl.u32 %v1494_v56, 7  ;;  %v4176_v3 = vld [vmem:[%s6024_s7] ss:$0 sm:$0xff]  ;;  %s3989_s22 = smov 112  }
  0x54   : > { %v776_v42 = vld [vmem:[%s682_s23] sm:$0xff]  ;;  %v777_v43 = vld [vmem:[%s682_s23 + $0x8] sm:$0xff]  ;;  %v778_v45 = vld [vmem:[%s682_s23 + $0x10] sm:$0xff]  ;;  %s6299_s13 = smov (!%p766_p8, %s3632_s13), 15  ;;  %s3994_s15 = smov 24  }
  0x55   : > { %v784_v44 = vpack.c.bf16 %v777_v43, %v776_v42  ;;  %v779_v46 = vld [vmem:[%s682_s23 + $0x18] sm:$0xff]  ;;  %v780_v48 = vld [vmem:[%s682_s23 + $0x20] sm:$0xff]  ;;  %v781_v49 = vld [vmem:[%s682_s23 + $0x28] sm:$0xff]  ;;  %6059 = vst [vmem:[#allocation7_spill] sm:$0xff] %v4159_v57  ;;  %s3633_s27 = sshll.u32 %s6299_s13, 1  ;;  %3763 = vset.pattern.permute.xlu0 %v4159_v57  ;;  %3761 = vset.pattern.permute.xlu1 %v4159_v57  ;;  %s3993_s13 = smov 32  }
  0x56   : > { %828 = vmatpush.bf16.msra.mxu0 %v3703_v41  ;;  %v785_v47 = vpack.c.bf16 %v779_v46, %v778_v45  ;;  %v786_v50 = vpack.c.bf16 %v781_v49, %v780_v48  ;;  %v782_v51 = vld [vmem:[%s682_s23 + $0x30] sm:$0xff]  ;;  %v783_v52 = vld [vmem:[%s682_s23 + $0x38] sm:$0xff]  ;;  %3762 = vset.pattern.permute.xlu2 %v4159_v57  ;;  %s4167_s30 = scalar_lea.vmem %s6022_s5, %s3633_s27  ;;  %v4195_v49 = vand.u32 127, %v1494_v56  ;;  %s4431_s23 = scalar_lea.vmem [#allocation3], %s4141_s18 }
  0x57   : > { %v787_v53 = vpack.c.bf16 %v783_v52, %v782_v51  ;;  %901 = vmatpush.bf16.msra.mxu1 %v3705_v55  ;;  %v2570_v58 = vld [vmem:[%s4167_s30 + $0xc] sm:$0x3]  ;;  %v2566_v59 = vld [vmem:[%s4167_s30 + $0x4] sm:$0x3]  ;;  %v2569_v63 = vld [vmem:[%s4167_s30 + $0xa] sm:$0x3] }
  0x58   : > { %v2704_v60 = vperm.slane %v2570_v58, 1  ;;  %v2676_v61 = vperm.slane %v2566_v59, 1  ;;  %v2565_v0 = vld [vmem:[%s4167_s30 + $0x2] sm:$0x3]  ;;  %v2697_v1 = vperm.slane %v2569_v63, 1  ;;  %v2616_v5 = vperm.slane %v2570_v58, 0 }
  0x59   : > { %3643 = vmatmul.msk.bf16.vlgmr.msra.gmra.mxu0 %vm6029_vm0, %v784_v44  ;;  %v2669_v2 = vperm.slane %v2565_v0, 1  ;;  %v2564_v7 = vld [vmem:[%s4167_s30] sm:$0x3]  ;;  %v2568_v12 = vld [vmem:[%s4167_s30 + $0x8] sm:$0x3]  ;;  %v2609_v14 = vperm.slane %v2569_v63, 0 }
  0x5a   : > { %v2662_v9 = vperm.slane %v2564_v7, 1  ;;  %v2602_v15 = vperm.slane %v2568_v12, 0  ;;  %v2571_v17 = vld [vmem:[%s4167_s30 + $0xe] sm:$0x3]  ;;  %v2588_v20 = vperm.slane %v2566_v59, 0  ;;  %v2690_v25 = vperm.slane %v2568_v12, 1 }
  0x5b   : > { %v2711_v19 = vperm.slane %v2571_v17, 1  ;;  %v2567_v22 = vld [vmem:[%s4167_s30 + $0x6] sm:$0x3]  ;;  %v2581_v27 = vperm.slane %v2565_v0, 0  ;;  %v2574_v28 = vperm.slane %v2564_v7, 0  ;;  %v2623_v36 = vperm.slane %v2571_v17, 0 }
  0x5c   : > { %v2595_v24 = vperm.slane %v2567_v22, 0  ;;  %v2683_v32 = vperm.slane %v2567_v22, 1  ;;  %6060 = vst [vmem:[#allocation8_spill] sm:$0xff] %v4195_v49  ;;  %s3995_s24 = smov 8   ;;  %s6047_s25 = smov 56  }
  0x5d   : > { %2709 = vperm.xlu1 %3761, %v2704_v60   ;;  %2681 = vperm.xlu0 %3763, %v2676_v61   ;;  %s3997_s26 = smov 16   ;;  %s3998_s27 = smov 64  }
  0x5e   : > { %2716 = vperm.xlu2 %3762, %v2711_v19   ;;  %s3999_s28 = smov 80   ;;  %s4000_s29 = smov 40  }
  0x5f   : > { %s4001_s30 = smov 88   ;;  %s4002_s21 = smov 104  }
  0x60   : > { %s4003_s11 = smov 48   ;;  %s4004_s12 = smov 72  }
  0x61   : > { %s4005_s19 = smov 96   ;;  %p771_p9 = scmp.lt.s32.totalorder %s4081_s16, 1 }
  0x63   : > { %s6301_s16 = smov (!%p771_p9, %s4081_s16), 1 }
  0x65   : > { %2702 = vperm.xlu1 %3761, %v2697_v1   ;;  %2674 = vperm.xlu0 %3763, %v2669_v2  }
  0x66   : > { %2695 = vperm.xlu2 %3762, %v2690_v25  }
  0x69   : > { %3644 = vmatmul.msk.bf16.gmra.mxu0 %vm6029_vm0, %v785_v47 }
  0x6d   : > { %2621 = vperm.xlu0 %3763, %v2616_v5   ;;  %2667 = vperm.xlu1 %3761, %v2662_v9  }
  0x6e   : > { %2688 = vperm.xlu2 %3762, %v2683_v32  }
  0x75   : > { %2614 = vperm.xlu0 %3763, %v2609_v14   ;;  %2607 = vperm.xlu1 %3761, %v2602_v15  }
  0x76   : > { %2628 = vperm.xlu2 %3762, %v2623_v36   ;;  %v4224_v36 = vld [vmem:[%s6026_s9] ss:$0 sm:$0xff] }
  0x79   : > { %3645 = vmatmul.msk.bf16.gmra.mxu0 %vm6029_vm0, %v786_v50 }
  0x7d   : > { %2600 = vperm.xlu0 %3763, %v2595_v24   ;;  %2593 = vperm.xlu1 %3761, %v2588_v20  }
  0x85   : > { %2586 = vperm.xlu0 %3763, %v2581_v27   ;;  %2579 = vperm.xlu1 %3761, %v2574_v28  }
  0x89   : > { %3646 = vmatmul.msk.bf16.gmra.mxu0 %vm6029_vm0, %v787_v53  ;;  %v6034_v53 = vmov 0.0  }
  0xb8   : > { %v2717_v50 = vpop.permute.xlu2 %2716 }
  0xb9   : > { %vm2725_vm2 = vcmp.eq.s32.totalorder %v2717_v50, %v4195_v49 }
  0xba   : > { %v3674_v55 = vsel %vm2725_vm2, 1.0, %v6034_v53 }
  0xbb   : > { %v2749_v56 = vpack.c.bf16 %v3674_v55, %v3674_v55 }
  0xc0   : > { %v2696_v58 = vpop.permute.xlu2 %2695 }
  0xc1   : > { %vm2722_vm5 = vcmp.eq.s32.totalorder %v2696_v58, %v4195_v49 }
  0xc2   : > { %v3671_v61 = vsel %vm2722_vm5, 1.0, %v6034_v53 }
  0xc3   : > { %v2746_v2 = vpack.c.bf16 %v3671_v61, %v3671_v61 }
  0xc5   : > { %v2786_v9 = vunpack.c.l.b16 %v2746_v2 }
  0xcf   : > { %v2710_v47 = vpop.permute.xlu1 %2709  ;;  %v2682_v48 = vpop.permute.xlu0 %2681 }
  0xd0   : > { %vm2724_vm1 = vcmp.eq.s32.totalorder %v2710_v47, %v4195_v49  ;;  %vm2720_vm4 = vcmp.eq.s32.totalorder %v2682_v48, %v4195_v49 }
  0xd1   : > { %v3673_v54 = vsel %vm2724_vm1, 1.0, %v6034_v53  ;;  %vm6030_vm1 = vcmask 130048  }
  0xd2   : > { %v2748_v59 = vpack.c.bf16 %v3673_v54, %v3673_v54 }
  0xd6   : > { %v830_v62 = vpop.f32.mrf.mxu0 }
  0xd7   : > { %v831_v4 = vadd.f32 %v4176_v3, %v830_v62  ;;  %v2703_v51 = vpop.permute.xlu1 %2702  ;;  %v2675_v52 = vpop.permute.xlu0 %2674  ;;  %v3669_v62 = vsel %vm2720_vm4, 1.0, %v6034_v53  ;;  %vm6028_vm4 = vcmask 23552  }
  0xd8   : > { %vm2723_vm3 = vcmp.eq.s32.totalorder %v2703_v51, %v4195_v49  ;;  %vm2719_vm6 = vcmp.eq.s32.totalorder %v2675_v52, %v4195_v49 }
  0xd9   : > { %3832 = vtanh.f32 %v831_v4  ;;  %v3672_v60 = vsel %vm2723_vm3, 1.0, %v6034_v53  ;;  %v2789_v4 = vunpack.c.l.b16 %v2749_v56  ;;  %v3668_v7 = vsel %vm2719_vm6, 1.0, %v6034_v53 }
  0xda   : > { %v2747_v1 = vpack.c.bf16 %v3672_v60, %v3672_v60  ;;  %v2743_v15 = vpack.c.bf16 %v3668_v7, %v3668_v7 }
  0xdc   : > { %v2783_v28 = vunpack.c.l.b16 %v2743_v15 }
  0xde   : > { %v832_v6 = vpop.f32.mrf.mxu0 }
  0xdf   : > { %v833_v8 = vadd.f32 %v4176_v3, %v832_v6  ;;  %v3833_v10 = vpop.eup %3832  ;;  %v2622_v63 = vpop.permute.xlu0 %2621  ;;  %v2744_v6 = vpack.c.bf16 %v3669_v62, %v3669_v62 }
  0xe0   : > { %v2668_v0 = vpop.permute.xlu1 %2667  ;;  %vm2636_vm8 = vcmp.eq.s32.totalorder %v2622_v63, %v4195_v49 }
  0xe1   : > { %3834 = vtanh.f32 %v833_v8  ;;  %vm2718_vm7 = vcmp.eq.s32.totalorder %v2668_v0, %v4195_v49  ;;  %v2689_v8 = vpop.permute.xlu2 %2688  ;;  %v2784_v20 = vunpack.c.l.b16 %v2744_v6 }
  0xe2   : > { %vm2721_vm9 = vcmp.eq.s32.totalorder %v2689_v8, %v4195_v49 }
  0xe3   : > { %v3670_v12 = vsel %vm2721_vm9, 1.0, %v6034_v53 }
  0xe6   : > { %v835_v11 = vpop.f32.mrf.mxu0 }
  0xe7   : > { %v3835_v13 = vpop.eup %3834  ;;  %v836_v18 = vadd.f32 %v4176_v3, %v835_v11  ;;  %v3667_v11 = vsel %vm2718_vm7, 1.0, %v6034_v53  ;;  %v2615_v17 = vpop.permute.xlu0 %2614 }
  0xe8   : > { %v858_v16 = vpack.c.bf16 %v3835_v13, %v3833_v10  ;;  %v2787_v10 = vunpack.c.l.b16 %v2747_v1  ;;  %v2745_v13 = vpack.c.bf16 %v3670_v12, %v3670_v12  ;;  %v2742_v19 = vpack.c.bf16 %v3667_v11, %v3667_v11 }
  0xe9   : > { %3836 = vtanh.f32 %v836_v18  ;;  %v2608_v18 = vpop.permute.xlu1 %2607  ;;  %vm2635_vm10 = vcmp.eq.s32.totalorder %v2615_v17, %v4195_v49  ;;  %v2629_v25 = vpop.permute.xlu2 %2628 }
  0xea   : > { %3655 = vmatmul.msk.bf16.vlgmr.msra.gmra.mxu1 %vm6029_vm0, %v858_v16  ;;  %v2792_v14 = vpack.c.b16 %v2787_v10, %v2786_v9  ;;  %v3665_v16 = vsel %vm2636_vm8, 1.0, %v6034_v53  ;;  %vm2634_vm11 = vcmp.eq.s32.totalorder %v2608_v18, %v4195_v49  ;;  %v3664_v24 = vsel %vm2635_vm10, 1.0, %v6034_v53 }
  0xeb   : > { %vm2637_vm12 = vcmp.eq.s32.totalorder %v2629_v25, %v4195_v49  ;;  %v2782_v27 = vunpack.c.l.b16 %v2742_v19  ;;  %v2659_v32 = vpack.c.bf16 %v3664_v24, %v3664_v24 }
  0xed   : > { %v2763_v47 = vunpack.c.l.b16 %v2659_v32 }
  0xee   : > { %v837_v21 = vpop.f32.mrf.mxu0 }
  0xef   : > { %v838_v23 = vadd.f32 %v4176_v3, %v837_v21  ;;  %v3837_v26 = vpop.eup %3836  ;;  %v2785_v21 = vunpack.c.l.b16 %v2745_v13 }
  0xf1   : > { %3838 = vtanh.f32 %v838_v23  ;;  %v2791_v22 = vpack.c.b16 %v2785_v21, %v2784_v20  ;;  %v2660_v23 = vpack.c.bf16 %v3665_v16, %v3665_v16 }
  0xf6   : > { %v840_v29 = vpop.f32.mrf.mxu0 }
  0xf7   : > { %v3839_v30 = vpop.eup %3838  ;;  %v841_v33 = vadd.f32 %v4176_v3, %v840_v29  ;;  %v3666_v29 = vsel %vm2637_vm12, 1.0, %v6034_v53 }
  0xf8   : > { %v859_v31 = vpack.c.bf16 %v3839_v30, %v3837_v26  ;;  %v3663_v26 = vsel %vm2634_vm11, 1.0, %v6034_v53  ;;  %v2661_v30 = vpack.c.bf16 %v3666_v29, %v3666_v29 }
  0xf9   : > { %3840 = vtanh.f32 %v841_v33  ;;  %v2658_v33 = vpack.c.bf16 %v3663_v26, %v3663_v26 }
  0xfa   : > { %3656 = vmatmul.msk.bf16.gmra.mxu1 %vm6029_vm0, %v859_v31  ;;  %v2790_v31 = vpack.c.b16 %v2783_v28, %v2782_v27 }
  0xfe   : > { %v842_v34 = vpop.f32.mrf.mxu0 }
  0xff   : > { %v843_v35 = vadd.f32 %v4176_v3, %v842_v34  ;;  %v3841_v37 = vpop.eup %3840  ;;  %v2601_v34 = vpop.permute.xlu0 %2600 }
 0x100   : > { %vm2633_vm13 = vcmp.eq.s32.totalorder %v2601_v34, %v4195_v49 }
 0x101   : > { %3842 = vtanh.f32 %v843_v35  ;;  %v2594_v35 = vpop.permute.xlu1 %2593 }
 0x102   : > { %vm2632_vm14 = vcmp.eq.s32.totalorder %v2594_v35, %v4195_v49 }
 0x106   : > { %v845_v38 = vpop.f32.mrf.mxu0 }
 0x107   : > { %v3843_v39 = vpop.eup %3842  ;;  %v846_v41 = vadd.f32 %v4176_v3, %v845_v38  ;;  %v2765_v38 = vunpack.c.l.b16 %v2661_v30  ;;  %v2587_v52 = vpop.permute.xlu0 %2586 }
 0x108   : > { %v860_v40 = vpack.c.bf16 %v3843_v39, %v3841_v37  ;;  %v2764_v37 = vunpack.c.l.b16 %v2660_v23  ;;  %v3662_v39 = vsel %vm2633_vm13, 1.0, %v6034_v53  ;;  %vm2631_vm2 = vcmp.eq.s32.totalorder %v2587_v52, %v4195_v49 }
 0x109   : > { %3844 = vtanh.f32 %v846_v41  ;;  %v2580_v54 = vpop.permute.xlu1 %2579 }
 0x10a   : > { %3657 = vmatmul.msk.bf16.gmra.mxu1 %vm6029_vm0, %v860_v40  ;;  %v3661_v40 = vsel %vm2632_vm14, 1.0, %v6034_v53  ;;  %v2769_v41 = vpack.c.b16 %v2765_v38, %v2764_v37  ;;  %vm2630_vm3 = vcmp.eq.s32.totalorder %v2580_v54, %v4195_v49 }
 0x10b   : > { %v3659_v56 = vsel %vm2630_vm3, 1.0, %v6034_v53 }
 0x10c   : > { %v2654_v61 = vpack.c.bf16 %v3659_v56, %v3659_v56 }
 0x10e   : > { %v847_v42 = vpop.f32.mrf.mxu0  ;;  %v2758_v1 = vunpack.c.l.b16 %v2654_v61 }
 0x10f   : > { %v848_v43 = vadd.f32 %v4176_v3, %v847_v42  ;;  %v3845_v44 = vpop.eup %3844  ;;  %v2788_v3 = vunpack.c.l.b16 %v2748_v59  ;;  %v3660_v59 = vsel %vm2631_vm2, 1.0, %v6034_v53 }
 0x110   : > { %v2655_v60 = vpack.c.bf16 %v3660_v59, %v3660_v59 }
 0x111   : > { %3846 = vtanh.f32 %v848_v43  ;;  %v2793_v5 = vpack.c.b16 %v2789_v4, %v2788_v3  ;;  %v2657_v43 = vpack.c.bf16 %v3662_v39, %v3662_v39 }
 0x112   : > { %v2759_v2 = vunpack.c.l.b16 %v2655_v60 }
 0x113   : > { %2798 = vmatpush.bf16.msra.mxu2 %v2793_v5  ;;  %3707 = vmatpush.bf16.msra.mxu3 %v2793_v5  ;;  %v2761_v58 = vunpack.c.l.b16 %v2657_v43 }
 0x114   : > { %v2766_v5 = vpack.c.b16 %v2759_v2, %v2758_v1 }
 0x117   : > { %v3847_v45 = vpop.eup %3846  ;;  %2799 = vmatpush.bf16.msra.mxu2 %v2792_v14  ;;  %3708 = vmatpush.bf16.msra.mxu3 %v2792_v14 }
 0x118   : > { %v861_v46 = vpack.c.bf16 %v3847_v45, %v3845_v44  ;;  %v2656_v45 = vpack.c.bf16 %v3661_v40, %v3661_v40 }
 0x11a   : > { %3658 = vmatmul.msk.bf16.gmra.mxu1 %vm6029_vm0, %v861_v46  ;;  %v2762_v46 = vunpack.c.l.b16 %v2658_v33  ;;  %v2760_v55 = vunpack.c.l.b16 %v2656_v45 }
 0x11b   : > { %2800 = vmatpush.bf16.msra.mxu2 %v2791_v22  ;;  %3709 = vmatpush.bf16.msra.mxu3 %v2791_v22 }
 0x11c   : > { %v2768_v51 = vpack.c.b16 %v2763_v47, %v2762_v46  ;;  %v2767_v62 = vpack.c.b16 %v2761_v58, %v2760_v55 }
 0x11f   : > { %2801 = vmatpush.bf16.msra.mxu2 %v2790_v31  ;;  %3710 = vmatpush.bf16.msra.mxu3 %v2790_v31 }
 0x123   : > { %2802 = vmatpush.bf16.msra.mxu2 %v2769_v41  ;;  %3711 = vmatpush.bf16.msra.mxu3 %v2769_v41 }
 0x127   : > { %2803 = vmatpush.bf16.msra.mxu2 %v2768_v51  ;;  %3712 = vmatpush.bf16.msra.mxu3 %v2768_v51 }
 0x12b   : > { %2804 = vmatpush.bf16.msra.mxu2 %v2767_v62  ;;  %3713 = vmatpush.bf16.msra.mxu3 %v2767_v62 }
 0x12f   : > { %2805 = vmatpush.bf16.msra.mxu2 %v2766_v5  ;;  %3714 = vmatpush.bf16.msra.mxu3 %v2766_v5 }
 0x167   : > { %v903_v42 = vpop.f32.mrf.mxu1 }
 0x168   : > { %v4231_v44 = vadd.f32 %v4224_v36, %v903_v42 }
 0x16a   : > { %v1117_v48 = vsel %vm1116_vm15, %v4231_v44, -inf  ;;  %v924_v50 = vsel %vm6030_vm1, %v4231_v44, -inf }
 0x16b   : > { %1118 = vmax.xlane.f32.xlu1 %v1117_v48  ;;  %925 = vmax.xlane.f32.xlu0 %v924_v50 }
 0x16f   : > { %v905_v63 = vpop.f32.mrf.mxu1 }
 0x170   : > { %v4242_v0 = vadd.f32 %v4224_v36, %v905_v63 }
 0x172   : > { %v1120_v3 = vsel %vm1116_vm15, %v4242_v0, -inf  ;;  %v927_v4 = vsel %vm6030_vm1, %v4242_v0, -inf }
 0x173   : > { %1121 = vmax.xlane.f32.xlu2 %v1120_v3  ;;  %928 = vmax.xlane.f32.xlu0 %v927_v4 }
 0x177   : > { %v908_v6 = vpop.f32.mrf.mxu1 }
 0x178   : > { %v4249_v7 = vadd.f32 %v4224_v36, %v908_v6 }
 0x17a   : > { %v930_v8 = vsel %vm6030_vm1, %v4249_v7, -inf  ;;  %v1123_v9 = vsel %vm1116_vm15, %v4249_v7, -inf }
 0x17b   : > { %931 = vmax.xlane.f32.xlu1 %v930_v8  ;;  %1124 = vmax.xlane.f32.xlu0 %v1123_v9 }
 0x17f   : > { %v910_v10 = vpop.f32.mrf.mxu1 }
 0x180   : > { %v4256_v11 = vadd.f32 %v4224_v36, %v910_v10 }
 0x182   : > { %v933_v12 = vsel %vm6030_vm1, %v4256_v11, -inf  ;;  %v1126_v15 = vsel %vm1116_vm15, %v4256_v11, -inf }
 0x183   : > { %934 = vmax.xlane.f32.xlu1 %v933_v12 }
 0x187   : > { %v913_v13 = vpop.f32.mrf.mxu1 }
 0x188   : > { %v4261_v14 = vadd.f32 %v4224_v36, %v913_v13 }
 0x18a   : > { %v936_v16 = vsel %vm6030_vm1, %v4261_v14, -inf  ;;  %v1129_v19 = vsel %vm1116_vm15, %v4261_v14, -inf }
 0x18b   : > { %937 = vmax.xlane.f32.xlu2 %v936_v16  ;;  %1127 = vmax.xlane.f32.xlu1 %v1126_v15 }
 0x18f   : > { %v915_v17 = vpop.f32.mrf.mxu1 }
 0x190   : > { %v4268_v18 = vadd.f32 %v4224_v36, %v915_v17 }
 0x192   : > { %v1132_v20 = vsel %vm1116_vm15, %v4268_v18, -inf  ;;  %v939_v23 = vsel %vm6030_vm1, %v4268_v18, -inf }
 0x193   : > { %1130 = vmax.xlane.f32.xlu2 %v1129_v19  ;;  %1133 = vmax.xlane.f32.xlu0 %v1132_v20 }
 0x197   : > { %v918_v21 = vpop.f32.mrf.mxu1 }
 0x198   : > { %v4275_v22 = vadd.f32 %v4224_v36, %v918_v21 }
 0x19a   : > { %v1135_v24 = vsel %vm1116_vm15, %v4275_v22, -inf  ;;  %v942_v25 = vsel %vm6030_vm1, %v4275_v22, -inf }
 0x19b   : > { %940 = vmax.xlane.f32.xlu2 %v939_v23  ;;  %1136 = vmax.xlane.f32.xlu1 %v1135_v24 }
 0x19c   : > { %943 = vmax.xlane.f32.xlu0 %v942_v25 }
 0x19f   : > { %v920_v26 = vpop.f32.mrf.mxu1 }
 0x1a0   : > { %v4284_v27 = vadd.f32 %v4224_v36, %v920_v26 }
 0x1a2   : > { %v1138_v28 = vsel %vm1116_vm15, %v4284_v27, -inf  ;;  %v945_v29 = vsel %vm6030_vm1, %v4284_v27, -inf }
 0x1a3   : > { %1139 = vmax.xlane.f32.xlu2 %v1138_v28  ;;  %946 = vmax.xlane.f32.xlu1 %v945_v29 }
 0x1de   : > { %v1119_v30 = vpop.xlane.xlu1 %1118  ;;  %v926_v31 = vpop.xlane.xlu0 %925 }
 0x1df   : > { %v1141_v32 = vsub.f32 %v4231_v44, %v1119_v30  ;;  %v948_v33 = vsub.f32 %v4231_v44, %v926_v31 }
 0x1e1   : > { %v1149_v34 = vmul.f32 1.442695, %v1141_v32  ;;  %v956_v35 = vmul.f32 1.442695, %v948_v33 }
 0x1e3   : > { %3848 = vpow2.f32 %v1149_v34 }
 0x1e4   : > { %3850 = vpow2.f32 %v956_v35 }
 0x1e6   : > { %v1122_v36 = vpop.xlane.xlu2 %1121  ;;  %v929_v38 = vpop.xlane.xlu0 %928 }
 0x1e7   : > { %v1142_v37 = vsub.f32 %v4242_v0, %v1122_v36  ;;  %v949_v47 = vsub.f32 %v4242_v0, %v929_v38 }
 0x1e9   : > { %v4293_v39 = vpop.eup %3848  ;;  %v1151_v40 = vmul.f32 1.442695, %v1142_v37  ;;  %v958_v51 = vmul.f32 1.442695, %v949_v47 }
 0x1ea   : > { %v4295_v41 = vpop.eup %3850  ;;  %1173 = vrot.lane.b32.xlu0 %v4293_v39, %s3989_s22 }
 0x1eb   : > { %3852 = vpow2.f32 %v1151_v40  ;;  %v972_v42 = vsel %vm6030_vm1, %v4295_v41, 0.0 }
 0x1ec   : > { %973 = vadd.xlane.f32.xlu2 %v972_v42 }
 0x1ee   : > { %v1125_v44 = vpop.xlane.xlu0 %1124  ;;  %v932_v48 = vpop.xlane.xlu1 %931 }
 0x1ef   : > { %v1143_v45 = vsub.f32 %v4249_v7, %v1125_v44  ;;  %v950_v52 = vsub.f32 %v4249_v7, %v932_v48 }
 0x1f1   : > { %v4301_v43 = vpop.eup %3852  ;;  %v1153_v46 = vmul.f32 1.442695, %v1143_v45  ;;  %v960_v55 = vmul.f32 1.442695, %v950_v52 }
 0x1f2   : > { %1175 = vrot.lane.b32.xlu1 %v4301_v43, %s3989_s22 }
 0x1f3   : > { %3854 = vpow2.f32 %v1153_v46 }
 0x1f4   : > { %3856 = vpow2.f32 %v958_v51 }
 0x1f5   : > { %3858 = vpow2.f32 %v960_v55 }
 0x1f6   : > { %v935_v54 = vpop.xlane.xlu1 %934 }
 0x1f7   : > { %v951_v62 = vsub.f32 %v4256_v11, %v935_v54 }
 0x1f9   : > { %v4307_v50 = vpop.eup %3854  ;;  %v962_v1 = vmul.f32 1.442695, %v951_v62 }
 0x1fa   : > { %v4312_v58 = vpop.eup %3856 }
 0x1fb   : > { %v975_v59 = vsel %vm6030_vm1, %v4312_v58, 0.0  ;;  %v4316_v60 = vpop.eup %3858 }
 0x1fc   : > { %v978_v63 = vsel %vm6030_vm1, %v4316_v60, 0.0 }
 0x1fe   : > { %v1128_v56 = vpop.xlane.xlu1 %1127  ;;  %v938_v6 = vpop.xlane.xlu2 %937 }
 0x1ff   : > { %v1144_v61 = vsub.f32 %v4256_v11, %v1128_v56  ;;  %v952_v13 = vsub.f32 %v4261_v14, %v938_v6 }
 0x201   : > { %v1155_v0 = vmul.f32 1.442695, %v1144_v61  ;;  %v964_v16 = vmul.f32 1.442695, %v952_v13 }
 0x203   : > { %3860 = vpow2.f32 %v1155_v0 }
 0x204   : > { %1177 = vrot.lane.b32.xlu2 %v4307_v50, %s3989_s22  ;;  %3862 = vpow2.f32 %v962_v1 }
 0x206   : > { %v1134_v2 = vpop.xlane.xlu0 %1133  ;;  %v1131_v9 = vpop.xlane.xlu2 %1130 }
 0x207   : > { %v1146_v3 = vsub.f32 %v4268_v18, %v1134_v2  ;;  %v1145_v11 = vsub.f32 %v4261_v14, %v1131_v9  ;;  %v3990_v2 = vmov 16  }
 0x208   : > { %3764 = vset.pattern.permute.xlu2 %v3990_v2 }
 0x209   : > { %v4323_v4 = vpop.eup %3860  ;;  %v1159_v7 = vmul.f32 1.442695, %v1146_v3  ;;  %v1157_v12 = vmul.f32 1.442695, %v1145_v11  ;;  %v3991_v3 = vmov 18  }
 0x20a   : > { %v4327_v5 = vpop.eup %3862  ;;  %3765 = vset.pattern.permute.xlu1 %v3991_v3  ;;  %3768 = vset.pattern.permute.xlu0 %v3991_v3 }
 0x20b   : > { %6061 = vst [vmem:[#allocation9_spill] sm:$0xff] %v4327_v5  ;;  %v981_v8 = vsel %vm6030_vm1, %v4327_v5, 0.0  ;;  %3864 = vpow2.f32 %v1159_v7 }
 0x20c   : > { %3866 = vpow2.f32 %v1157_v12 }
 0x20d   : > { %3868 = vpow2.f32 %v964_v16 }
 0x20e   : > { %v941_v17 = vpop.xlane.xlu2 %940  ;;  %v1137_v24 = vpop.xlane.xlu1 %1136 }
 0x20f   : > { %v953_v19 = vsub.f32 %v4268_v18, %v941_v17  ;;  %v1147_v14 = vsub.f32 %v4275_v22, %v1137_v24  ;;  %v944_v25 = vpop.xlane.xlu0 %943 }
 0x210   : > { %v954_v29 = vsub.f32 %v4275_v22, %v944_v25 }
 0x211   : > { %v4331_v10 = vpop.eup %3864  ;;  %v966_v21 = vmul.f32 1.442695, %v953_v19  ;;  %v1161_v28 = vmul.f32 1.442695, %v1147_v14 }
 0x212   : > { %v4337_v15 = vpop.eup %3866  ;;  %v968_v30 = vmul.f32 1.442695, %v954_v29 }
 0x213   : > { %v4342_v20 = vpop.eup %3868  ;;  %3870 = vpow2.f32 %v966_v21 }
 0x214   : > { %976 = vadd.xlane.f32.xlu0 %v975_v59  ;;  %v984_v23 = vsel %vm6030_vm1, %v4342_v20, 0.0  ;;  %3872 = vpow2.f32 %v1161_v28 }
 0x215   : > { %3874 = vpow2.f32 %v968_v30 }
 0x216   : > { %v1140_v35 = vpop.xlane.xlu2 %1139  ;;  %v947_v38 = vpop.xlane.xlu1 %946 }
 0x217   : > { %v1148_v36 = vsub.f32 %v4284_v27, %v1140_v35  ;;  %v955_v40 = vsub.f32 %v4284_v27, %v947_v38 }
 0x219   : > { %v4347_v26 = vpop.eup %3870  ;;  %v1163_v37 = vmul.f32 1.442695, %v1148_v36  ;;  %v970_v42 = vmul.f32 1.442695, %v955_v40 }
 0x21a   : > { %6062 = vst [vmem:[#allocation10_spill] sm:$0xff] %v4347_v26  ;;  %v987_v18 = vsel %vm6030_vm1, %v4347_v26, 0.0  ;;  %v4352_v32 = vpop.eup %3872 }
 0x21b   : > { %v4357_v34 = vpop.eup %3874  ;;  %3876 = vpow2.f32 %v1163_v37 }
 0x21c   : > { %979 = vadd.xlane.f32.xlu1 %v978_v63  ;;  %6063 = vst [vmem:[#allocation11_spill] sm:$0xff] %v4357_v34  ;;  %v990_v22 = vsel %vm6030_vm1, %v4357_v34, 0.0  ;;  %3878 = vpow2.f32 %v970_v42 }
 0x221   : > { %v4363_v44 = vpop.eup %3876 }
 0x222   : > { %v4367_v45 = vpop.eup %3878 }
 0x223   : > { %v993_v47 = vsel %vm6030_vm1, %v4367_v45, 0.0 }
 0x228   : > { %1179 = vrot.lane.b32.xlu0 %v4323_v4, %s3989_s22 }
 0x22d   : > { %982 = vadd.xlane.f32.xlu2 %v981_v8 }
 0x235   : > { %1183 = vrot.lane.b32.xlu1 %v4331_v10, %s3989_s22 }
 0x245   : > { %1181 = vrot.lane.b32.xlu2 %v4337_v15, %s3989_s22 }
 0x252   : > { %985 = vadd.xlane.f32.xlu0 %v984_v23 }
 0x25c   : > { %v1174_v31 = vpop.permute.xlu0 %1173 }
 0x25d   : > { %v1198_v33 = vsel %vm6028_vm4, %v1174_v31, 0.0  ;;  %v3992_v31 = vmov 17  }
 0x25f   : > { %988 = vadd.xlane.f32.xlu1 %v987_v18  ;;  %v4369_v46 = vpop.xlane.xlu2 %973 }
 0x264   : > { %v1176_v51 = vpop.permute.xlu1 %1175 }
 0x265   : > { %v1201_v27 = vsel %vm6028_vm4, %v1176_v51, 0.0 }
 0x266   : > { %1185 = vrot.lane.b32.xlu0 %v4352_v32, %s3989_s22 }
 0x267   : > { %1199 = vadd.xlane.f32.xlu1 %v1198_v33  ;;  %v1178_v52 = vpop.permute.xlu2 %1177 }
 0x268   : > { %v1204_v63 = vsel %vm6028_vm4, %v1178_v52, 0.0 }
 0x26e   : > { %991 = vadd.xlane.f32.xlu2 %v990_v22 }
 0x286   : > { %1187 = vrot.lane.b32.xlu2 %v4363_v44, %s3989_s22 }
 0x287   : > { %v4373_v48 = vpop.xlane.xlu0 %976 }
 0x28f   : > { %v4380_v62 = vpop.xlane.xlu1 %979 }
 0x290   : > { %994 = vadd.xlane.f32.xlu0 %v993_v47 }
 0x298   : > { %1202 = vadd.xlane.f32.xlu0 %v1201_v27 }
 0x29a   : > { %v1180_v54 = vpop.permute.xlu0 %1179 }
 0x29b   : > { %v1207_v55 = vsel %vm6028_vm4, %v1180_v54, 0.0 }
 0x29c   : > { %1208 = vadd.xlane.f32.xlu1 %v1207_v55 }
 0x2a0   : > { %v4377_v59 = vpop.xlane.xlu2 %982 }
 0x2a7   : > { %v1184_v0 = vpop.permute.xlu1 %1183 }
 0x2a8   : > { %v1182_v56 = vpop.permute.xlu2 %1181  ;;  %v1213_v1 = vsel %vm6028_vm4, %v1184_v0, 0.0 }
 0x2a9   : > { %v1210_v61 = vsel %vm6028_vm4, %v1182_v56, 0.0 }
 0x2aa   : > { %1211 = vadd.xlane.f32.xlu0 %v1210_v61 }
 0x2af   : > { %1205 = vadd.xlane.f32.xlu2 %v1204_v63 }
 0x2b7   : > { %1214 = vadd.xlane.f32.xlu2 %v1213_v1 }
 0x2c5   : > { %v4387_v6 = vpop.xlane.xlu0 %985 }
 0x2d2   : > { %v4389_v7 = vpop.xlane.xlu1 %988 }
 0x2d3   : > { %6064 = vst [vmem:[#allocation12_spill] sm:$0xff] %v4389_v7 }
 0x2d8   : > { %v1186_v8 = vpop.permute.xlu0 %1185 }
 0x2d9   : > { %v1216_v9 = vsel %vm6028_vm4, %v1186_v8, 0.0 }
 0x2da   : > { %v1200_v11 = vpop.xlane.xlu1 %1199  ;;  %1217 = vadd.xlane.f32.xlu1 %v1216_v9 }
 0x2db   : > { %3880 = vrcp.f32 %v1200_v11  ;;  %v1233_v19 = vand.u32 2147483648, %v1200_v11  ;;  %v1231_v23 = vand.u32 2147483647, %v1200_v11  ;;  %vm1227_vm6 = vweird.f32 %v1200_v11 }
 0x2dd   : > { %v1234_v25 = vor.u32 1.1754944e-38, %v1233_v19  ;;  %vm1232_vm8 = vcmp.eq.f32.partialorder %v1231_v23, 8.507059e+37 }
 0x2e1   : > { %v3881_v12 = vpop.eup %3880  ;;  %v4392_v13 = vpop.xlane.xlu2 %991 }
 0x2e2   : > { %6065 = vst [vmem:[#allocation13_spill] sm:$0xff] %v4392_v13  ;;  %v1223_v16 = vmul.f32 %v3881_v12, %v1200_v11  ;;  %vm1228_vm5 = vweird.f32 %v3881_v12 }
 0x2e3   : > { %vm1229_vm7 = vmor %vm1227_vm6, %vm1228_vm5 }
 0x2e4   : > { %v1224_v17 = vsub.f32 1.0, %v1223_v16 }
 0x2e6   : > { %v1225_v21 = vmul.f32 %v3881_v12, %v1224_v17 }
 0x2e8   : > { %v1226_v24 = vadd.f32 %v3881_v12, %v1225_v21 }
 0x2e9   : > { %v1188_v14 = vpop.permute.xlu2 %1187 }
 0x2ea   : > { %v1219_v28 = vsel %vm6028_vm4, %v1188_v14, 0.0  ;;  %v1230_v29 = vsel %vm1229_vm7, %v3881_v12, %v1226_v24 }
 0x2eb   : > { %1220 = vadd.xlane.f32.xlu0 %v1219_v28  ;;  %v1235_v18 = vsel %vm1232_vm8, %v1234_v25, %v1230_v29 }
 0x2ec   : > { %v1236_v30 = vmul.f32 %v4293_v39, %v1235_v18 }
 0x2ee   : > { %1344 = vperm.xlu2 %3764, %v1236_v30  }
 0x2f3   : > { %1399 = vperm.xlu1 %3765, %v1236_v30  }
 0x2f6   : > { %3766 = vset.pattern.permute.xlu2 %v3992_v31 }
 0x2f7   : > { %1447 = vperm.xlu2 %3766, %v1236_v30  }
 0x2fb   : > { %3767 = vset.pattern.permute.xlu1 %v3990_v2 }
 0x2ff   : > { %3771 = vset.pattern.permute.xlu2 %v3991_v3 }
 0x303   : > { %v4399_v33 = vpop.xlane.xlu0 %994 }
 0x30b   : > { %v1203_v22 = vpop.xlane.xlu0 %1202 }
 0x30c   : > { %3882 = vrcp.f32 %v1203_v22  ;;  %v1248_v40 = vand.u32 2147483648, %v1203_v22  ;;  %v1246_v47 = vand.u32 2147483647, %v1203_v22  ;;  %vm1242_vm10 = vweird.f32 %v1203_v22 }
 0x30e   : > { %v1249_v52 = vor.u32 1.1754944e-38, %v1248_v40  ;;  %vm1247_vm12 = vcmp.eq.f32.partialorder %v1246_v47, 8.507059e+37 }
 0x30f   : > { %v1209_v35 = vpop.xlane.xlu1 %1208 }
 0x310   : > { %3884 = vrcp.f32 %v1209_v35  ;;  %v1278_v12 = vand.u32 2147483648, %v1209_v35  ;;  %vm1272_vm14 = vweird.f32 %v1209_v35  ;;  %v1276_v17 = vand.u32 2147483647, %v1209_v35 }
 0x312   : > { %v3883_v36 = vpop.eup %3882  ;;  %v1279_v21 = vor.u32 1.1754944e-38, %v1278_v12  ;;  %vm1277_vm2 = vcmp.eq.f32.partialorder %v1276_v17, 8.507059e+37 }
 0x313   : > { %v1238_v37 = vmul.f32 %v3883_v36, %v1203_v22  ;;  %vm1243_vm9 = vweird.f32 %v3883_v36 }
 0x314   : > { %vm1244_vm11 = vmor %vm1242_vm10, %vm1243_vm9 }
 0x315   : > { %v1239_v38 = vsub.f32 1.0, %v1238_v37 }
 0x316   : > { %v3885_v39 = vpop.eup %3884 }
 0x317   : > { %v1240_v42 = vmul.f32 %v3883_v36, %v1239_v38  ;;  %v1268_v51 = vmul.f32 %v3885_v39, %v1209_v35  ;;  %vm1273_vm13 = vweird.f32 %v3885_v39 }
 0x318   : > { %vm1274_vm15 = vmor %vm1272_vm14, %vm1273_vm13 }
 0x319   : > { %v1241_v27 = vadd.f32 %v3883_v36, %v1240_v42  ;;  %v1269_v56 = vsub.f32 1.0, %v1268_v51 }
 0x31b   : > { %v1245_v54 = vsel %vm1244_vm11, %v3883_v36, %v1241_v27  ;;  %v1270_v0 = vmul.f32 %v3885_v39, %v1269_v56 }
 0x31c   : > { %v1250_v55 = vsel %vm1247_vm12, %v1249_v52, %v1245_v54 }
 0x31d   : > { %v1212_v61 = vpop.xlane.xlu0 %1211  ;;  %v1251_v63 = vmul.f32 %v4301_v43, %v1250_v55  ;;  %v1271_v11 = vadd.f32 %v3885_v39, %v1270_v0 }
 0x31e   : > { %3886 = vrcp.f32 %v1212_v61  ;;  %vm1287_vm6 = vweird.f32 %v1212_v61  ;;  %v1293_v35 = vand.u32 2147483648, %v1212_v61 }
 0x31f   : > { %1403 = vperm.xlu0 %3768, %v1251_v63   ;;  %1349 = vperm.xlu1 %3767, %v1251_v63   ;;  %v1275_v19 = vsel %vm1274_vm15, %v3885_v39, %v1271_v11  ;;  %v1291_v39 = vand.u32 2147483647, %v1212_v61 }
 0x320   : > { %v1280_v28 = vsel %vm1277_vm2, %v1279_v21, %v1275_v19 }
 0x321   : > { %v1281_v36 = vmul.f32 %v4323_v4, %v1280_v28  ;;  %v1294_v4 = vor.u32 1.1754944e-38, %v1293_v35  ;;  %vm1292_vm11 = vcmp.eq.f32.partialorder %v1291_v39, 8.507059e+37 }
 0x322   : > { %v1206_v1 = vpop.xlane.xlu2 %1205 }
 0x323   : > { %3888 = vrcp.f32 %v1206_v1  ;;  %v1263_v29 = vand.u32 2147483648, %v1206_v1  ;;  %v1261_v30 = vand.u32 2147483647, %v1206_v1  ;;  %vm1257_vm7 = vweird.f32 %v1206_v1 }
 0x324   : > { %v3887_v8 = vpop.eup %3886 }
 0x325   : > { %v1283_v9 = vmul.f32 %v3887_v8, %v1212_v61  ;;  %vm1288_vm3 = vweird.f32 %v3887_v8  ;;  %v1264_v42 = vor.u32 1.1754944e-38, %v1263_v29  ;;  %vm1262_vm10 = vcmp.eq.f32.partialorder %v1261_v30, 8.507059e+37 }
 0x326   : > { %vm4406_vm8 = vmor %vm1287_vm6, %vm1288_vm3 }
 0x327   : > { %v1284_v16 = vsub.f32 1.0, %v1283_v9  ;;  %3769 = vset.pattern.permute.xlu1 %v3992_v31  ;;  %3770 = vset.pattern.permute.xlu0 %v3990_v2 }
 0x328   : > { %1451 = vperm.xlu1 %3769, %v1251_v63  }
 0x329   : > { %v3889_v43 = vpop.eup %3888  ;;  %v1285_v23 = vmul.f32 %v3887_v8, %v1284_v16 }
 0x32a   : > { %v1253_v24 = vmul.f32 %v3889_v43, %v1206_v1  ;;  %v1215_v14 = vpop.xlane.xlu2 %1214  ;;  %vm1258_vm5 = vweird.f32 %v3889_v43 }
 0x32b   : > { %3890 = vrcp.f32 %v1215_v14  ;;  %v1286_v22 = vadd.f32 %v3887_v8, %v1285_v23  ;;  %vm1259_vm9 = vmor %vm1257_vm7, %vm1258_vm5  ;;  %v1308_v1 = vand.u32 2147483648, %v1215_v14  ;;  %vm1302_vm13 = vweird.f32 %v1215_v14 }
 0x32c   : > { %v1254_v25 = vsub.f32 1.0, %v1253_v24  ;;  %v1306_v9 = vand.u32 2147483647, %v1215_v14 }
 0x32d   : > { %v1290_v27 = vsel %vm4406_vm8, %v3887_v8, %v1286_v22  ;;  %v1309_v11 = vor.u32 1.1754944e-38, %v1308_v1  ;;  %v1390_v22 = vld [vmem:[%s4431_s23] sm:$0xff] }
 0x32e   : > { %v1255_v18 = vmul.f32 %v3889_v43, %v1254_v25  ;;  %v1295_v56 = vsel %vm1292_vm11, %v1294_v4, %v1290_v27  ;;  %vm1307_vm15 = vcmp.eq.f32.partialorder %v1306_v9, 8.507059e+37 }
 0x32f   : > { %v1296_v63 = vmul.f32 %v4337_v15, %v1295_v56 }
 0x330   : > { %3774 = vset.pattern.permute.xlu1 %v3991_v3  ;;  %v1256_v37 = vadd.f32 %v3889_v43, %v1255_v18  ;;  %v4428_v18 = vand.u32 7, %v4159_v57 }
 0x331   : > { %v3891_v40 = vpop.eup %3890  ;;  %1411 = vperm.xlu1 %3774, %v1281_v36  }
 0x332   : > { %v1298_v47 = vmul.f32 %v3891_v40, %v1215_v14  ;;  %v1260_v51 = vsel %vm1259_vm9, %v3889_v43, %v1256_v37  ;;  %vm1303_vm12 = vweird.f32 %v3891_v40  ;;  %vm1599_vm7 = vcmp.eq.s32.totalorder %v4428_v18, 0 }
 0x333   : > { %v1265_v52 = vsel %vm1262_vm10, %v1264_v42, %v1260_v51  ;;  %vm1304_vm14 = vmor %vm1302_vm13, %vm1303_vm12  ;;  %vm1759_vm13 = vcmp.eq.s32.totalorder %v4428_v18, 4  ;;  %vm1679_vm4 = vcmp.eq.s32.totalorder %v4428_v18, 2 }
 0x334   : > { %v1299_v54 = vsub.f32 1.0, %v1298_v47  ;;  %v1266_v55 = vmul.f32 %v4307_v50, %v1265_v52  ;;  %vm4438_vm9 = vmpackc.low %vm1599_vm7, %vm1599_vm7 }
 0x336   : > { %1407 = vperm.xlu2 %3771, %v1266_v55   ;;  %1354 = vperm.xlu0 %3770, %v1266_v55   ;;  %v1300_v61 = vmul.f32 %v3891_v40, %v1299_v54 }
 0x338   : > { %v1301_v0 = vadd.f32 %v3891_v40, %v1300_v61 }
 0x339   : > { %3776 = vset.pattern.permute.xlu1 %v3990_v2 }
 0x33a   : > { %1364 = vperm.xlu1 %3776, %v1296_v63   ;;  %v1305_v8 = vsel %vm1304_vm14, %v3891_v40, %v1301_v0  ;;  %vm1719_vm14 = vcmp.eq.s32.totalorder %v4428_v18, 3  ;;  %v1497_v0 = vadd.s32 16, %v4159_v57 }
 0x33b   : > { %v1310_v50 = vsel %vm1307_vm15, %v1309_v11, %v1305_v8  ;;  %vm1639_vm15 = vcmp.eq.s32.totalorder %v4428_v18, 1 }
 0x33c   : > { %v1311_v15 = vmul.f32 %v4331_v10, %v1310_v50 }
 0x33e   : > { %3773 = vset.pattern.permute.xlu2 %v3990_v2  ;;  %3772 = vset.pattern.permute.xlu0 %v3992_v31 }
 0x33f   : > { %1359 = vperm.xlu2 %3773, %v1281_v36   ;;  %1455 = vperm.xlu0 %3772, %v1266_v55   ;;  %v1496_v55 = vadd.s32 8, %v4159_v57 }
 0x341   : > { %v4452_v61 = vand.u32 7, %v1496_v55 }
 0x342   : > { %3780 = vset.pattern.permute.xlu1 %v3991_v3 }
 0x343   : > { %1419 = vperm.xlu1 %3780, %v1311_v15   ;;  %vm1640_vm7 = vcmp.eq.s32.totalorder %v4452_v61, 1 }
 0x347   : > { %3775 = vset.pattern.permute.xlu2 %v3992_v31  ;;  %3785 = vset.pattern.permute.xlu0 %v3991_v3 }
 0x348   : > { %1459 = vperm.xlu2 %3775, %v1281_v36   ;;  %v4448_v54 = vpop.permute.xlu2 %1344 }
 0x34b   : > { %3781 = vset.pattern.permute.xlu1 %v3992_v31 }
 0x34c   : > { %1467 = vperm.xlu1 %3781, %v1311_v15  }
 0x34d   : > { %v1218_v12 = vpop.xlane.xlu1 %1217 }
 0x34e   : > { %3892 = vrcp.f32 %v1218_v12  ;;  %v1323_v43 = vand.u32 2147483648, %v1218_v12  ;;  %v1321_v21 = vand.u32 2147483647, %v1218_v12  ;;  %vm1317_vm3 = vweird.f32 %v1218_v12 }
 0x350   : > { %3777 = vset.pattern.permute.xlu2 %v3991_v3  ;;  %v1324_v24 = vor.u32 1.1754944e-38, %v1323_v43  ;;  %vm1322_vm6 = vcmp.eq.f32.partialorder %v1321_v21, 8.507059e+37 }
 0x351   : > { %1415 = vperm.xlu2 %3777, %v1296_v63   ;;  %v1448_v56 = vpop.permute.xlu2 %1447 }
 0x354   : > { %v3893_v16 = vpop.eup %3892  ;;  %3782 = vset.pattern.permute.xlu1 %v3990_v2 }
 0x355   : > { %v1313_v10 = vmul.f32 %v3893_v16, %v1218_v12  ;;  %vm1318_vm2 = vweird.f32 %v3893_v16 }
 0x356   : > { %vm1319_vm5 = vmor %vm1317_vm3, %vm1318_vm2  ;;  %vm1760_vm2 = vcmp.eq.s32.totalorder %v4452_v61, 4 }
 0x357   : > { %v1314_v17 = vsub.f32 1.0, %v1313_v10  ;;  %vm4458_vm3 = vmpackc.low %vm1759_vm13, %vm1759_vm13 }
 0x358   : > { %vm4498_vm13 = vmpackc.low %vm1640_vm7, %vm1640_vm7 }
 0x359   : > { %v1315_v19 = vmul.f32 %v3893_v16, %v1314_v17  ;;  %3778 = vset.pattern.permute.xlu2 %v3992_v31 }
 0x35a   : > { %1463 = vperm.xlu2 %3778, %v1296_v63  }
 0x35b   : > { %v1316_v23 = vadd.f32 %v3893_v16, %v1315_v19 }
 0x35d   : > { %v1320_v14 = vsel %vm1319_vm5, %v3893_v16, %v1316_v23  ;;  %vm1720_vm5 = vcmp.eq.s32.totalorder %v4452_v61, 3 }
 0x35e   : > { %v1221_v25 = vpop.xlane.xlu0 %1220  ;;  %v1325_v28 = vsel %vm1322_vm6, %v1324_v24, %v1320_v14  ;;  %vm4464_vm6 = vmpackc.low %vm1719_vm14, %vm1719_vm14  ;;  %v4505_v24 = vand.u32 7, %v1497_v0  ;;  %v1478_v14 = vmul.f32 %v1448_v56, %v1390_v22  ;;  %vm1879_vm14 = vcmp.eq.s32.totalorder %v4428_v18, 7 }
 0x35f   : > { %3894 = vrcp.f32 %v1221_v25  ;;  %v1326_v29 = vmul.f32 %v4352_v32, %v1325_v28  ;;  %v1338_v32 = vand.u32 2147483648, %v1221_v25  ;;  %v1336_v40 = vand.u32 2147483647, %v1221_v25 }
 0x360   : > { %vm1332_vm10 = vweird.f32 %v1221_v25  ;;  %3896 = vrcp.f32 %v4387_v6 }
 0x361   : > { %1374 = vperm.xlu1 %3782, %v1326_v29   ;;  %v1339_v27 = vor.u32 1.1754944e-38, %v1338_v32  ;;  %vm1337_vm12 = vcmp.eq.f32.partialorder %v1336_v40, 8.507059e+37  ;;  %3898 = vrcp.f32 %v4399_v33 }
 0x362   : > { %3779 = vset.pattern.permute.xlu2 %v3990_v2  ;;  %3900 = vrcp.f32 %v4369_v46 }
 0x363   : > { %1369 = vperm.xlu2 %3779, %v1311_v15   ;;  %v4483_v15 = vld [vmem:[%s4431_s23 + $0x10] sm:$0xff]  ;;  %3902 = vrcp.f32 %v4373_v48 }
 0x364   : > { %3904 = vrcp.f32 %v4380_v62 }
 0x365   : > { %v3895_v30 = vpop.eup %3894  ;;  %v1400_v35 = vpop.permute.xlu1 %1399  ;;  %3906 = vrcp.f32 %v4377_v59 }
 0x366   : > { %v1328_v36 = vmul.f32 %v3895_v30, %v1221_v25  ;;  %v1430_v37 = vmul.f32 %v1400_v35, %v1390_v22  ;;  %vm1333_vm8 = vweird.f32 %v3895_v30  ;;  %v4469_v1 = vpop.eup %3896 }
 0x367   : > { %vm1334_vm11 = vmor %vm1332_vm10, %vm1333_vm8  ;;  %v1057_v19 = vmul.f32 %v4469_v1, %v4387_v6 }
 0x368   : > { %v1329_v38 = vsub.f32 1.0, %v1328_v36  ;;  %v4434_v39 = vpack.c.bf16 %v1430_v37, %v1430_v37  ;;  %vm4472_vm8 = vmpackc.low %vm1639_vm15, %vm1639_vm15  ;;  %vm1880_vm15 = vcmp.eq.s32.totalorder %v4452_v61, 7 }
 0x369   : > { %3783 = vset.pattern.permute.xlu1 %v3991_v3  ;;  %vm4478_vm10 = vmpackc.low %vm1760_vm2, %vm1760_vm2  ;;  %vm1680_vm2 = vcmp.eq.s32.totalorder %v4452_v61, 2 }
 0x36a   : > { %v1330_v2 = vmul.f32 %v3895_v30, %v1329_v38  ;;  %1423 = vperm.xlu1 %3783, %v1326_v29   ;;  %v1791_v10 = vsel %vm4458_vm3, %v4434_v39, 0  ;;  %v1751_v43 = vsel %vm4464_vm6, %v4434_v39, 0  ;;  %v1671_v23 = vsel %vm4472_vm8, %v4434_v39, 0  ;;  %vm4526_vm7 = vmpackc.low %vm1880_vm15, %vm1880_vm15 }
 0x36b   : > { %v2011_v38 = vunpack.c.l.b16 %v1671_v23  ;;  %vm4534_vm0 = vmpackc.low %vm1680_vm2, %vm1680_vm2 }
 0x36c   : > { %v1331_v47 = vadd.f32 %v3895_v30, %v1330_v2  ;;  %vm4546_vm15 = vmpackc.low %vm1879_vm14, %vm1879_vm14 }
 0x36d   : > { %vm4562_vm14 = vmpackc.low %vm1679_vm4, %vm1679_vm4  ;;  %vm1800_vm4 = vcmp.eq.s32.totalorder %v4452_v61, 5 }
 0x36e   : > { %v1335_v4 = vsel %vm1334_vm11, %v3895_v30, %v1331_v47  ;;  %vm4488_vm11 = vmpackc.low %vm1720_vm5, %vm1720_vm5  ;;  %v2067_v30 = vunpack.c.l.b16 %v1751_v43  ;;  %v6090_v43 = vmov 0 }
 0x36f   : > { %v1340_v52 = vsel %vm1337_vm12, %v1339_v27, %v1335_v4  ;;  %vm1600_vm12 = vcmp.eq.s32.totalorder %v4452_v61, 0  ;;  %v1058_v27 = vsub.f32 1.0, %v1057_v19  ;;  %v4531_v4 = vpack.c.bf16 %v1478_v14, %v1478_v14  ;;  %vm4594_vm1 = vmpackc.low %vm1800_vm4, %vm1800_vm4 }
 0x370   : > { %v1341_v3 = vmul.f32 %v4363_v44, %v1340_v52  ;;  %vm4513_vm5 = vmpackc.low %vm1600_vm12, %vm1600_vm12  ;;  %vm1601_vm12 = vcmp.eq.s32.totalorder %v4505_v24, 0  ;;  %v1065_v52 = vand.u32 2147483647, %v4387_v6 }
 0x371   : > { %vm4553_vm2 = vmpackc.low %vm1601_vm12, %vm1601_vm12  ;;  %vm1062_vm12 = vweird.f32 %v4469_v1  ;;  %v1943_v23 = vsel %vm4464_vm6, %v4531_v4, 0  ;;  %v1927_v21 = vsel %vm4472_vm8, %v4531_v4, 0 }
 0x372   : > { %1427 = vperm.xlu0 %3785, %v1341_v3   ;;  %1379 = vperm.xlu2 %3779, %v1341_v3   ;;  %v6091_v43 = vsel %vm4553_vm2, 4294967295, %v6090_v43  ;;  %vm1799_vm2 = vcmp.eq.s32.totalorder %v4428_v18, 5 }
 0x373   : > { %3784 = vset.pattern.permute.xlu1 %v3992_v31 }
 0x374   : > { %1471 = vperm.xlu1 %3784, %v1326_v29   ;;  %v2095_v29 = vunpack.c.l.b16 %v1791_v10 }
 0x37a   : > { %3786 = vset.pattern.permute.xlu2 %v3992_v31  ;;  %v1391_v31 = vld [vmem:[%s4431_s23 + $0x8] sm:$0xff] }
 0x37b   : > { %1475 = vperm.xlu2 %3786, %v1341_v3  }
 0x390   : > { %v1408_v12 = vpop.permute.xlu2 %1407 }
 0x391   : > { %v4476_v8 = vpop.permute.xlu1 %1349  ;;  %v1404_v11 = vpop.permute.xlu0 %1403  ;;  %v1432_v28 = vmul.f32 %v1408_v12, %v4483_v15  ;;  %v6088_v12 = vmov 0 }
 0x392   : > { %v1431_v16 = vmul.f32 %v1404_v11, %v1391_v31  ;;  %v6089_v12 = vsel %vm4546_vm15, 4294967295, %v6088_v12 }
 0x393   : > { %v4541_v55 = vpack.c.bf16 %v1432_v28, %v1432_v28  ;;  %v1059_v28 = vmul.f32 %v4469_v1, %v1058_v27 }
 0x394   : > { %v4507_v25 = vpack.c.bf16 %v1431_v16, %v1431_v16 }
 0x396   : > { %v1792_v22 = vsel %vm4478_vm10, %v4507_v25, 0  ;;  %v1752_v36 = vsel %vm4488_vm11, %v4507_v25, 0  ;;  %v1672_v37 = vsel %vm4498_vm13, %v4507_v25, 0  ;;  %v1912_v10 = vsel %vm4526_vm7, %v4507_v25, 0 }
 0x397   : > { %v2096_v32 = vunpack.c.l.b16 %v1792_v22  ;;  %v2068_v2 = vunpack.c.l.b16 %v1752_v36  ;;  %v2012_v40 = vunpack.c.l.b16 %v1672_v37  ;;  %v1712_v14 = vsel %vm4534_vm0, %v4507_v25, 0 }
 0x398   : > { %v1919_v22 = vsel %vm4438_vm9, %v4531_v4, 0  ;;  %v2180_v37 = vunpack.c.l.b16 %v1912_v10 }
 0x399   : > { %v2103_v56 = vpack.c.b16 %v2096_v32, %v2095_v29  ;;  %v2075_v0 = vpack.c.b16 %v2068_v2, %v2067_v30  ;;  %v2019_v11 = vpack.c.b16 %v2012_v40, %v2011_v38  ;;  %v1911_v29 = vsel %vm4546_vm15, %v4434_v39, 0 }
 0x39a   : > { %v1452_v16 = vpop.permute.xlu1 %1451  ;;  %v1711_v30 = vsel %vm4562_vm14, %v4434_v39, 0  ;;  %v2040_v32 = vunpack.c.l.b16 %v1712_v14  ;;  %v1498_v2 = vadd.s32 24, %v4159_v57  ;;  %v2179_v40 = vunpack.c.l.b16 %v1911_v29 }
 0x39b   : > { %v1479_v19 = vmul.f32 %v1452_v16, %v1391_v31  ;;  %2107 = vrot.lane.b32.xlu0 %v2103_v56, %s3993_s13  ;;  %2079 = vrot.lane.b32.xlu1 %v2075_v0, %s3994_s15  ;;  %v4570_v31 = vpop.permute.xlu2 %1359  ;;  %v1067_v56 = vand.u32 2147483648, %v4387_v6  ;;  %v2039_v0 = vunpack.c.l.b16 %v1711_v30  ;;  %vm1061_vm15 = vweird.f32 %v4387_v6 }
 0x39c   : > { %6094 = vst [vmem:[#allocation14_spill] sm:$0xff] %v4570_v31  ;;  %2023 = vrot.lane.b32.xlu2 %v2019_v11, %s3995_s24  ;;  %v2207_v11 = vunpack.c.l.b16 %v1919_v22  ;;  %v2187_v14 = vpack.c.b16 %v2180_v37, %v2179_v40  ;;  %v4604_v30 = vand.u32 7, %v1498_v2  ;;  %v4607_v22 = vld [vmem:[%s4431_s23 + $0x18] sm:$0xff]  ;;  %vm4615_vm4 = vmor %vm1061_vm15, %vm1062_vm12  ;;  %vm1840_vm15 = vcmp.eq.s32.totalorder %v4452_v61, 6 }
 0x39d   : > { %v4582_v36 = vpack.c.bf16 %v1479_v19, %v1479_v19  ;;  %v1060_v19 = vadd.f32 %v4469_v1, %v1059_v28  ;;  %v2047_v29 = vpack.c.b16 %v2040_v32, %v2039_v0  ;;  %v1832_v28 = vsel %vm4594_vm1, %v4507_v25, 0  ;;  %vm4657_vm6 = vmpackc.low %vm1840_vm15, %vm1840_vm15 }
 0x39e   : > { %v1068_v32 = vor.u32 1.1754944e-38, %v1067_v56  ;;  %v1935_v0 = vsel %vm4562_vm14, %v4531_v4, 0  ;;  %vm1066_vm14 = vcmp.eq.f32.partialorder %v1065_v52, 8.507059e+37 }
 0x39f   : > { %v1920_v27 = vsel %vm4513_vm5, %v4582_v36, 0  ;;  %v1936_v38 = vsel %vm4534_vm0, %v4582_v36, 0  ;;  %v1944_v2 = vsel %vm4488_vm11, %v4582_v36, 0  ;;  %vm4632_vm0 = vmpackc.low %vm1799_vm2, %vm1799_vm2  ;;  %v1064_v17 = vsel %vm4615_vm4, %v4469_v1, %v1060_v19 }
 0x3a0   : > { %v2208_v16 = vunpack.c.l.b16 %v1920_v27  ;;  %vm1839_vm11 = vcmp.eq.s32.totalorder %v4428_v18, 6  ;;  %v2264_v56 = vunpack.c.l.b16 %v1936_v38  ;;  %vm1602_vm2 = vcmp.eq.s32.totalorder %v4604_v30, 0 }
 0x3a1   : > { %v2263_v18 = vunpack.c.l.b16 %v1935_v0  ;;  %vm4653_vm12 = vmpackc.low %vm1839_vm11, %vm1839_vm11  ;;  %v1069_v38 = vsel %vm1066_vm14, %v1068_v32, %v1064_v17  ;;  %v2291_v19 = vunpack.c.l.b16 %v1943_v23  ;;  %v1960_v52 = vsel %vm4594_vm1, %v4582_v36, 0 }
 0x3a2   : > { %v2215_v53 = vpack.c.b16 %v2208_v16, %v2207_v11  ;;  %vm4661_vm4 = vmpackc.low %vm1602_vm2, %vm1602_vm2  ;;  %v1872_v0 = vsel %vm4657_vm6, %v4507_v25, 0  ;;  %v1968_v17 = vsel %vm4657_vm6, %v4582_v36, 0  ;;  %vm1641_vm1 = vcmp.eq.s32.totalorder %v4505_v24, 1 }
 0x3a3   : > { %v1412_v27 = vpop.permute.xlu1 %1411  ;;  %2191 = vrot.lane.b32.xlu1 %v2187_v14, %s6047_s25  ;;  %v4647_v11 = vpop.permute.xlu2 %1459  ;;  %v2124_v14 = vunpack.c.l.b16 %v1832_v28  ;;  %vm1681_vm11 = vcmp.eq.s32.totalorder %v4505_v24, 2  ;;  %v2152_v6 = vunpack.c.l.b16 %v1872_v0  ;;  %vm4699_vm15 = vmpackc.low %vm1641_vm1, %vm1641_vm1  ;;  %vm1682_vm2 = vcmp.eq.s32.totalorder %v4604_v30, 2 }
 0x3a4   : > { %v1433_v40 = vmul.f32 %v1412_v27, %v4607_v22  ;;  %2051 = vrot.lane.b32.xlu2 %v2047_v29, %s3997_s26  ;;  %2219 = vrot.lane.b32.xlu0 %v2215_v53, %s3998_s27  ;;  %v1831_v53 = vsel %vm4632_vm0, %v4434_v39, 0  ;;  %v2292_v29 = vunpack.c.l.b16 %v1944_v2  ;;  %v2271_v27 = vpack.c.b16 %v2264_v56, %v2263_v18  ;;  %vm4706_vm14 = vmpackc.low %vm1681_vm11, %vm1681_vm11 }
 0x3a5   : > { %v2123_v63 = vunpack.c.l.b16 %v1831_v53  ;;  %v1959_v56 = vsel %vm4632_vm0, %v4531_v4, 0  ;;  %v4688_v53 = vpop.eup %3898  ;;  %vm1642_vm0 = vcmp.eq.s32.totalorder %v4604_v30, 1  ;;  %v1499_v0 = vadd.s32 32, %v4159_v57  ;;  %vm4718_vm6 = vmpackc.low %vm1682_vm2, %vm1682_vm2 }
 0x3a6   : > { %v4649_v16 = vpack.c.bf16 %v1433_v40, %v1433_v40  ;;  %v2299_v2 = vpack.c.b16 %v2292_v29, %v2291_v19  ;;  %v1070_v40 = vmul.f32 %v4342_v20, %v1069_v38  ;;  %v1967_v20 = vsel %vm4653_vm12, %v4531_v4, 0 }
 0x3a7   : > { %v2131_v37 = vpack.c.b16 %v2124_v14, %v2123_v63  ;;  %v2348_v14 = vunpack.c.l.b16 %v1960_v52  ;;  %v1871_v29 = vsel %vm4653_vm12, %v4434_v39, 0  ;;  %v2376_v63 = vunpack.c.l.b16 %v1968_v17  ;;  %vm4710_vm12 = vmpackc.low %vm1642_vm0, %vm1642_vm0 }
 0x3a8   : > { %v4696_v18 = vpop.permute.xlu0 %1354  ;;  %v2347_v38 = vunpack.c.l.b16 %v1959_v56  ;;  %v6109_v19 = vmov 0  ;;  %v1102_v61 = vmul.f32 %v4688_v53, %v4399_v33  ;;  %v1674_v56 = vsel %vm4710_vm12, %v4649_v16, 0 }
 0x3a9   : > { %6108 = vst [vmem:[#allocation16_spill] sm:$0xff] %v4696_v18  ;;  %v6110_v19 = vsel %vm4699_vm15, 4294967295, %v6109_v19  ;;  %vm1801_vm1 = vcmp.eq.s32.totalorder %v4505_v24, 5  ;;  %vm1762_vm11 = vcmp.eq.s32.totalorder %v4604_v30, 4 }
 0x3aa   : > { %v2355_v52 = vpack.c.b16 %v2348_v14, %v2347_v38  ;;  %v1928_v14 = vsel %vm4498_vm13, %v4582_v36, 0  ;;  %v4731_v38 = vld [vmem:[%s4431_s23 + $0x20] sm:$0xff]  ;;  %vm1761_vm13 = vcmp.eq.s32.totalorder %v4505_v24, 4  ;;  %vm4766_vm8 = vmpackc.low %vm1801_vm1, %vm1801_vm1  ;;  %vm6123_vm1 = vcmp.eq.s32.totalorder %v4604_v30, 5 }
 0x3ab   : > { %2275 = vrot.lane.b32.xlu1 %v2271_v27, %s3999_s28  ;;  %v1416_v1 = vpop.permute.xlu2 %1415  ;;  %v2151_v27 = vunpack.c.l.b16 %v1871_v29  ;;  %v1500_v29 = vadd.s32 40, %v4159_v57  ;;  %v2236_v32 = vunpack.c.l.b16 %v1928_v14  ;;  %vm4756_vm0 = vmpackc.low %vm1761_vm13, %vm1761_vm13 }
 0x3ac   : > { %2135 = vrot.lane.b32.xlu2 %v2131_v37, %s4000_s29  ;;  %v1365_v10 = vpop.permute.xlu1 %1364  ;;  %2303 = vrot.lane.b32.xlu0 %v2299_v2, %s4001_s30  ;;  %v2375_v37 = vunpack.c.l.b16 %v1967_v20  ;;  %v1434_v51 = vmul.f32 %v1416_v1, %v4731_v38  ;;  %vm4770_vm13 = vmpackc.low %vm1762_vm11, %vm1762_vm11  ;;  %v6147_v2 = vsel %vm4661_vm4, %v4649_v16, 0 }
 0x3ad   : > { %v4690_v23 = vmul.f32 %v1365_v10, %v1070_v40  ;;  %v6113_v40 = vmov 0  ;;  %v2159_v17 = vpack.c.b16 %v2152_v6, %v2151_v27  ;;  %v1714_v6 = vsel %vm4718_vm6, %v4649_v16, 0  ;;  %vm4785_vm11 = vmpackc.low %vm6123_vm1, %vm6123_vm1 }
 0x3ae   : > { %v6114_v40 = vsel %vm4710_vm12, 4294967295, %v6113_v40  ;;  %v2383_v10 = vpack.c.b16 %v2376_v63, %v2375_v37  ;;  %v1103_v63 = vsub.f32 1.0, %v1102_v61  ;;  %v1673_v27 = vsel %vm4699_vm15, %v4541_v55, 0  ;;  %v4743_v37 = vld [vmem:[%s4431_s23 + $0x28] sm:$0xff] }
 0x3af   : > { %6107 = vst [vmem:[#allocation15_spill] sm:$0xff] %v4690_v23  ;;  %v2042_v3 = vunpack.c.l.b16 %v1714_v6  ;;  %v4752_v9 = vand.u32 7, %v1500_v29  ;;  %v2013_v49 = vunpack.c.l.b16 %v1673_v27  ;;  %v2235_v6 = vunpack.c.l.b16 %v1927_v21 }
 0x3b0   : > { %v6121_v27 = vmov 0  ;;  %v1794_v34 = vsel %vm4770_vm13, %v4649_v16, 0  ;;  %vm1881_vm1 = vcmp.eq.s32.totalorder %v4505_v24, 7 }
 0x3b1   : > { %v1456_v26 = vpop.permute.xlu0 %1455  ;;  %v6122_v27 = vsel %vm4770_vm13, 4294967295, %v6121_v27  ;;  %vm1604_vm2 = vcmp.eq.s32.totalorder %v4752_v9, 0  ;;  %vm6130_vm13 = vweird.f32 %v4688_v53 }
 0x3b2   : > { %v1480_v7 = vmul.f32 %v1456_v26, %v4483_v15  ;;  %v1793_v26 = vsel %vm4756_vm0, %v4541_v55, 0 }
 0x3b3   : > { %2359 = vrot.lane.b32.xlu1 %v2355_v52, %s4002_s21  ;;  %v2014_v52 = vunpack.c.l.b16 %v1674_v56  ;;  %v6117_v56 = vmov 0 }
 0x3b4   : > { %2163 = vrot.lane.b32.xlu2 %v2159_v17, %s4003_s11  ;;  %2387 = vrot.lane.b32.xlu0 %v2383_v10, %s3989_s22  ;;  %v1713_v17 = vsel %vm4706_vm14, %v4541_v55, 0  ;;  %v4749_v10 = vand.u32 7, %v1499_v0  ;;  %v6118_v56 = vsel %vm4756_vm0, 4294967295, %v6117_v56  ;;  %v1104_v0 = vmul.f32 %v4688_v53, %v1103_v63  ;;  %v4777_v21 = vpop.permute.xlu2 %1463 }
 0x3b5   : > { %v1420_v61 = vpop.permute.xlu1 %1419  ;;  %v2041_v23 = vunpack.c.l.b16 %v1713_v17  ;;  %v2020_v1 = vpack.c.b16 %v2014_v52, %v2013_v49  ;;  %v1112_v63 = vand.u32 2147483648, %v4399_v33  ;;  %v4790_v52 = vpack.c.bf16 %v1434_v51, %v1434_v51 }
 0x3b6   : > { %v1435_v14 = vmul.f32 %v1420_v61, %v4743_v37  ;;  %vm1603_vm12 = vcmp.eq.s32.totalorder %v4749_v10, 0  ;;  %v2243_v61 = vpack.c.b16 %v2236_v32, %v2235_v6  ;;  %v1834_v32 = vsel %vm4785_vm11, %v4649_v16, 0 }
 0x3b7   : > { %v2048_v17 = vpack.c.b16 %v2042_v3, %v2041_v23  ;;  %v1952_v3 = vsel %vm4478_vm10, %v4582_v36, 0  ;;  %v1951_v51 = vsel %vm4458_vm3, %v4531_v4, 0  ;;  %v1105_v50 = vadd.f32 %v4688_v53, %v1104_v0  ;;  %vm4814_vm10 = vmpackc.low %vm1603_vm12, %vm1603_vm12 }
 0x3b8   : > { %v4800_v23 = vpack.c.bf16 %v1435_v14, %v1435_v14  ;;  %v1481_v14 = vmul.f32 %v4647_v11, %v4607_v22  ;;  %v2098_v6 = vunpack.c.l.b16 %v1794_v34  ;;  %vm4827_vm3 = vmpackc.low %vm1604_vm2, %vm1604_vm2  ;;  %v2320_v0 = vunpack.c.l.b16 %v1952_v3 }
 0x3b9   : > { %vm1882_vm12 = vcmp.eq.s32.totalorder %v4604_v30, 7  ;;  %v4833_v34 = vpack.c.bf16 %v1480_v7, %v1480_v7  ;;  %v2097_v22 = vunpack.c.l.b16 %v1793_v26  ;;  %vm6131_vm0 = vweird.f32 %v4399_v33  ;;  %vm4849_vm2 = vmpackc.low %vm1881_vm1, %vm1881_vm1 }
 0x3ba   : > { %vm4839_vm15 = vmor %vm6131_vm0, %vm6130_vm13  ;;  %v1113_v13 = vor.u32 1.1754944e-38, %v1112_v63  ;;  %v1635_v3 = vsel %vm4814_vm10, %v4790_v52, 0  ;;  %v4856_v5 = vpack.c.bf16 %v1481_v14, %v1481_v14  ;;  %vm1722_vm13 = vcmp.eq.s32.totalorder %v4604_v30, 3 }
 0x3bb   : > { %2025 = vrot.lane.b32.xlu1 %v2020_v1, %s3995_s24  ;;  %v1833_v1 = vsel %vm4766_vm8, %v4541_v55, 0  ;;  %v1109_v7 = vsel %vm4839_vm15, %v4688_v53, %v1105_v50  ;;  %v2104_v63 = vpack.c.b16 %v2098_v6, %v2097_v22  ;;  %vm4858_vm0 = vmpackc.low %vm1882_vm12, %vm1882_vm12  ;;  %v6138_v53 = vsel %vm4438_vm9, %v4434_v39, 0 }
 0x3bc   : > { %2247 = vrot.lane.b32.xlu2 %v2243_v61, %s4004_s12  ;;  %2053 = vrot.lane.b32.xlu0 %v2048_v17, %s3997_s26  ;;  %v2126_v61 = vunpack.c.l.b16 %v1834_v32  ;;  %v1110_v17 = vand.u32 2147483647, %v4399_v33  ;;  %v2319_v32 = vunpack.c.l.b16 %v1951_v51  ;;  %v2125_v31 = vunpack.c.l.b16 %v1833_v1  ;;  %vm4909_vm12 = vmpackc.low %vm1722_vm13, %vm1722_vm13 }
 0x3bd   : > { %v1636_v33 = vsel %vm4827_vm3, %v4800_v23, 0  ;;  %v1976_v51 = vsel %vm4526_vm7, %v4582_v36, 0  ;;  %v4869_v50 = vunpack.c.l.b16 %v6138_v53  ;;  %v1914_v14 = vsel %vm4858_vm0, %v4649_v16, 0  ;;  %v4885_v42 = vpop.permute.xlu2 %1369 }
 0x3be   : > { %v2327_v1 = vpack.c.b16 %v2320_v0, %v2319_v32  ;;  %v2132_v11 = vpack.c.b16 %v2126_v61, %v2125_v31  ;;  %v6139_v6 = vsel %vm4513_vm5, %v4507_v25, 0  ;;  %vm1111_vm7 = vcmp.eq.f32.partialorder %v1110_v17, 8.507059e+37  ;;  %v1468_v36 = vpop.permute.xlu1 %1467 }
 0x3bf   : > { %v4878_v22 = vunpack.c.l.b16 %v6139_v6  ;;  %vm6140_vm9 = vnez %v6091_v43  ;;  %vm1721_vm15 = vcmp.eq.s32.totalorder %v4505_v24, 3  ;;  %v1114_v35 = vsel %vm1111_vm7, %v1113_v13, %v1109_v7 }
 0x3c0   : > { %v1921_v39 = vsel %vm6140_vm9, %v4833_v34, 0  ;;  %v1913_v25 = vsel %vm4849_vm2, %v4541_v55, 0  ;;  %vm6141_vm5 = vnez %v6089_v12  ;;  %v2182_v0 = vunpack.c.l.b16 %v1914_v14  ;;  %vm4901_vm1 = vmpackc.low %vm1721_vm15, %vm1721_vm15 }
 0x3c1   : > { %v1975_v47 = vsel %vm6141_vm5, %v4531_v4, 0  ;;  %v2404_v61 = vunpack.c.l.b16 %v1976_v51  ;;  %v1922_v17 = vsel %vm4661_vm4, %v4856_v5, 0  ;;  %v2209_v13 = vunpack.c.l.b16 %v1921_v39 }
 0x3c2   : > { %v1482_v4 = vmul.f32 %v4777_v21, %v4731_v38  ;;  %v1115_v12 = vmul.f32 %v4367_v45, %v1114_v35  ;;  %v2181_v7 = vunpack.c.l.b16 %v1913_v25  ;;  %v1483_v51 = vmul.f32 %v1468_v36, %v4743_v37 }
 0x3c3   : > { %2109 = vrot.lane.b32.xlu1 %v2104_v63, %s3993_s13  ;;  %v2403_v63 = vunpack.c.l.b16 %v1975_v47  ;;  %v2210_v53 = vunpack.c.l.b16 %v1922_v17  ;;  %vm1841_vm7 = vcmp.eq.s32.totalorder %v4505_v24, 6  ;;  %vm1842_vm15 = vcmp.eq.s32.totalorder %v4604_v30, 6 }
 0x3c4   : > { %2331 = vrot.lane.b32.xlu2 %v2327_v1, %s4005_s19  ;;  %2137 = vrot.lane.b32.xlu0 %v2132_v11, %s4000_s29  ;;  %v2188_v11 = vpack.c.b16 %v2182_v0, %v2181_v7  ;;  %v1753_v38 = vsel %vm4901_vm1, %v4541_v55, 0  ;;  %v1754_v45 = vsel %vm4909_vm12, %v4649_v16, 0  ;;  %v1937_v21 = vsel %vm4706_vm14, %v4833_v34, 0  ;;  %vm4957_vm4 = vmpackc.low %vm1841_vm7, %vm1841_vm7 }
 0x3c5   : > { %v2411_v14 = vpack.c.b16 %v2404_v61, %v2403_v63  ;;  %v2216_v37 = vpack.c.b16 %v2210_v53, %v2209_v13  ;;  %vm1803_vm5 = vcmp.eq.s32.totalorder %v4749_v10, 5  ;;  %vm1804_vm13 = vcmp.eq.s32.totalorder %v4752_v9, 5 }
 0x3c6   : > { %v4926_v6 = vpack.c.bf16 %v1482_v4, %v1482_v4  ;;  %v1945_v39 = vsel %vm4901_vm1, %v4833_v34, 0  ;;  %v6146_v35 = vsel %vm6140_vm9, %v4541_v55, 0  ;;  %v4942_v47 = vunpack.c.l.b16 %v6147_v2  ;;  %vm4976_vm9 = vmpackc.low %vm1804_vm13, %vm1804_vm13 }
 0x3c7   : > { %v4936_v25 = vunpack.c.l.b16 %v6146_v35  ;;  %v4944_v36 = vpack.c.bf16 %v1483_v51, %v1483_v51  ;;  %v1938_v43 = vsel %vm4718_vm6, %v4856_v5, 0  ;;  %v1946_v28 = vsel %vm4909_vm12, %v4856_v5, 0  ;;  %vm4967_vm6 = vmpackc.low %vm1803_vm5, %vm1803_vm5 }
 0x3c8   : > { %vm1883_vm14 = vcmp.eq.s32.totalorder %v4749_v10, 7  ;;  %v2070_v13 = vunpack.c.l.b16 %v1754_v45  ;;  %v2265_v32 = vunpack.c.l.b16 %v1937_v21  ;;  %v2293_v4 = vunpack.c.l.b16 %v1945_v39  ;;  %vm4990_vm12 = vmpackc.low %vm1842_vm15, %vm1842_vm15 }
 0x3c9   : > { %v2266_v63 = vunpack.c.l.b16 %v1938_v43  ;;  %vm4980_vm1 = vmpackc.low %vm1883_vm14, %vm1883_vm14  ;;  %v1963_v53 = vsel %vm4967_vm6, %v4926_v6, 0  ;;  %v2294_v1 = vunpack.c.l.b16 %v1946_v28  ;;  %v1874_v21 = vsel %vm4990_vm12, %v4649_v16, 0 }
 0x3ca   : > { %v1969_v30 = vsel %vm4957_vm4, %v4833_v34, 0  ;;  %v5006_v35 = vunpack.c.l.b16 %v1963_v53  ;;  %v1873_v16 = vsel %vm4957_vm4, %v4541_v55, 0  ;;  %v1961_v43 = vsel %vm4766_vm8, %v4833_v34, 0 }
 0x3cb   : > { %2193 = vrot.lane.b32.xlu1 %v2188_v11, %s6047_s25  ;;  %s4006_s25 = smov 120   ;;  %v2300_v39 = vpack.c.b16 %v2294_v1, %v2293_v4  ;;  %vm1684_vm7 = vcmp.eq.s32.totalorder %v4752_v9, 2  ;;  %v5028_v28 = vunpack.c.l.b16 %v1635_v3  ;;  %v1970_v55 = vsel %vm4990_vm12, %v4856_v5, 0 }
 0x3cc   : > { %v1380_v0 = vpop.permute.xlu2 %1379  ;;  %2415 = vrot.lane.b32.xlu2 %v2411_v14, %s4006_s25  ;;  %2221 = vrot.lane.b32.xlu0 %v2216_v37, %s3998_s27  ;;  %v1964_v14 = vsel %vm4976_vm9, %v4944_v36, 0  ;;  %v2272_v37 = vpack.c.b16 %v2266_v63, %v2265_v32  ;;  %v1962_v29 = vsel %vm4785_vm11, %v4856_v5, 0  ;;  %vm1644_vm8 = vcmp.eq.s32.totalorder %v4752_v9, 1  ;;  %vm5045_vm13 = vmpackc.low %vm1684_vm7, %vm1684_vm7 }
 0x3cd   : > { %v4962_v17 = vmul.f32 %v1380_v0, %v1115_v12  ;;  %v2069_v12 = vunpack.c.l.b16 %v1753_v38  ;;  %v1979_v38 = vsel %vm4980_vm1, %v4926_v6, 0  ;;  %v5008_v2 = vunpack.c.l.b16 %v1964_v14  ;;  %vm5050_vm4 = vmpackc.low %vm1644_vm8, %vm1644_vm8 }
 0x3ce   : > { %v5014_v0 = vunpack.c.l.b16 %v1636_v33  ;;  %v2154_v61 = vunpack.c.l.b16 %v1874_v21  ;;  %v2377_v3 = vunpack.c.l.b16 %v1969_v30  ;;  %vm1884_vm15 = vcmp.eq.s32.totalorder %v4752_v9, 7 }
 0x3cf   : > { %6150 = vst [vmem:[#allocation17_spill] sm:$0xff] %v4962_v17  ;;  %v2076_v45 = vpack.c.b16 %v2070_v13, %v2069_v12  ;;  %v2349_v32 = vunpack.c.l.b16 %v1961_v43  ;;  %vm1683_vm5 = vcmp.eq.s32.totalorder %v4749_v10, 2  ;;  %v2153_v49 = vunpack.c.l.b16 %v1873_v16  ;;  %vm5054_vm14 = vmpackc.low %vm1884_vm15, %vm1884_vm15 }
 0x3d0   : > { %v2378_v12 = vunpack.c.l.b16 %v1970_v55  ;;  %vm1643_vm11 = vcmp.eq.s32.totalorder %v4749_v10, 1  ;;  %v2350_v53 = vunpack.c.l.b16 %v1962_v29  ;;  %vm5058_vm12 = vmpackc.low %vm1683_vm5, %vm1683_vm5  ;;  %v1716_v30 = vsel %vm5045_vm13, %v4800_v23, 0 }
 0x3d1   : > { %v2160_v11 = vpack.c.b16 %v2154_v61, %v2153_v49  ;;  %vm5068_vm7 = vmpackc.low %vm1643_vm11, %vm1643_vm11  ;;  %v5072_v16 = vunpack.c.l.b16 %v1979_v38  ;;  %vm6169_vm8 = vnez %v6110_v19  ;;  %v1676_v29 = vsel %vm5050_vm4, %v4800_v23, 0 }
 0x3d2   : > { %v2384_v14 = vpack.c.b16 %v2378_v12, %v2377_v3  ;;  %v2356_v21 = vpack.c.b16 %v2350_v53, %v2349_v32  ;;  %v1929_v55 = vsel %vm6169_vm8, %v4833_v34, 0  ;;  %v1715_v38 = vsel %vm5058_vm12, %v4790_v52, 0 }
 0x3d3   : > { %2277 = vrot.lane.b32.xlu1 %v2272_v37, %s3999_s28  ;;  %v1980_v37 = vsel %vm5054_vm14, %v4944_v36, 0  ;;  %v2044_v3 = vunpack.c.l.b16 %v1716_v30  ;;  %vm6170_vm15 = vnez %v6114_v40  ;;  %v1675_v32 = vsel %vm5068_vm7, %v4790_v52, 0 }
 0x3d4   : > { %2081 = vrot.lane.b32.xlu2 %v2076_v45, %s3994_s15  ;;  %2305 = vrot.lane.b32.xlu0 %v2300_v39, %s4001_s30  ;;  %v6167_v39 = vmov 0  ;;  %v5074_v43 = vunpack.c.l.b16 %v1980_v37  ;;  %v1930_v19 = vsel %vm6170_vm15, %v4856_v5, 0  ;;  %vm1764_vm5 = vcmp.eq.s32.totalorder %v4752_v9, 4 }
 0x3d5   : > { %v6168_v39 = vsel %vm5068_vm7, 4294967295, %v6167_v39  ;;  %v2237_v49 = vunpack.c.l.b16 %v1929_v55  ;;  %v2016_v12 = vunpack.c.l.b16 %v1676_v29  ;;  %v2043_v53 = vunpack.c.l.b16 %v1715_v38  ;;  %vm5098_vm8 = vmpackc.low %vm1764_vm5, %vm1764_vm5 }
 0x3d6   : > { %vm1763_vm11 = vcmp.eq.s32.totalorder %v4749_v10, 4  ;;  %v1836_v13 = vsel %vm4976_vm9, %v4800_v23, 0  ;;  %vm6173_vm15 = vnez %v6118_v56  ;;  %v1796_v38 = vsel %vm5098_vm8, %v4800_v23, 0 }
 0x3d7   : > { %v1953_v55 = vsel %vm6173_vm15, %v4833_v34, 0  ;;  %vm5108_vm7 = vmpackc.low %vm1763_vm11, %vm1763_vm11  ;;  %v1835_v56 = vsel %vm4967_vm6, %v4790_v52, 0  ;;  %vm6176_vm9 = vnez %v6122_v27  ;;  %v1924_v20 = vsel %vm4827_vm3, %v4944_v36, 0 }
 0x3d8   : > { %v1954_v7 = vsel %vm6176_vm9, %v4856_v5, 0  ;;  %v1977_v27 = vsel %vm4849_vm2, %v4833_v34, 0  ;;  %v1923_v44 = vsel %vm4814_vm10, %v4926_v6, 0  ;;  %v1978_v34 = vsel %vm4858_vm0, %v4856_v5, 0 }
 0x3d9   : > { %v2212_v26 = vunpack.c.l.b16 %v1924_v20  ;;  %v1915_v1 = vsel %vm4980_vm1, %v4790_v52, 0  ;;  %vm1724_vm3 = vcmp.eq.s32.totalorder %v4752_v9, 3  ;;  %vm1723_vm10 = vcmp.eq.s32.totalorder %v4749_v10, 3 }
 0x3da   : > { %v2211_v18 = vunpack.c.l.b16 %v1923_v44  ;;  %v2183_v51 = vunpack.c.l.b16 %v1915_v1  ;;  %vm5163_vm2 = vmpackc.low %vm1724_vm3, %vm1724_vm3  ;;  %vm1843_vm0 = vcmp.eq.s32.totalorder %v4749_v10, 6  ;;  %vm1844_vm1 = vcmp.eq.s32.totalorder %v4752_v9, 6 }
 0x3db   : > { %2389 = vrot.lane.b32.xlu1 %v2384_v14, %s3989_s22  ;;  %v2015_v14 = vunpack.c.l.b16 %v1675_v32  ;;  %v2321_v32 = vunpack.c.l.b16 %v1953_v55  ;;  %v1916_v55 = vsel %vm5054_vm14, %v4800_v23, 0  ;;  %vm5172_vm6 = vmpackc.low %vm1723_vm10, %vm1723_vm10  ;;  %v1756_v10 = vsel %vm5163_vm2, %v4800_v23, 0 }
 0x3dc   : > { %2165 = vrot.lane.b32.xlu2 %v2160_v11, %s4003_s11  ;;  %2361 = vrot.lane.b32.xlu0 %v2356_v21, %s4002_s21  ;;  %v2238_v11 = vunpack.c.l.b16 %v1930_v19  ;;  %v2049_v21 = vpack.c.b16 %v2044_v3, %v2043_v53  ;;  %v5116_v3 = vpop.permute.xlu1 %1374  ;;  %v2128_v19 = vunpack.c.l.b16 %v1836_v13  ;;  %v2127_v53 = vunpack.c.l.b16 %v1835_v56  ;;  %vm5189_vm5 = vmpackc.low %vm1843_vm0, %vm1843_vm0 }
 0x3dd   : > { %v2021_v30 = vpack.c.b16 %v2016_v12, %v2015_v14  ;;  %v2100_v12 = vunpack.c.l.b16 %v1796_v38  ;;  %v1502_v13 = vadd.s32 56, %v4159_v57  ;;  %v1501_v38 = vadd.s32 48, %v4159_v57  ;;  %vm5202_vm15 = vmpackc.low %vm1844_vm1, %vm1844_vm1 }
 0x3de   : > { %v2244_v40 = vpack.c.b16 %v2238_v11, %v2237_v49  ;;  %v1795_v49 = vsel %vm5108_vm7, %v4790_v52, 0  ;;  %v2322_v11 = vunpack.c.l.b16 %v1954_v7  ;;  %v2405_v56 = vunpack.c.l.b16 %v1977_v27  ;;  %v5153_v7 = vpop.permute.xlu2 %1475 }
 0x3df   : > { %v2099_v14 = vunpack.c.l.b16 %v1795_v49  ;;  %v2184_v15 = vunpack.c.l.b16 %v1916_v55  ;;  %v5159_v49 = vand.u32 7, %v1502_v13  ;;  %v1948_v55 = vsel %vm5163_vm2, %v4944_v36, 0 }
 0x3e0   : > { %v1947_v44 = vsel %vm5172_vm6, %v4926_v6, 0  ;;  %v1939_v1 = vsel %vm5058_vm12, %v4926_v6, 0  ;;  %v6200_v31 = vmov 0  ;;  %v1971_v45 = vsel %vm5189_vm5, %v4926_v6, 0 }
 0x3e1   : > { %v2189_v13 = vpack.c.b16 %v2184_v15, %v2183_v51  ;;  %vm1646_vm14 = vcmp.eq.s32.totalorder %v5159_v49, 1  ;;  %vm1606_vm10 = vcmp.eq.s32.totalorder %v5159_v49, 0  ;;  %v2295_v51 = vunpack.c.l.b16 %v1947_v44 }
 0x3e2   : > { %vm5216_vm3 = vmpackc.low %vm1646_vm14, %vm1646_vm14  ;;  %v6196_v44 = vmov 0  ;;  %v6222_v9 = vpack.c.b16 %v5008_v2, %v5006_v35  ;;  %v6225_v35 = vpack.c.b16 %v4942_v47, %v4936_v25 }
 0x3e3   : > { %2055 = vrot.lane.b32.xlu1 %v2049_v21, %s3997_s26  ;;  %v2133_v21 = vpack.c.b16 %v2128_v19, %v2127_v53  ;;  %v5156_v19 = vld [vmem:[%s4431_s23 + $0x30] sm:$0xff]  ;;  %v5161_v53 = vand.u32 7, %v1501_v38  ;;  %v1940_v38 = vsel %vm5045_vm13, %v4944_v36, 0  ;;  %vm1726_vm13 = vcmp.eq.s32.totalorder %v5159_v49, 3  ;;  %vm5241_vm1 = vmpackc.low %vm1606_vm10, %vm1606_vm10 }
 0x3e4   : > { %2249 = vrot.lane.b32.xlu2 %v2244_v40, %s4004_s12  ;;  %2027 = vrot.lane.b32.xlu0 %v2021_v30, %s3995_s24  ;;  %v2328_v40 = vpack.c.b16 %v2322_v11, %v2321_v32  ;;  %v2105_v30 = vpack.c.b16 %v2100_v12, %v2099_v14  ;;  %v1424_v32 = vpop.permute.xlu1 %1423  ;;  %v1428_v5 = vpop.permute.xlu0 %1427  ;;  %v2406_v12 = vunpack.c.l.b16 %v1978_v34  ;;  %v5169_v14 = vld [vmem:[%s4431_s23 + $0x38] sm:$0xff]  ;;  %s6183_s23 = smov 56   ;;  %v1755_v34 = vsel %vm5172_vm6, %v4790_v52, 0  ;;  %vm5233_vm0 = vmpackc.low %vm1726_vm13, %vm1726_vm13 }
 0x3e5   : > { %v1437_v27 = vmul.f32 %v1428_v5, %v5169_v14  ;;  %vm1605_vm11 = vcmp.eq.s32.totalorder %v5161_v53, 0  ;;  %vm1645_vm9 = vcmp.eq.s32.totalorder %v5161_v53, 1  ;;  %vm1725_vm2 = vcmp.eq.s32.totalorder %v5161_v53, 3 }
 0x3e6   : > { %vm5228_vm12 = vmpackc.low %vm1605_vm11, %vm1605_vm11  ;;  %v6190_v11 = vmov 0  ;;  %vm1766_vm11 = vcmp.eq.s32.totalorder %v5159_v49, 4  ;;  %vm1846_vm13 = vcmp.eq.s32.totalorder %v5159_v49, 6  ;;  %v1485_v63 = vmul.f32 %v5153_v7, %v5169_v14 }
 0x3e7   : > { %v5220_v15 = vpack.c.bf16 %v1437_v27, %v1437_v27  ;;  %v6191_v11 = vsel %vm5233_vm0, 4294967295, %v6190_v11  ;;  %vm5237_vm6 = vmpackc.low %vm1645_vm9, %vm1645_vm9  ;;  %vm1765_vm9 = vcmp.eq.s32.totalorder %v5161_v53, 4 }
 0x3e8   : > { %vm5251_vm14 = vmpackc.low %vm1725_vm2, %vm1725_vm2  ;;  %vm1845_vm2 = vcmp.eq.s32.totalorder %v5161_v53, 6  ;;  %v5334_v7 = vpack.c.bf16 %v1485_v63, %v1485_v63  ;;  %v6211_v63 = vpack.c.b16 %v4878_v22, %v4869_v50 }
 0x3e9   : > { %v6197_v44 = vsel %vm5251_vm14, 4294967295, %v6196_v44  ;;  %vm5279_vm10 = vmpackc.low %vm1766_vm11, %vm1766_vm11 }
 0x3ea   : > { %vm5301_vm11 = vmpackc.low %vm1845_vm2, %vm1845_vm2  ;;  %v1934_v50 = vsel %vm5216_vm3, %v5334_v7, 0 }
 0x3eb   : > { %2139 = vrot.lane.b32.xlu1 %v2133_v21, %s4000_s29  ;;  %v1436_v21 = vmul.f32 %v1424_v32, %v5156_v19 }
 0x3ec   : > { %2333 = vrot.lane.b32.xlu2 %v2328_v40, %s4005_s19  ;;  %2111 = vrot.lane.b32.xlu0 %v2105_v30, %s3993_s13  ;;  %v2217_v40 = vpack.c.b16 %v2212_v26, %v2211_v18  ;;  %v2412_v30 = vpack.c.b16 %v2406_v12, %v2405_v56  ;;  %v2296_v56 = vunpack.c.l.b16 %v1948_v55  ;;  %v2072_v18 = vunpack.c.l.b16 %v1756_v10  ;;  %v1472_v61 = vpop.permute.xlu1 %1471 }
 0x3ed   : > { %v5207_v26 = vpack.c.bf16 %v1436_v21, %v1436_v21  ;;  %v2268_v12 = vunpack.c.l.b16 %v1940_v38  ;;  %v2071_v21 = vunpack.c.l.b16 %v1755_v34  ;;  %v1678_v38 = vsel %vm5216_vm3, %v5220_v15, 0 }
 0x3ee   : > { %v2301_v20 = vpack.c.b16 %v2296_v56, %v2295_v51  ;;  %v1638_v34 = vsel %vm5241_vm1, %v5220_v15, 0  ;;  %v1876_v56 = vsel %vm5202_vm15, %v4800_v23, 0  ;;  %v2018_v51 = vunpack.c.l.b16 %v1678_v38 }
 0x3ef   : > { %v2077_v55 = vpack.c.b16 %v2072_v18, %v2071_v21  ;;  %v1677_v18 = vsel %vm5237_vm6, %v5207_v26, 0  ;;  %v1757_v23 = vsel %vm5251_vm14, %v5207_v26, 0  ;;  %v5286_v38 = vunpack.c.l.b16 %v1638_v34  ;;  %vm5292_vm14 = vmpackc.low %vm1765_vm9, %vm1765_vm9 }
 0x3f0   : > { %v2073_v33 = vunpack.c.l.b16 %v1757_v23  ;;  %v1798_v34 = vsel %vm5279_vm10, %v5220_v15, 0  ;;  %v1484_v23 = vmul.f32 %v1472_v61, %v5156_v19  ;;  %v1797_v61 = vsel %vm5292_vm14, %v5207_v26, 0 }
 0x3f1   : > { %v2102_v19 = vunpack.c.l.b16 %v1798_v34  ;;  %vm1885_vm9 = vcmp.eq.s32.totalorder %v5161_v53, 7 }
 0x3f3   : > { %2223 = vrot.lane.b32.xlu1 %v2217_v40, %s3998_s27  ;;  %v2267_v40 = vunpack.c.l.b16 %v1939_v1  ;;  %v1758_v1 = vsel %vm5233_vm0, %v5220_v15, 0  ;;  %vm5288_vm0 = vmpackc.low %vm1846_vm13, %vm1846_vm13  ;;  %vm6206_vm13 = vnez %v6168_v39  ;;  %v5328_v39 = vpack.c.bf16 %v1484_v23, %v1484_v23 }
 0x3f4   : > { %2417 = vrot.lane.b32.xlu2 %v2412_v30, %s4006_s25  ;;  %2195 = vrot.lane.b32.xlu0 %v2189_v13, %s6183_s23  ;;  %v1637_v13 = vsel %vm5228_vm12, %v5207_v26, 0  ;;  %v6201_v31 = vsel %vm5288_vm0, 4294967295, %v6200_v31 }
 0x3f5   : > { %v2273_v10 = vpack.c.b16 %v2268_v12, %v2267_v40  ;;  %v1875_v12 = vsel %vm5189_vm5, %v4790_v52, 0  ;;  %v2156_v40 = vunpack.c.l.b16 %v1876_v56  ;;  %v5284_v52 = vunpack.c.l.b16 %v1637_v13 }
 0x3f6   : > { %v5222_v5 = vpop.permute.xlu2 %2023  ;;  %v2155_v24 = vunpack.c.l.b16 %v1875_v12  ;;  %v1925_v17 = vsel %vm5228_vm12, %v5328_v39, 0  ;;  %vm6223_vm5 = vnez %v6197_v44  ;;  %vm6226_vm12 = vcmask 64512  }
 0x3f7   : > { %v1973_v44 = vsel %vm5301_vm11, %v5328_v39, 0 }
 0x3f8   : > { %v2161_v57 = vpack.c.b16 %v2156_v40, %v2155_v24  ;;  %v1878_v24 = vsel %vm5288_vm0, %v5220_v15, 0  ;;  %v1877_v40 = vsel %vm5301_vm11, %v5207_v26, 0  ;;  %vm5336_vm0 = vmpackc.low %vm1885_vm9, %vm1885_vm9  ;;  %vm6230_vm11 = vcmask 457728  }
 0x3f9   : > { %v1917_v37 = vsel %vm5336_vm0, %v5207_v26, 0 }
 0x3fb   : > { %2307 = vrot.lane.b32.xlu1 %v2301_v20, %s4001_s30  ;;  %v2074_v20 = vunpack.c.l.b16 %v1758_v1 }
 0x3fc   : > { %2083 = vrot.lane.b32.xlu2 %v2077_v55, %s3994_s15  ;;  %2279 = vrot.lane.b32.xlu0 %v2273_v10, %s3999_s28  ;;  %v2017_v55 = vunpack.c.l.b16 %v1677_v18  ;;  %v2157_v18 = vunpack.c.l.b16 %v1877_v40  ;;  %v1926_v10 = vsel %vm5241_vm1, %v5334_v7, 0  ;;  %vm6227_vm1 = vnez %v6201_v31 }
 0x3fd   : > { %v2078_v13 = vpack.c.b16 %v2074_v20, %v2073_v33  ;;  %v1931_v33 = vsel %vm6206_vm13, %v4926_v6, 0  ;;  %vm6054_vm13 = vcmask 64512  }
 0x3fe   : > { %v2052_v21 = vpop.permute.xlu2 %2051  ;;  %v2022_v56 = vpack.c.b16 %v2018_v51, %v2017_v55  ;;  %v1932_v51 = vsel %vm5050_vm4, %v4944_v36, 0  ;;  %vm1886_vm4 = vcmp.eq.s32.totalorder %v5159_v49, 7  ;;  %v2158_v55 = vunpack.c.l.b16 %v1878_v24 }
 0x3ff   : > { %v2240_v20 = vunpack.c.l.b16 %v1932_v51  ;;  %vm5330_vm2 = vmpackc.low %vm1886_vm4, %vm1886_vm4  ;;  %vm2444_vm4 = vcmask 195584  }
 0x400   : > { %v2162_v24 = vpack.c.b16 %v2158_v55, %v2157_v18  ;;  %v1918_v23 = vsel %vm5330_vm2, %v5220_v15, 0  ;;  %v2426_v18 = vsel %vm6054_vm13, %v6211_v63, %v5222_v5  ;;  %vm6215_vm13 = vcmask 261120  }
 0x401   : > { %v2186_v55 = vunpack.c.l.b16 %v1918_v23 }
 0x403   : > { %2029 = vrot.lane.b32.xlu1 %v2022_v56, %s3995_s24  ;;  %v2101_v56 = vunpack.c.l.b16 %v1797_v61  ;;  %v1933_v61 = vsel %vm5237_vm6, %v5328_v39, 0  ;;  %vm1686_vm6 = vcmp.eq.s32.totalorder %v5159_v49, 2  ;;  %s5766_s24 = scalar_lea.vmem [#allocation5], %s4141_s18 }
 0x404   : > { %2167 = vrot.lane.b32.xlu2 %v2161_v57, %s4003_s11  ;;  %2085 = vrot.lane.b32.xlu0 %v2078_v13, %s3994_s15  ;;  %v2239_v13 = vunpack.c.l.b16 %v1931_v33  ;;  %v1956_v33 = vsel %vm5098_vm8, %v4944_v36, 0  ;;  %vm6212_vm8 = vcmask 130048   ;;  %vm5370_vm9 = vmpackc.low %vm1686_vm6, %vm1686_vm6  ;;  %vm1806_vm6 = vcmp.eq.s32.totalorder %v5159_v49, 5  ;;  %s5759_s15 = scalar_lea.vmem [#allocation4], %s4141_s18 }
 0x405   : > { %v2106_v14 = vpack.c.b16 %v2102_v19, %v2101_v56  ;;  %v1955_v19 = vsel %vm5108_vm7, %v4926_v6, 0  ;;  %v2437_v30 = vsel %vm6212_vm8, %v2426_v18, %v2052_v21  ;;  %v2324_v29 = vunpack.c.l.b16 %v1956_v33 }
 0x406   : > { %v2136_v57 = vpop.permute.xlu2 %2135  ;;  %v2245_v51 = vpack.c.b16 %v2240_v20, %v2239_v13  ;;  %v2241_v56 = vunpack.c.l.b16 %v1933_v61  ;;  %vm1685_vm7 = vcmp.eq.s32.totalorder %v5161_v53, 2  ;;  %v2185_v13 = vunpack.c.l.b16 %v1917_v37 }
 0x407   : > { %vm2461_vm8 = vcmask 326656   ;;  %vm5375_vm3 = vmpackc.low %vm1685_vm7, %vm1685_vm7  ;;  %v1718_v18 = vsel %vm5370_vm9, %v5220_v15, 0  ;;  %vm6055_vm7 = vcmask 457728   ;;  %v1949_v6 = vsel %vm6223_vm5, %v5328_v39, 0 }
 0x408   : > { %v1941_v61 = vsel %vm5375_vm3, %v5328_v39, 0  ;;  %v1717_v1 = vsel %vm5375_vm3, %v5207_v26, 0  ;;  %vm5408_vm3 = vmpackc.low %vm1806_vm6, %vm1806_vm6  ;;  %vm2506_vm6 = vcmask 654336   ;;  %vm6228_vm5 = vcmask 130048  }
 0x409   : > { %v1838_v49 = vsel %vm5408_vm3, %v5220_v15, 0  ;;  %v1982_v15 = vsel %vm5330_vm2, %v5334_v7, 0  ;;  %vm2533_vm2 = vcmask 850944  }
 0x40b   : > { %2113 = vrot.lane.b32.xlu1 %v2106_v14, %s3993_s13  ;;  %v2323_v14 = vunpack.c.l.b16 %v1955_v19  ;;  %v1957_v19 = vsel %vm5292_vm14, %v5328_v39, 0  ;;  %vm1805_vm14 = vcmp.eq.s32.totalorder %v5161_v53, 5  ;;  %s4008_s13 = smov 2  }
 0x40c   : > { %2251 = vrot.lane.b32.xlu2 %v2245_v51, %s4004_s12  ;;  %2169 = vrot.lane.b32.xlu0 %v2162_v24, %s4003_s11  ;;  %v2242_v51 = vunpack.c.l.b16 %v1934_v50  ;;  %v2190_v24 = vpack.c.b16 %v2186_v55, %v2185_v13 }
 0x40d   : > { %v2080_v40 = vpop.permute.xlu1 %2079  ;;  %v2108_v20 = vpop.permute.xlu0 %2107  ;;  %v2329_v63 = vpack.c.b16 %v2324_v29, %v2323_v14  ;;  %v2325_v29 = vunpack.c.l.b16 %v1957_v19 }
 0x40e   : > { %v2446_v22 = vsel %vm2444_vm4, %v2437_v30, %v2080_v40  ;;  %v2164_v5 = vpop.permute.xlu2 %2163  ;;  %v2246_v33 = vpack.c.b16 %v2242_v51, %v2241_v56  ;;  %v1942_v30 = vsel %vm5370_vm9, %v5334_v7, 0  ;;  %vm6056_vm9 = vcmask 523264  }
 0x40f   : > { %v2454_v32 = vsel %vm6215_vm13, %v2446_v22, %v2108_v20  ;;  %vm2470_vm13 = vcmask 392192   ;;  %v2269_v20 = vunpack.c.l.b16 %v1941_v61  ;;  %v2046_v22 = vunpack.c.l.b16 %v1718_v18 }
 0x410   : > { %v2463_v37 = vsel %vm2461_vm8, %v2454_v32, %v2136_v57  ;;  %v1958_v57 = vsel %vm5279_vm10, %v5334_v7, 0  ;;  %v2270_v13 = vunpack.c.l.b16 %v1942_v30  ;;  %v2045_v51 = vunpack.c.l.b16 %v1717_v1  ;;  %vm5412_vm10 = vmpackc.low %vm1805_vm14, %vm1805_vm14 }
 0x411   : > { %v2472_v56 = vsel %vm2470_vm13, %v2463_v37, %v2164_v5  ;;  %v2326_v21 = vunpack.c.l.b16 %v1958_v57  ;;  %v1965_v23 = vsel %vm5412_vm10, %v5328_v39, 0  ;;  %v1966_v61 = vsel %vm5408_vm3, %v5334_v7, 0 }
 0x412   : > { %v2274_v32 = vpack.c.b16 %v2270_v13, %v2269_v20  ;;  %v2050_v53 = vpack.c.b16 %v2046_v22, %v2045_v51  ;;  %v1837_v19 = vsel %vm5412_vm10, %v5207_v26, 0  ;;  %v2353_v37 = vunpack.c.l.b16 %v1965_v23 }
 0x413   : > { %2197 = vrot.lane.b32.xlu1 %v2190_v24, %s6183_s23  ;;  %v2330_v5 = vpack.c.b16 %v2326_v21, %v2325_v29  ;;  %v2130_v1 = vunpack.c.l.b16 %v1838_v49  ;;  %v2129_v22 = vunpack.c.l.b16 %v1837_v19  ;;  %v2410_v29 = vunpack.c.l.b16 %v1982_v15 }
 0x414   : > { %2335 = vrot.lane.b32.xlu2 %v2329_v63, %s4005_s19  ;;  %2253 = vrot.lane.b32.xlu0 %v2246_v33, %s4004_s12  ;;  %v1981_v33 = vsel %vm5336_vm0, %v5328_v39, 0  ;;  %vm2515_vm0 = vcmask 719872   ;;  %vm2524_vm14 = vcmask 785408   ;;  %vm2542_vm3 = vcmask 916480  }
 0x415   : > { %v2192_v40 = vpop.permute.xlu1 %2191  ;;  %v2409_v20 = vunpack.c.l.b16 %v1981_v33  ;;  %v2134_v13 = vpack.c.b16 %v2130_v1, %v2129_v22  ;;  %vm2551_vm10 = vcmask 982016   ;;  %v2213_v24 = vunpack.c.l.b16 %v1925_v17 }
 0x416   : > { %v2248_v55 = vpop.permute.xlu2 %2247  ;;  %v2220_v50 = vpop.permute.xlu0 %2219  ;;  %v2481_v14 = vsel %vm6055_vm7, %v2472_v56, %v2192_v40  ;;  %vm2497_vm7 = vcmask 588800   ;;  %v2379_v49 = vunpack.c.l.b16 %v1971_v45  ;;  %v2297_v15 = vunpack.c.l.b16 %v1949_v6 }
 0x417   : > { %v2490_v63 = vsel %vm6056_vm9, %v2481_v14, %v2220_v50  ;;  %v2354_v50 = vunpack.c.l.b16 %v1966_v61  ;;  %v2414_v14 = vpack.c.b16 %v2410_v29, %v2409_v20 }
 0x418   : > { %v2499_v34 = vsel %vm2497_vm7, %v2490_v63, %v2248_v55  ;;  %v1972_v55 = vsel %vm5202_vm15, %v4944_v36, 0  ;;  %v2214_v63 = vunpack.c.l.b16 %v1926_v10  ;;  %vm6224_vm15 = vnez %v6191_v11 }
 0x419   : > { %v2358_v56 = vpack.c.b16 %v2354_v50, %v2353_v37  ;;  %v1974_v11 = vsel %vm6227_vm1, %v5334_v7, 0  ;;  %v2381_v50 = vunpack.c.l.b16 %v1973_v44  ;;  %vm6233_vm1 = vmmov %vm6228_vm5 }
 0x41a   : > { %v2218_v33 = vpack.c.b16 %v2214_v63, %v2213_v24  ;;  %v2382_v22 = vunpack.c.l.b16 %v1974_v11 }
 0x41b   : > { %2281 = vrot.lane.b32.xlu1 %v2274_v32, %s3999_s28 }
 0x41c   : > { %2057 = vrot.lane.b32.xlu2 %v2050_v53, %s3997_s26  ;;  %2337 = vrot.lane.b32.xlu0 %v2330_v5, %s4005_s19  ;;  %v2380_v53 = vunpack.c.l.b16 %v1972_v55  ;;  %v2386_v29 = vpack.c.b16 %v2382_v22, %v2381_v50 }
 0x41d   : > { %v2276_v18 = vpop.permute.xlu1 %2275 }
 0x41e   : > { %v2332_v30 = vpop.permute.xlu2 %2331  ;;  %v2304_v40 = vpop.permute.xlu0 %2303  ;;  %v2508_v57 = vsel %vm2506_vm6, %v2499_v34, %v2276_v18  ;;  %v2385_v27 = vpack.c.b16 %v2380_v53, %v2379_v49  ;;  %v1950_v18 = vsel %vm6224_vm15, %v5334_v7, 0  ;;  %vm6229_vm15 = vcmask 261120  }
 0x41f   : > { %v2517_v26 = vsel %vm2515_vm0, %v2508_v57, %v2304_v40  ;;  %v2298_v34 = vunpack.c.l.b16 %v1950_v18 }
 0x420   : > { %v2526_v21 = vsel %vm2524_vm14, %v2517_v26, %v2332_v30 }
 0x421   : > { %v2302_v30 = vpack.c.b16 %v2298_v34, %v2297_v15 }
 0x423   : > { %2365 = vrot.lane.b32.xlu1 %v2358_v56, %s4002_s21 }
 0x424   : > { %2141 = vrot.lane.b32.xlu2 %v2134_v13, %s4000_s29  ;;  %2421 = vrot.lane.b32.xlu0 %v2414_v14, %s4006_s25  ;;  %v6231_v14 = vpack.c.b16 %v5074_v43, %v5072_v16 }
 0x425   : > { %v2360_v51 = vpop.permute.xlu1 %2359 }
 0x426   : > { %v2535_v4 = vsel %vm2533_vm2, %v2526_v21, %v2360_v51  ;;  %v2416_v36 = vpop.permute.xlu2 %2415  ;;  %v2388_v32 = vpop.permute.xlu0 %2387 }
 0x427   : > { %v2544_v5 = vsel %vm2542_vm3, %v2535_v4, %v2388_v32 }
 0x428   : > { %v2553_v23 = vsel %vm2551_vm10, %v2544_v5, %v2416_v36 }
 0x429   : > { %2806 = vmatmul.bf16.vlgmr.msra.gmra.mxu2 %v2553_v23 }
 0x42b   : > { %2363 = vrot.lane.b32.xlu1 %v6222_v9, %s4002_s21  ;;  %v4007_v9 = vmov 0  }
 0x42c   : > { %2225 = vrot.lane.b32.xlu2 %v2218_v33, %s3998_s27  ;;  %2391 = vrot.lane.b32.xlu0 %v2385_v27, %s3989_s22 }
 0x42d   : > { %v2026_v61 = vpop.permute.xlu1 %2025  ;;  %3787 = vset.pattern.permute.xlu0 %v4007_v9  ;;  %3789 = vset.pattern.permute.xlu1 %v4007_v9 }
 0x42e   : > { %v2082_v19 = vpop.permute.xlu2 %2081  ;;  %v2054_v37 = vpop.permute.xlu0 %2053  ;;  %v2429_v2 = vsel %vm6226_vm12, %v6225_v35, %v2026_v61  ;;  %3788 = vset.pattern.permute.xlu2 %v4007_v9 }
 0x42f   : > { %v2439_v1 = vsel %vm6228_vm5, %v2429_v2, %v2054_v37  ;;  %vm6234_vm5 = vmmov %vm6229_vm15 }
 0x430   : > { %v2448_v25 = vsel %vm2444_vm4, %v2439_v1, %v2082_v19 }
 0x434   : > { %2309 = vrot.lane.b32.xlu2 %v2302_v30, %s4001_s30 }
 0x435   : > { %v2110_v40 = vpop.permute.xlu1 %2109 }
 0x436   : > { %v2166_v20 = vpop.permute.xlu2 %2165  ;;  %v2138_v57 = vpop.permute.xlu0 %2137  ;;  %v2456_v47 = vsel %vm6229_vm15, %v2448_v25, %v2110_v40  ;;  %v6232_v40 = vpack.c.b16 %v5286_v38, %v5284_v52  ;;  %vm6236_vm15 = vmmov %vm6226_vm12 }
 0x437   : > { %v2465_v12 = vsel %vm2461_vm8, %v2456_v47, %v2138_v57 }
 0x438   : > { %v2474_v31 = vsel %vm2470_vm13, %v2465_v12, %v2166_v20 }
 0x43c   : > { %2393 = vrot.lane.b32.xlu2 %v2386_v29, %s3989_s22  ;;  %s5503_s22 = scalar_lea.vmem [#allocation6], %s4141_s18  ;;  %v6235_v29 = vpack.c.b16 %v5014_v0, %v5028_v28  ;;  %s4009_s18 = smov 1  }
 0x43d   : > { %v2194_v39 = vpop.permute.xlu1 %2193  ;;  %v5506_v19 = vld [vmem:[%s5503_s22 + $0x38] sm:$0xff]  ;;  %v5510_v30 = vld [vmem:[%s5503_s22 + $0x28] sm:$0xff]  ;;  %v5521_v47 = vld [vmem:[%s5503_s22 + $0x30] sm:$0xff] }
 0x43e   : > { %v2250_v56 = vpop.permute.xlu2 %2249  ;;  %v2222_v26 = vpop.permute.xlu0 %2221  ;;  %v2483_v7 = vsel %vm6230_vm11, %v2474_v31, %v2194_v39  ;;  %2865 = vperm.xlu0 %3787, %v5506_v19   ;;  %2859 = vperm.xlu1 %3789, %v5510_v30   ;;  %vm6237_vm11 = vmmov %vm6233_vm1 }
 0x43f   : > { %v2492_v13 = vsel %vm6056_vm9, %v2483_v7, %v2222_v26 }
 0x440   : > { %v2501_v21 = vsel %vm2497_vm7, %v2492_v13, %v2250_v56 }
 0x444   : > { %2419 = vrot.lane.b32.xlu2 %v6231_v14, %s4006_s25  ;;  %s3634_s25 = sshll.u32 %s6301_s16, 3 }
 0x445   : > { %v2278_v17 = vpop.permute.xlu1 %2277  ;;  %s774_s28 = scalar_lea.vmem %s6027_s10, %s3634_s25 }
 0x446   : > { %v2334_v55 = vpop.permute.xlu2 %2333  ;;  %v2306_v51 = vpop.permute.xlu0 %2305  ;;  %v2510_v10 = vsel %vm2506_vm6, %v2501_v21, %v2278_v17 }
 0x447   : > { %v2519_v45 = vsel %vm2515_vm0, %v2510_v10, %v2306_v51 }
 0x448   : > { %v2528_v32 = vsel %vm2524_vm14, %v2519_v45, %v2334_v55  ;;  %v5538_v55 = vld [vmem:[%s5503_s22 + $0x20] sm:$0xff] }
 0x44c   : > { %2862 = vperm.xlu2 %3788, %v5521_v47  }
 0x44d   : > { %v2390_v4 = vpop.permute.xlu1 %2389 }
 0x44e   : > { %v2418_v36 = vpop.permute.xlu2 %2417  ;;  %v2362_v24 = vpop.permute.xlu0 %2361 }
 0x44f   : > { %v2537_v53 = vsel %vm2533_vm2, %v2528_v32, %v2362_v24 }
 0x450   : > { %v2546_v5 = vsel %vm2542_vm3, %v2537_v53, %v2390_v4 }
 0x451   : > { %v2556_v16 = vsel %vm2551_vm10, %v2546_v5, %v2418_v36  ;;  %v3901_v36 = vpop.eup %3900 }
 0x452   : > { %2811 = vmatmul.bf16.gmra.mxu2 %v2556_v16  ;;  %v997_v53 = vmul.f32 %v3901_v36, %v4369_v46 }
 0x454   : > { %2856 = vperm.xlu2 %3788, %v5538_v55  }
 0x455   : > { %v2056_v43 = vpop.permute.xlu1 %2055 }
 0x456   : > { %v2084_v23 = vpop.permute.xlu2 %2083  ;;  %v2028_v63 = vpop.permute.xlu0 %2027 }
 0x457   : > { %v2432_v12 = vsel %vm6236_vm15, %v6235_v29, %v2028_v63 }
 0x458   : > { %v2441_v38 = vsel %vm6237_vm11, %v2432_v12, %v2056_v43 }
 0x459   : > { %v2450_v7 = vsel %vm2444_vm4, %v2441_v38, %v2084_v23 }
 0x45d   : > { %v2140_v49 = vpop.permute.xlu1 %2139 }
 0x45e   : > { %v2168_v33 = vpop.permute.xlu2 %2167  ;;  %v2112_v27 = vpop.permute.xlu0 %2111 }
 0x465   : > { %v2224_v6 = vpop.permute.xlu1 %2223 }
 0x466   : > { %v2252_v61 = vpop.permute.xlu2 %2251  ;;  %v2196_v18 = vpop.permute.xlu0 %2195 }
 0x46d   : > { %v2308_v37 = vpop.permute.xlu1 %2307 }
 0x46e   : > { %v2336_v15 = vpop.permute.xlu2 %2335  ;;  %v2280_v34 = vpop.permute.xlu0 %2279 }
 0x475   : > { %v2030_v35 = vpop.permute.xlu1 %2029 }
 0x476   : > { %v2058_v2 = vpop.permute.xlu2 %2057  ;;  %v2086_v44 = vpop.permute.xlu0 %2085  ;;  %v2435_v11 = vsel %vm6226_vm12, %v6232_v40, %v2030_v35  ;;  %vm6238_vm12 = vcmask 457728  }
 0x477   : > { %v2443_v1 = vsel %vm6233_vm1, %v2435_v11, %v2058_v2  ;;  %vm6239_vm1 = vmmov %vm6234_vm5  ;;  %v3903_v35 = vpop.eup %3902 }
 0x478   : > { %v2452_v22 = vsel %vm2444_vm4, %v2443_v1, %v2086_v44  ;;  %v2458_v0 = vsel %vm6239_vm1, %v2450_v7, %v2112_v27  ;;  %vm6240_vm4 = vmmov %vm6238_vm12  ;;  %v998_v27 = vsub.f32 1.0, %v997_v53  ;;  %v1012_v44 = vmul.f32 %v3903_v35, %v4373_v48 }
 0x479   : > { %v2467_v14 = vsel %vm2461_vm8, %v2458_v0, %v2140_v49 }
 0x47a   : > { %v2476_v45 = vsel %vm2470_vm13, %v2467_v14, %v2168_v33  ;;  %v999_v40 = vmul.f32 %v3901_v36, %v998_v27  ;;  %v1050_v27 = vand.u32 2147483647, %v4377_v59 }
 0x47b   : > { %v2485_v32 = vsel %vm6240_vm4, %v2476_v45, %v2196_v18 }
 0x47c   : > { %v2494_v5 = vsel %vm6056_vm9, %v2485_v32, %v2224_v6 }
 0x47d   : > { %v2114_v20 = vpop.permute.xlu1 %2113  ;;  %v2503_v23 = vsel %vm2497_vm7, %v2494_v5, %v2252_v61  ;;  %v1035_v5 = vand.u32 2147483647, %v4380_v62 }
 0x47e   : > { %v2142_v57 = vpop.permute.xlu2 %2141  ;;  %v2170_v50 = vpop.permute.xlu0 %2169  ;;  %v2460_v25 = vsel %vm6234_vm5, %v2452_v22, %v2114_v20  ;;  %v2512_v9 = vsel %vm2506_vm6, %v2503_v23, %v2280_v34 }
 0x47f   : > { %v2469_v52 = vsel %vm2461_vm8, %v2460_v25, %v2142_v57  ;;  %v2521_v6 = vsel %vm2515_vm0, %v2512_v9, %v2308_v37  ;;  %v1013_v57 = vsub.f32 1.0, %v1012_v44  ;;  %vm1002_vm8 = vweird.f32 %v3901_v36 }
 0x480   : > { %v2478_v31 = vsel %vm2470_vm13, %v2469_v52, %v2170_v50  ;;  %v2530_v61 = vsel %vm2524_vm14, %v2521_v6, %v2336_v15  ;;  %v1000_v50 = vadd.f32 %v3901_v36, %v999_v40  ;;  %v1007_v25 = vand.u32 2147483648, %v4369_v46 }
 0x481   : > { %vm1001_vm13 = vweird.f32 %v4369_v46  ;;  %v1005_v37 = vand.u32 2147483647, %v4369_v46  ;;  %v1014_v12 = vmul.f32 %v3903_v35, %v1013_v57  ;;  %vm1036_vm1 = vcmp.eq.f32.partialorder %v1035_v5, 8.507059e+37  ;;  %v6254_v5 = vld [vmem:[#allocation10_spill] sm:$0xff] }
 0x482   : > { %v1008_v52 = vor.u32 1.1754944e-38, %v1007_v25 }
 0x485   : > { %v2198_v39 = vpop.permute.xlu1 %2197 }
 0x486   : > { %v2226_v56 = vpop.permute.xlu2 %2225  ;;  %v2254_v26 = vpop.permute.xlu0 %2253  ;;  %v2487_v13 = vsel %vm6238_vm12, %v2478_v31, %v2198_v39  ;;  %v1015_v39 = vadd.f32 %v3903_v35, %v1014_v12  ;;  %v1020_v31 = vand.u32 2147483647, %v4373_v48 }
 0x487   : > { %v2496_v28 = vsel %vm6056_vm9, %v2487_v13, %v2226_v56  ;;  %v1022_v56 = vand.u32 2147483648, %v4373_v48 }
 0x488   : > { %v2505_v51 = vsel %vm2497_vm7, %v2496_v28, %v2254_v26  ;;  %vm1003_vm7 = vmor %vm1001_vm13, %vm1002_vm8  ;;  %vm1046_vm8 = vweird.f32 %v4377_v59 }
 0x489   : > { %v1004_v15 = vsel %vm1003_vm7, %v3901_v36, %v1000_v50  ;;  %v1023_v13 = vor.u32 1.1754944e-38, %v1022_v56  ;;  %vm1051_vm7 = vcmp.eq.f32.partialorder %v1050_v27, 8.507059e+37 }
 0x48d   : > { %v2282_v17 = vpop.permute.xlu1 %2281 }
 0x48e   : > { %v2310_v21 = vpop.permute.xlu2 %2309  ;;  %v2338_v10 = vpop.permute.xlu0 %2337  ;;  %v2514_v4 = vsel %vm2506_vm6, %v2505_v51, %v2282_v17  ;;  %vm1006_vm6 = vcmp.eq.f32.partialorder %v1005_v37, 8.507059e+37  ;;  %v6249_v37 = vld [vmem:[#allocation12_spill] sm:$0xff] }
 0x48f   : > { %v2523_v24 = vsel %vm2515_vm0, %v2514_v4, %v2310_v21  ;;  %v1009_v38 = vsel %vm1006_vm6, %v1008_v52, %v1004_v15  ;;  %vm1017_vm0 = vweird.f32 %v3903_v35 }
 0x490   : > { %v2532_v16 = vsel %vm2524_vm14, %v2523_v24, %v2338_v10  ;;  %v1010_v26 = vmul.f32 %v4295_v41, %v1009_v38  ;;  %vm1016_vm14 = vweird.f32 %v4373_v48  ;;  %v3905_v10 = vpop.eup %3904 }
 0x491   : > { %v1027_v45 = vmul.f32 %v3905_v10, %v4380_v62  ;;  %v3907_v36 = vpop.eup %3906  ;;  %vm1032_vm15 = vweird.f32 %v3905_v10 }
 0x492   : > { %v1382_v46 = vmul.f32 %v4448_v54, %v1010_v26  ;;  %vm1047_vm4 = vweird.f32 %v3907_v36 }
 0x493   : > { %v1028_v4 = vsub.f32 1.0, %v1027_v45  ;;  %vm1048_vm13 = vmor %vm1046_vm8, %vm1047_vm4  ;;  %v1080_v45 = vand.u32 2147483647, %v6249_v37 }
 0x495   : > { %v2366_v43 = vpop.permute.xlu1 %2365  ;;  %v1029_v32 = vmul.f32 %v3905_v10, %v1028_v4 }
 0x496   : > { %v2394_v63 = vpop.permute.xlu2 %2393  ;;  %v2541_v49 = vsel %vm2533_vm2, %v2532_v16, %v2366_v43  ;;  %v2422_v33 = vpop.permute.xlu0 %2421 }
 0x497   : > { %v2550_v18 = vsel %vm2542_vm3, %v2541_v49, %v2394_v63  ;;  %v1030_v53 = vadd.f32 %v3905_v10, %v1029_v32 }
 0x498   : > { %v2562_v2 = vsel %vm2551_vm10, %v2550_v18, %v2422_v33  ;;  %v1052_v33 = vand.u32 2147483648, %v4377_v59 }
 0x499   : > { %2821 = vmatmul.bf16.vlgmr.msra.gmra.mxu3 %v2562_v2 }
 0x49a   : > { %v1053_v2 = vor.u32 1.1754944e-38, %v1052_v33 }
 0x49d   : > { %v2364_v11 = vpop.permute.xlu1 %2363 }
 0x49e   : > { %v2539_v1 = vsel %vm2533_vm2, %v2530_v61, %v2364_v11  ;;  %v2392_v20 = vpop.permute.xlu0 %2391  ;;  %v2420_v34 = vpop.permute.xlu2 %2419  ;;  %vm1018_vm2 = vmor %vm1016_vm14, %vm1017_vm0  ;;  %v6245_v61 = vld [vmem:[#allocation9_spill] sm:$0xff] }
 0x49f   : > { %v2548_v22 = vsel %vm2542_vm3, %v2539_v1, %v2392_v20  ;;  %v1019_v7 = vsel %vm1018_vm2, %v3903_v35, %v1015_v39  ;;  %vm1021_vm3 = vcmp.eq.f32.partialorder %v1020_v31, 8.507059e+37  ;;  %v6243_v35 = vld [vmem:[#allocation16_spill] sm:$0xff]  ;;  %v6246_v20 = vld [vmem:[#allocation14_spill] sm:$0xff] }
 0x4a0   : > { %v2559_v29 = vsel %vm2551_vm10, %v2548_v22, %v2420_v34  ;;  %v1024_v14 = vsel %vm1021_vm3, %v1023_v13, %v1019_v7  ;;  %vm6241_vm10 = vmmov %vm6237_vm11  ;;  %vm1031_vm11 = vweird.f32 %v4380_v62  ;;  %v6248_v34 = vld [vmem:[#allocation13_spill] sm:$0xff]  ;;  %v6250_v13 = vld [vmem:[#allocation11_spill] sm:$0xff] }
 0x4a1   : > { %2816 = vmatmul.bf16.gmra.mxu2 %v2559_v29  ;;  %v1025_v41 = vmul.f32 %v4312_v58, %v1024_v14  ;;  %vm6242_vm5 = vmmov %vm6241_vm10  ;;  %v1042_v58 = vmul.f32 %v3907_v36, %v4377_v59  ;;  %3908 = vrcp.f32 %v6248_v34  ;;  %v1097_v38 = vand.u32 2147483648, %v6248_v34 }
 0x4a2   : > { %vm1033_vm12 = vmor %vm1031_vm11, %vm1032_vm15  ;;  %3910 = vrcp.f32 %v6249_v37  ;;  %vm1091_vm2 = vweird.f32 %v6248_v34  ;;  %v1095_v39 = vand.u32 2147483647, %v6248_v34  ;;  %vm1076_vm11 = vweird.f32 %v6249_v37 }
 0x4a3   : > { %v1383_v48 = vmul.f32 %v4476_v8, %v1025_v41  ;;  %v1043_v24 = vsub.f32 1.0, %v1042_v58  ;;  %v1037_v8 = vand.u32 2147483648, %v4380_v62  ;;  %v1034_v43 = vsel %vm1033_vm12, %v3905_v10, %v1030_v53  ;;  %vm6244_vm6 = vmmov %vm6242_vm5 }
 0x4a4   : > { %vm6247_vm0 = vmmov %vm6242_vm5  ;;  %v1098_v31 = vor.u32 1.1754944e-38, %v1097_v38  ;;  %v1082_v10 = vand.u32 2147483648, %v6249_v37 }
 0x4a5   : > { %v1044_v16 = vmul.f32 %v3907_v36, %v1043_v24  ;;  %v1038_v23 = vor.u32 1.1754944e-38, %v1037_v8  ;;  %vm6251_vm15 = vmmov %vm6247_vm0 }
 0x4a6   : > { %vm6253_vm4 = vmmov %vm6247_vm0 }
 0x4a7   : > { %v1039_v63 = vsel %vm1036_vm1, %v1038_v23, %v1034_v43  ;;  %v1045_v49 = vadd.f32 %v3907_v36, %v1044_v16  ;;  %v3909_v22 = vpop.eup %3908  ;;  %vm1081_vm1 = vcmp.eq.f32.partialorder %v1080_v45, 8.507059e+37  ;;  %v6255_v23 = vld [vmem:[#allocation17_spill] sm:$0xff]  ;;  %vm6256_vm8 = vmmov %vm6247_vm0 }
 0x4a8   : > { %v1040_v9 = vmul.f32 %v4316_v60, %v1039_v63  ;;  %v1087_v25 = vmul.f32 %v3909_v22, %v6248_v34  ;;  %vm1092_vm14 = vweird.f32 %v3909_v22  ;;  %v3911_v52 = vpop.eup %3910 }
 0x4a9   : > { %v1049_v18 = vsel %vm1048_vm13, %v3907_v36, %v1045_v49  ;;  %vm1093_vm3 = vmor %vm1091_vm2, %vm1092_vm14  ;;  %v1072_v56 = vmul.f32 %v3911_v52, %v6249_v37  ;;  %v1083_v36 = vor.u32 1.1754944e-38, %v1082_v10 }
 0x4aa   : > { %v1384_v62 = vmul.f32 %v6243_v35, %v1040_v9  ;;  %v1054_v40 = vsel %vm1051_vm7, %v1053_v2, %v1049_v18  ;;  %v1088_v29 = vsub.f32 1.0, %v1087_v25  ;;  %vm6257_vm13 = vmmov %vm6247_vm0  ;;  %v5634_v18 = vld [vmem:[%s5503_s22 + $0x8] sm:$0xff]  ;;  %v5638_v35 = vld [vmem:[%s5503_s22] sm:$0xff]  ;;  %v2863_v2 = vpop.permute.xlu2 %2862 }
 0x4ab   : > { %v1055_v1 = vmul.f32 %v6245_v61, %v1054_v40  ;;  %v1073_v7 = vsub.f32 1.0, %v1072_v56 }
 0x4ac   : > { %v2807_v0 = vpop.f32.mrf.mxu2  ;;  %v1089_v15 = vmul.f32 %v3909_v22, %v1088_v29 }
 0x4ad   : > { %v5569_v28 = vadd.f32 %v2807_v0, %v1382_v46  ;;  %v1385_v59 = vmul.f32 %v6246_v20, %v1055_v1  ;;  %v1074_v14 = vmul.f32 %v3911_v52, %v1073_v7 }
 0x4ae   : > { %v1090_v12 = vadd.f32 %v3909_v22, %v1089_v15 }
 0x4af   : > { %v2947_v17 = vsel %vm6241_vm10, %v5569_v28, -inf  ;;  %vm1096_vm10 = vcmp.eq.f32.partialorder %v1095_v39, 8.507059e+37 }
 0x4b0   : > { %2948 = vmax.xlane.f32.xlu0 %v2947_v17  ;;  %v1094_v26 = vsel %vm1093_vm3, %v3909_v22, %v1090_v12  ;;  %v2866_v40 = vpop.permute.xlu0 %2865  ;;  %v2860_v34 = vpop.permute.xlu1 %2859 }
 0x4b1   : > { %v1099_v46 = vsel %vm1096_vm10, %v1098_v31, %v1094_v26 }
 0x4b2   : > { %v1100_v0 = vmul.f32 %v6250_v13, %v1099_v46 }
 0x4b4   : > { %v2809_v51 = vpop.f32.mrf.mxu2  ;;  %v1388_v17 = vmul.f32 %v5116_v3, %v1100_v0  ;;  %v6252_v3 = vld [vmem:[#allocation15_spill] sm:$0xff] }
 0x4b5   : > { %v5576_v21 = vadd.f32 %v2809_v51, %v1383_v48  ;;  %v1075_v51 = vadd.f32 %v3911_v52, %v1074_v14 }
 0x4b7   : > { %v2950_v54 = vsel %vm6242_vm5, %v5576_v21, -inf  ;;  %vm1077_vm5 = vweird.f32 %v3911_v52 }
 0x4b8   : > { %2951 = vmax.xlane.f32.xlu1 %v2950_v54  ;;  %vm1078_vm12 = vmor %vm1076_vm11, %vm1077_vm5 }
 0x4b9   : > { %v1079_v4 = vsel %vm1078_vm12, %v3911_v52, %v1075_v51  ;;  %vm6260_vm5 = vmmov %vm6253_vm4 }
 0x4ba   : > { %v1084_v24 = vsel %vm1081_vm1, %v1083_v36, %v1079_v4  ;;  %vm6262_vm11 = vmmov %vm6253_vm4 }
 0x4bb   : > { %v1085_v16 = vmul.f32 %v6254_v5, %v1084_v24  ;;  %vm6263_vm12 = vmmov %vm6253_vm4 }
 0x4bc   : > { %vm6264_vm1 = vmmov %vm6253_vm4 }
 0x4bd   : > { %v1387_v43 = vmul.f32 %v4885_v42, %v1085_v16  ;;  %v5642_v42 = vld [vmem:[%s5503_s22 + $0x10] sm:$0xff] }
 0x4d5   : > { %v2812_v6 = vpop.f32.mrf.mxu2 }
 0x4d6   : > { %v5591_v44 = vadd.f32 %v2812_v6, %v1384_v62  ;;  %v5645_v62 = vld [vmem:[%s5503_s22 + $0x18] sm:$0xff]  ;;  %v2857_v6 = vpop.permute.xlu2 %2856 }
 0x4d8   : > { %v2953_v11 = vsel %vm6244_vm6, %v5591_v44, -inf  ;;  %vm6259_vm6 = vmmov %vm6247_vm0 }
 0x4d9   : > { %2954 = vmax.xlane.f32.xlu2 %v2953_v11  ;;  %v6258_v11 = vld [vmem:[#allocation8_spill] sm:$0xff] }
 0x4da   : > { %vm2871_vm7 = vcmp.eq.s32.totalorder %v6258_v11, %v2857_v6  ;;  %vm2873_vm2 = vcmp.eq.s32.totalorder %v6258_v11, %v2863_v2  ;;  %vm2872_vm3 = vcmp.eq.s32.totalorder %v6258_v11, %v2860_v34  ;;  %v6274_v34 = vmov 0.0  }
 0x4dd   : > { %v2814_v57 = vpop.f32.mrf.mxu2 }
 0x4de   : > { %v5597_v60 = vadd.f32 %v2814_v57, %v1385_v59 }
 0x4e0   : > { %v2956_v50 = vsel %vm6247_vm0, %v5597_v60, -inf  ;;  %vm2874_vm0 = vcmp.eq.s32.totalorder %v6258_v11, %v2866_v40 }
 0x4e1   : > { %2957 = vmax.xlane.f32.xlu0 %v2956_v50 }
 0x51c   : > { %v2822_v41 = vpop.f32.mrf.mxu3 }
 0x51d   : > { %v5610_v48 = vadd.f32 %v2822_v41, %v1388_v17 }
 0x51f   : > { %v2965_v54 = vsel %vm6251_vm15, %v5610_v48, -inf  ;;  %v2881_v22 = vsel %vm2873_vm2, %v5610_v48, 0.0  ;;  %vm6261_vm15 = vmmov %vm6253_vm4 }
 0x520   : > { %2966 = vmax.xlane.f32.xlu0 %v2965_v54  ;;  %v2901_v52 = vsel %vm6262_vm11, %v2881_v22, 0.0 }
 0x523   : > { %v2949_v59 = vpop.xlane.xlu0 %2948 }
 0x524   : > { %v2817_v58 = vpop.f32.mrf.mxu2  ;;  %v2824_v8 = vpop.f32.mrf.mxu3  ;;  %vm2971_vm10 = vcmp.eq.f32.partialorder %v5569_v28, %v2949_v59 }
 0x525   : > { %v5618_v32 = vadd.f32 %v2817_v58, %v6252_v3  ;;  %v5625_v63 = vadd.f32 %v2824_v8, %v6255_v23  ;;  %v2979_v37 = vsel %vm2971_vm10, %v6258_v11, 16 }
 0x526   : > { %v5669_v39 = vsel %vm6263_vm12, %v2979_v37, 2147483647 }
 0x527   : > { %v2959_v53 = vsel %vm6253_vm4, %v5618_v32, -inf  ;;  %v2968_v27 = vsel %vm6256_vm8, %v5625_v63, -inf  ;;  %v2879_v61 = vsel %vm2871_vm7, %v5618_v32, 0.0  ;;  %v2882_v50 = vsel %vm2874_vm0, %v5625_v63, 0.0  ;;  %vm6265_vm8 = vmmov %vm6264_vm1 }
 0x528   : > { %2960 = vmax.xlane.f32.xlu1 %v2959_v53  ;;  %v2895_v20 = vsel %vm6259_vm6, %v2879_v61, 0.0  ;;  %v2904_v29 = vsel %vm6261_vm15, %v2882_v50, 0.0  ;;  %v2989_v31 = vshra.s32 %v5669_v39, 16  ;;  %vm6266_vm7 = vmmov %vm6264_vm1  ;;  %v2988_v37 = vand.u32 65535, %v5669_v39 }
 0x529   : > { %vm6267_vm0 = vmmov %vm6264_vm1 }
 0x52a   : > { %v5678_v7 = vcvt.s32.f32 %v2989_v31  ;;  %vm6269_vm10 = vmmov %vm6267_vm0 }
 0x52b   : > { %v2952_v45 = vpop.xlane.xlu1 %2951  ;;  %vm6270_vm11 = vmmov %vm6267_vm0 }
 0x52c   : > { %v2819_v49 = vpop.f32.mrf.mxu2  ;;  %vm6271_vm12 = vmmov %vm6267_vm0 }
 0x52d   : > { %v5627_v33 = vadd.f32 %v2819_v49, %v1387_v43 }
 0x52f   : > { %v2962_v9 = vsel %vm6257_vm13, %v5627_v33, -inf  ;;  %v2880_v15 = vsel %vm2872_vm3, %v5627_v33, 0.0  ;;  %vm6268_vm3 = vmmov %vm6267_vm0 }
 0x530   : > { %2969 = vmax.xlane.f32.xlu1 %v2968_v27  ;;  %2963 = vmax.xlane.f32.xlu2 %v2962_v9  ;;  %v2898_v56 = vsel %vm6264_vm1, %v2880_v15, 0.0 }
 0x534   : > { %2847 = vperm.xlu0 %3787, %v5634_v18  }
 0x53c   : > { %2844 = vperm.xlu0 %3787, %v5638_v35  }
 0x548   : > { %2850 = vperm.xlu2 %3788, %v5642_v42  }
 0x549   : > { %2853 = vperm.xlu1 %3789, %v5645_v62  }
 0x54c   : > { %v2955_v1 = vpop.xlane.xlu2 %2954 }
 0x54d   : > { %vm2973_vm14 = vcmp.eq.f32.partialorder %v5591_v44, %v2955_v1 }
 0x54e   : > { %v2981_v57 = vsel %vm2973_vm14, %v6258_v11, 16 }
 0x54f   : > { %v5661_v25 = vsel %vm6260_vm5, %v2981_v57, 2147483647  ;;  %vm2972_vm5 = vcmp.eq.f32.partialorder %v5576_v21, %v2952_v45 }
 0x550   : > { %v3019_v12 = vshra.s32 %v5661_v25, 16  ;;  %v3018_v31 = vand.u32 65535, %v5661_v25 }
 0x552   : > { %v5673_v26 = vcvt.s32.f32 %v3019_v12 }
 0x554   : > { %v2958_v38 = vpop.xlane.xlu0 %2957 }
 0x555   : > { %vm2974_vm4 = vcmp.eq.f32.partialorder %v5597_v60, %v2958_v38 }
 0x556   : > { %v2982_v46 = vsel %vm2974_vm4, %v6258_v11, 16  ;;  %vm6272_vm4 = vmmov %vm6267_vm0 }
 0x557   : > { %v5681_v13 = vsel %vm6265_vm8, %v2982_v46, 2147483647  ;;  %v3138_v46 = vld [vmem:[%s5766_s24 + $0x38] sm:$0xff] }
 0x558   : > { %v3034_v0 = vshra.s32 %v5681_v13, 16 }
 0x55a   : > { %v5685_v14 = vcvt.s32.f32 %v3034_v0  ;;  %v3020_v0 = vcvt.s32.f32 %v3018_v31 }
 0x566   : > { %2896 = vadd.xlane.f32.xlu0 %v2895_v20 }
 0x56e   : > { %2905 = vadd.xlane.f32.xlu0 %v2904_v29 }
 0x571   : > { %2902 = vadd.xlane.f32.xlu2 %v2901_v52  ;;  %v2990_v52 = vcvt.s32.f32 %v2988_v37 }
 0x573   : > { %2899 = vadd.xlane.f32.xlu1 %v2898_v56  ;;  %v3130_v56 = vld [vmem:[%s5759_s15 + $0x38] sm:$0xff] }
 0x574   : > { %3912 = vlog2.f32 %v3130_v56 }
 0x576   : > { %3022 = vmin.xlane.f32.xlu0 %v5673_v26 }
 0x57b   : > { %2992 = vmin.xlane.f32.xlu1 %v5678_v7 }
 0x583   : > { %3037 = vmin.xlane.f32.xlu1 %v5685_v14 }
 0x593   : > { %v2967_v17 = vpop.xlane.xlu0 %2966 }
 0x594   : > { %vm2977_vm13 = vcmp.eq.f32.partialorder %v5610_v48, %v2967_v17  ;;  %v3913_v17 = vpop.eup %3912 }
 0x595   : > { %v2985_v41 = vsel %vm2977_vm13, %v6258_v11, 16  ;;  %vm6273_vm13 = vmmov %vm6267_vm0  ;;  %v3178_v45 = vmul.f32 0.6931472, %v3913_v17 }
 0x596   : > { %v5691_v51 = vsel %vm6266_vm7, %v2985_v41, 2147483647  ;;  %vm2946_vm7 = vcmp.ne.s32.totalorder %v5506_v19, 0 }
 0x597   : > { %v3079_v54 = vshra.s32 %v5691_v51, 16  ;;  %v3698_v22 = vsel %vm2946_vm7, 1.0, %v6274_v34 }
 0x599   : > { %v5694_v10 = vcvt.s32.f32 %v3079_v54  ;;  %v3129_v54 = vld [vmem:[%s5759_s15 + $0x30] sm:$0xff] }
 0x59b   : > { %3082 = vmin.xlane.f32.xlu1 %v5694_v10  ;;  %v2961_v3 = vpop.xlane.xlu1 %2960 }
 0x59c   : > { %vm2975_vm1 = vcmp.eq.f32.partialorder %v5618_v32, %v2961_v3  ;;  %v3186_v3 = vmax.f32 %v3178_v45, -100.0 }
 0x59d   : > { %v2983_v40 = vsel %vm2975_vm1, %v6258_v11, 16  ;;  %vm6277_vm1 = vmmov %vm6272_vm4 }
 0x59e   : > { %v5728_v61 = vsel %vm6272_vm4, %v2983_v40, 2147483647 }
 0x5a3   : > { %v2964_v4 = vpop.xlane.xlu2 %2963  ;;  %v5712_v49 = vpop.xlane.xlu1 %2969 }
 0x5a4   : > { %vm2976_vm6 = vcmp.eq.f32.partialorder %v5627_v33, %v2964_v4  ;;  %v2980_v33 = vsel %vm2972_vm5, %v6258_v11, 16  ;;  %v3137_v4 = vld [vmem:[%s5766_s24 + $0x30] sm:$0xff]  ;;  %vm6275_vm5 = vcmask 64512  }
 0x5a5   : > { %v2984_v36 = vsel %vm2976_vm6, %v6258_v11, 16  ;;  %vm2945_vm6 = vcmp.ne.s32.totalorder %v5521_v47, 0 }
 0x5a6   : > { %v5700_v58 = vsel %vm6267_vm0, %v2984_v36, 2147483647  ;;  %v2848_v24 = vpop.permute.xlu0 %2847  ;;  %v3193_v36 = vsub.f32 1.0, %v3129_v54 }
 0x5a7   : > { %v3064_v48 = vshra.s32 %v5700_v58, 16  ;;  %vm2868_vm14 = vcmp.eq.s32.totalorder %v6258_v11, %v2848_v24 }
 0x5a8   : > { %v2876_v43 = vsel %vm2868_vm14, %v5576_v21, 0.0 }
 0x5a9   : > { %v5703_v53 = vcvt.s32.f32 %v3064_v48  ;;  %v2886_v23 = vsel %vm6269_vm10, %v2876_v43, 0.0  ;;  %vm3266_vm10 = vcmp.eq.s32.totalorder %v3138_v46, 0 }
 0x5ab   : > { %v2851_v8 = vpop.permute.xlu2 %2850  ;;  %3067 = vmin.xlane.f32.xlu0 %v5703_v53 }
 0x5ac   : > { %vm2869_vm2 = vcmp.eq.s32.totalorder %v6258_v11, %v2851_v8 }
 0x5ad   : > { %v2877_v5 = vsel %vm2869_vm2, %v5591_v44, 0.0  ;;  %v5719_v44 = vsel %vm6270_vm11, %v2980_v33, 2147483647  ;;  %vm3146_vm2 = vcmp.ne.s32.totalorder %v3138_v46, 1  ;;  %vm3265_vm11 = vcmp.eq.s32.totalorder %v3137_v4, 0 }
 0x5ae   : > { %v2889_v16 = vsel %vm6268_vm3, %v2877_v5, 0.0  ;;  %v3004_v6 = vshra.s32 %v5719_v44, 16  ;;  %v2845_v1 = vpop.permute.xlu0 %2844  ;;  %v3682_v25 = vsel %vm3146_vm2, 1.0, %v6274_v34  ;;  %vm3145_vm3 = vcmp.ne.s32.totalorder %v3137_v4, 1 }
 0x5af   : > { %2890 = vadd.xlane.f32.xlu1 %v2889_v16  ;;  %vm2867_vm8 = vcmp.eq.s32.totalorder %v6258_v11, %v2845_v1  ;;  %v3234_v8 = vsub.f32 1.0, %v3682_v25  ;;  %v3226_v5 = vmul.f32 %v3682_v25, %v3186_v3  ;;  %v3003_v25 = vand.u32 65535, %v5719_v44 }
 0x5b0   : > { %v5725_v21 = vcvt.s32.f32 %v3004_v6  ;;  %v2875_v32 = vsel %vm2867_vm8, %v5569_v28, 0.0  ;;  %v3697_v28 = vsel %vm2945_vm6, 1.0, %v6274_v34  ;;  %vm2944_vm2 = vcmp.ne.s32.totalorder %v5510_v30, 0 }
 0x5b1   : > { %v2883_v59 = vsel %vm6273_vm13, %v2875_v32, 0.0  ;;  %v3790_v15 = vpack.i.bf16 %v3697_v28, %v3698_v22  ;;  %v3005_v4 = vcvt.s32.f32 %v3003_v25 }
 0x5b3   : > { %2887 = vadd.xlane.f32.xlu0 %v2886_v23  ;;  %v3681_v23 = vsel %vm3145_vm3, 1.0, %v6274_v34  ;;  %vm2943_vm3 = vcmp.ne.s32.totalorder %v5538_v55, 0 }
 0x5b4   : > { %v3233_v40 = vsub.f32 1.0, %v3681_v23 }
 0x5bb   : > { %v2854_v27 = vpop.permute.xlu1 %2853 }
 0x5bc   : > { %vm2870_vm15 = vcmp.eq.s32.totalorder %v6258_v11, %v2854_v27 }
 0x5bd   : > { %v2878_v9 = vsel %vm2870_vm15, %v5597_v60, 0.0  ;;  %v3049_v60 = vshra.s32 %v5728_v61, 16  ;;  %vm2978_vm15 = vcmp.eq.f32.partialorder %v5625_v63, %v5712_v49  ;;  %v3063_v63 = vand.u32 65535, %v5700_v58 }
 0x5be   : > { %v2892_v2 = vsel %vm6271_vm12, %v2878_v9, 0.0  ;;  %vm6276_vm12 = vmmov %vm6275_vm5 }
 0x5bf   : > { %2893 = vadd.xlane.f32.xlu2 %v2892_v2  ;;  %v5732_v20 = vcvt.s32.f32 %v3049_v60 }
 0x5c7   : > { %3007 = vmin.xlane.f32.xlu2 %v5725_v21 }
 0x5cf   : > { %3052 = vmin.xlane.f32.xlu2 %v5732_v20 }
 0x5d7   : > { %2884 = vadd.xlane.f32.xlu2 %v2883_v59 }
 0x5d9   : > { %v5738_v57 = vpop.xlane.xlu0 %2896 }
 0x5e1   : > { %v5750_v29 = vpop.xlane.xlu0 %2905 }
 0x5e6   : > { %v5742_v50 = vpop.xlane.xlu1 %2899 }
 0x5e9   : > { %v5763_v39 = vpop.xlane.xlu0 %3022 }
 0x5ea   : > { %vm3024_vm14 = vcmp.eq.f32.partialorder %v5673_v26, %v5763_v39 }
 0x5eb   : > { %v3025_v41 = vsel %vm3024_vm14, %v3020_v0, inf  ;;  %v3065_v0 = vcvt.s32.f32 %v3063_v63 }
 0x5ee   : > { %v5753_v12 = vpop.xlane.xlu1 %2992 }
 0x5ef   : > { %vm2994_vm0 = vcmp.eq.f32.partialorder %v5678_v7, %v5753_v12  ;;  %3791 = vrot.lane.b32.xlu2 %v3790_v15, %s4008_s13  ;;  %v3194_v7 = vsub.f32 1.0, %v3130_v56 }
 0x5f0   : > { %v2995_v38 = vsel %vm2994_vm0, %v2990_v52, inf  ;;  %v2986_v52 = vsel %vm2978_vm15, %v6258_v11, 16 }
 0x5f1   : > { %2996 = vmin.xlane.f32.xlu1 %v2995_v38  ;;  %3914 = vlog2.f32 %v3194_v7  ;;  %v5781_v31 = vsel %vm6277_vm1, %v2986_v52, 2147483647  ;;  %v3134_v52 = vld [vmem:[%s5766_s24 + $0x18] sm:$0xff] }
 0x5f2   : > { %3916 = vlog2.f32 %v3129_v54  ;;  %v3094_v46 = vshra.s32 %v5781_v31, 16  ;;  %vm3142_vm15 = vcmp.ne.s32.totalorder %v3134_v52, 1 }
 0x5f3   : > { %3918 = vlog2.f32 %v3193_v36  ;;  %v3033_v36 = vand.u32 65535, %v5681_v13  ;;  %v3078_v13 = vand.u32 65535, %v5691_v51  ;;  %v3695_v51 = vsel %vm2943_vm3, 1.0, %v6274_v34 }
 0x5f4   : > { %v5784_v7 = vcvt.s32.f32 %v3094_v46 }
 0x5f5   : > { %v3035_v44 = vcvt.s32.f32 %v3033_v36 }
 0x5f7   : > { %v3915_v48 = vpop.eup %3914 }
 0x5f8   : > { %v3210_v24 = vmul.f32 0.6931472, %v3915_v48  ;;  %v3917_v16 = vpop.eup %3916  ;;  %v5803_v48 = vpop.xlane.xlu1 %3037 }
 0x5f9   : > { %3026 = vmin.xlane.f32.xlu1 %v3025_v41  ;;  %v3176_v33 = vmul.f32 0.6931472, %v3917_v16  ;;  %v3919_v27 = vpop.eup %3918  ;;  %v5792_v41 = vpop.xlane.xlu2 %2902  ;;  %vm3039_vm13 = vcmp.eq.f32.partialorder %v5685_v14, %v5803_v48  ;;  %v3080_v14 = vcvt.s32.f32 %v3078_v13  ;;  %v3135_v16 = vld [vmem:[%s5766_s24 + $0x20] sm:$0xff] }
 0x5fa   : > { %v3218_v26 = vmax.f32 %v3210_v24, -100.0  ;;  %v3208_v6 = vmul.f32 0.6931472, %v3919_v27 }
 0x5fb   : > { %v3185_v2 = vmax.f32 %v3176_v33, -100.0 }
 0x5fc   : > { %v3242_v43 = vmul.f32 %v3234_v8, %v3218_v26  ;;  %v3217_v1 = vmax.f32 %v3208_v6, -100.0  ;;  %v3040_v8 = vsel %vm3039_vm13, %v3035_v44, inf  ;;  %vm6278_vm13 = vmmov %vm6276_vm12 }
 0x5fd   : > { %v3225_v32 = vmul.f32 %v3681_v23, %v3185_v2 }
 0x5fe   : > { %v3250_v9 = vadd.f32 %v3242_v43, %v3226_v5  ;;  %v3241_v28 = vmul.f32 %v3233_v40, %v3217_v1 }
 0x600   : > { %v3258_v60 = vsub.f32 0.0, %v3250_v9  ;;  %v3249_v37 = vadd.f32 %v3241_v28, %v3225_v32  ;;  %v3125_v32 = vld [vmem:[%s5759_s15 + $0x10] sm:$0xff] }
 0x601   : > { %v3133_v28 = vld [vmem:[%s5766_s24 + $0x10] sm:$0xff] }
 0x602   : > { %v3274_v59 = vsel %vm3266_vm10, 0.0, %v3258_v60  ;;  %v3257_v15 = vsub.f32 0.0, %v3249_v37  ;;  %vm3143_vm10 = vcmp.ne.s32.totalorder %v3135_v16, 1  ;;  %v3189_v37 = vsub.f32 1.0, %v3125_v32 }
 0x603   : > { %v3296_v22 = vsel %vm6275_vm5, %v3274_v59, 0.0  ;;  %v3679_v33 = vsel %vm3143_vm10, 1.0, %v6274_v34  ;;  %vm3141_vm5 = vcmp.ne.s32.totalorder %v3133_v28, 1 }
 0x604   : > { %3297 = vadd.xlane.f32.xlu0 %v3296_v22  ;;  %v3273_v38 = vsel %vm3265_vm11, 0.0, %v3257_v15  ;;  %v3231_v40 = vsub.f32 1.0, %v3679_v33  ;;  %v3126_v15 = vld [vmem:[%s5759_s15 + $0x18] sm:$0xff]  ;;  %v3677_v63 = vsel %vm3141_vm5, 1.0, %v6274_v34  ;;  %vm3263_vm11 = vcmp.eq.s32.totalorder %v3135_v16, 0 }
 0x605   : > { %v3293_v56 = vsel %vm6276_vm12, %v3273_v38, 0.0  ;;  %v3190_v38 = vsub.f32 1.0, %v3126_v15  ;;  %vm6057_vm5 = vcmp.ne.s32.totalorder %v5638_v35, 0 }
 0x60c   : > { %3294 = vadd.xlane.f32.xlu0 %v3293_v56 }
 0x618   : > { %3097 = vmin.xlane.f32.xlu2 %v5784_v7 }
 0x61e   : > { %v5788_v49 = vpop.xlane.xlu0 %3067 }
 0x61f   : > { %vm3069_vm4 = vcmp.eq.f32.partialorder %v5703_v53, %v5788_v49  ;;  %v3048_v53 = vand.u32 65535, %v5728_v61  ;;  %v5812_v61 = vpop.xlane.xlu1 %3082 }
 0x620   : > { %v3070_v17 = vsel %vm3069_vm4, %v3065_v0, inf  ;;  %vm3084_vm14 = vcmp.eq.f32.partialorder %v5694_v10, %v5812_v61  ;;  %v3127_v10 = vld [vmem:[%s5759_s15 + $0x20] sm:$0xff]  ;;  %vm3261_vm4 = vcmp.eq.s32.totalorder %v3133_v28, 0 }
 0x621   : > { %3071 = vmin.xlane.f32.xlu0 %v3070_v17  ;;  %v3050_v24 = vcvt.s32.f32 %v3048_v53  ;;  %v3085_v26 = vsel %vm3084_vm14, %v3080_v14, inf  ;;  %3920 = vlog2.f32 %v3127_v10  ;;  %v3191_v43 = vsub.f32 1.0, %v3127_v10 }
 0x622   : > { %v3093_v14 = vand.u32 65535, %v5781_v31 }
 0x623   : > { %3922 = vlog2.f32 %v3191_v43 }
 0x624   : > { %3924 = vlog2.f32 %v3125_v32  ;;  %v3095_v16 = vcvt.s32.f32 %v3093_v14 }
 0x625   : > { %3926 = vlog2.f32 %v3126_v15 }
 0x626   : > { %3928 = vlog2.f32 %v3189_v37  ;;  %v5844_v37 = vpop.xlane.xlu0 %2887 }
 0x627   : > { %v3921_v23 = vpop.eup %3920  ;;  %3930 = vlog2.f32 %v3190_v38  ;;  %v5850_v28 = vpop.xlane.xlu1 %2890 }
 0x628   : > { %v3172_v27 = vmul.f32 0.6931472, %v3921_v23 }
 0x629   : > { %v3923_v9 = vpop.eup %3922 }
 0x62a   : > { %v3183_v2 = vmax.f32 %v3172_v27, -100.0  ;;  %v3204_v6 = vmul.f32 0.6931472, %v3923_v9  ;;  %v3925_v46 = vpop.eup %3924 }
 0x62b   : > { %v3927_v0 = vpop.eup %3926  ;;  %v3168_v25 = vmul.f32 0.6931472, %v3925_v46 }
 0x62c   : > { %v3215_v1 = vmax.f32 %v3204_v6, -100.0  ;;  %v3223_v59 = vmul.f32 %v3679_v33, %v3183_v2  ;;  %v3170_v36 = vmul.f32 0.6931472, %v3927_v0  ;;  %v3128_v0 = vld [vmem:[%s5759_s15 + $0x28] sm:$0xff] }
 0x62d   : > { %v3181_v53 = vmax.f32 %v3168_v25, -100.0  ;;  %3932 = vlog2.f32 %v3128_v0 }
 0x62e   : > { %v3239_v22 = vmul.f32 %v3231_v40, %v3215_v1 }
 0x630   : > { %v3247_v56 = vadd.f32 %v3239_v22, %v3223_v59 }
 0x632   : > { %v5794_v54 = vpop.xlane.xlu2 %2893 }
 0x63a   : > { %v5797_v45 = vpop.xlane.xlu2 %3007 }
 0x63b   : > { %vm3009_vm8 = vcmp.eq.f32.partialorder %v5725_v21, %v5797_v45 }
 0x63c   : > { %v3010_v58 = vsel %vm3009_vm8, %v3005_v4, inf  ;;  %v3929_v4 = vpop.eup %3928  ;;  %vm3262_vm8 = vcmp.eq.s32.totalorder %v3134_v52, 0  ;;  %v2999_v52 = vcvt.f32.s32 %v5753_v12 }
 0x63d   : > { %3011 = vmin.xlane.f32.xlu2 %v3010_v58  ;;  %v3255_v58 = vsub.f32 0.0, %v3247_v56  ;;  %v3200_v44 = vmul.f32 0.6931472, %v3929_v4  ;;  %v3931_v13 = vpop.eup %3930  ;;  %v5857_v4 = vld [vmem:[%s5766_s24 + $0x28] sm:$0xff] }
 0x63e   : > { %v3000_v25 = vshll.u32 %v2999_v52, 16  ;;  %vm3144_vm14 = vcmp.ne.s32.totalorder %v5857_v4, 1  ;;  %v3933_v14 = vpop.eup %3932 }
 0x642   : > { %v5807_v3 = vpop.xlane.xlu2 %3052 }
 0x643   : > { %vm3054_vm0 = vcmp.eq.f32.partialorder %v5732_v20, %v5807_v3  ;;  %v3696_v20 = vsel %vm2944_vm2, 1.0, %v6274_v34 }
 0x644   : > { %v3055_v21 = vsel %vm3054_vm0, %v3050_v24, inf  ;;  %v3795_v5 = vpack.i.bf16 %v3695_v51, %v3696_v20  ;;  %v3229_v24 = vsub.f32 1.0, %v3677_v63  ;;  %v3221_v20 = vmul.f32 %v3677_v63, %v3181_v53  ;;  %vm6279_vm0 = vmmov %vm6276_vm12 }
 0x645   : > { %3041 = vmin.xlane.f32.xlu2 %v3040_v8  ;;  %3056 = vmin.xlane.f32.xlu1 %v3055_v21  ;;  %v3678_v8 = vsel %vm3142_vm15, 1.0, %v6274_v34  ;;  %v3182_v21 = vmax.f32 %v3170_v36, -100.0  ;;  %v3271_v51 = vsel %vm3263_vm11, 0.0, %v3255_v58  ;;  %v3192_v58 = vsub.f32 1.0, %v3128_v0  ;;  %v3960_v0 = vld [vmem:[%s5503_s22 + $0x28] sm:$0xff] }
 0x646   : > { %v3230_v10 = vsub.f32 1.0, %v3678_v8  ;;  %v3287_v9 = vsel %vm6276_vm12, %v3271_v51, 0.0  ;;  %v3014_v36 = vcvt.f32.s32 %v5797_v45  ;;  %v3680_v51 = vsel %vm3144_vm14, 1.0, %v6274_v34 }
 0x647   : > { %v3222_v33 = vmul.f32 %v3678_v8, %v3182_v21  ;;  %3934 = vlog2.f32 %v3192_v58  ;;  %v3074_v21 = vcvt.f32.s32 %v5788_v49  ;;  %vm2940_vm11 = vcmp.ne.s32.totalorder %v5634_v18, 0 }
 0x648   : > { %v3015_v12 = vshll.u32 %v3014_v36, 16 }
 0x64a   : > { %v5828_v60 = vpop.xlane.xlu2 %2884 }
 0x64d   : > { %3086 = vmin.xlane.f32.xlu2 %v3085_v26  ;;  %v3213_v26 = vmax.f32 %v3200_v44, -100.0 }
 0x64f   : > { %v3237_v43 = vmul.f32 %v3229_v24, %v3213_v26  ;;  %v3029_v24 = vcvt.f32.s32 %v5763_v39  ;;  %v3044_v39 = vcvt.f32.s32 %v5803_v48 }
 0x651   : > { %v3245_v2 = vadd.f32 %v3237_v43, %v3221_v20  ;;  %v3030_v43 = vshll.u32 %v3029_v24, 16 }
 0x652   : > { %v5835_v17 = vpop.permute.xlu2 %3791 }
 0x653   : > { %v3253_v31 = vsub.f32 0.0, %v3245_v2  ;;  %v3059_v2 = vcvt.f32.s32 %v5807_v3 }
 0x655   : > { %v3269_v32 = vsel %vm3261_vm4, 0.0, %v3253_v31  ;;  %v3060_v3 = vshll.u32 %v3059_v2, 16 }
 0x656   : > { %v3281_v15 = vsel %vm6278_vm13, %v3269_v32, 0.0  ;;  %vm2941_vm13 = vcmp.ne.s32.totalorder %v5642_v42, 0 }
 0x664   : > { %v2997_v56 = vpop.xlane.xlu1 %2996 }
 0x665   : > { %3796 = vrot.lane.b32.xlu2 %v3795_v5, %s4008_s13  ;;  %v3202_v5 = vmul.f32 0.6931472, %v3931_v13  ;;  %v2998_v63 = vcvt.f32.s32 %v2997_v56 }
 0x667   : > { %v3214_v23 = vmax.f32 %v3202_v5, -100.0  ;;  %v3001_v53 = vadd.s32 %v3000_v25, %v2998_v63  ;;  %v3174_v5 = vmul.f32 0.6931472, %v3933_v14 }
 0x669   : > { %v3238_v6 = vmul.f32 %v3230_v10, %v3214_v23  ;;  %vm3107_vm10 = vcmp.eq.s32.totalorder %v3001_v53, %v5638_v35  ;;  %v3935_v10 = vpop.eup %3934  ;;  %v3184_v49 = vmax.f32 %v3174_v5, -100.0 }
 0x66a   : > { %vm3115_vm15 = vmand %vm3107_vm10, %vm6057_vm5  ;;  %vm2942_vm10 = vcmp.ne.s32.totalorder %v5645_v62, 0  ;;  %vm6280_vm5 = vcmask 64512  }
 0x66b   : > { %v3246_v1 = vadd.f32 %v3238_v6, %v3222_v33  ;;  %v3075_v33 = vshll.u32 %v3074_v21, 16  ;;  %v3224_v31 = vmul.f32 %v3680_v51, %v3184_v49 }
 0x66c   : > { %v3027_v44 = vpop.xlane.xlu1 %3026 }
 0x66d   : > { %v3254_v59 = vsub.f32 0.0, %v3246_v1  ;;  %v3028_v26 = vcvt.f32.s32 %v3027_v44  ;;  %v3683_v1 = vsel %vm3115_vm15, 1.0, %v6274_v34  ;;  %v3961_v44 = vld [vmem:[%s5503_s22 + $0x20] sm:$0xff] }
 0x66f   : > { %v3270_v22 = vsel %vm3262_vm8, 0.0, %v3254_v59  ;;  %v3031_v6 = vadd.s32 %v3030_v43, %v3028_v26  ;;  %v3045_v59 = vshll.u32 %v3044_v39, 16  ;;  %v3123_v39 = vld [vmem:[%s5759_s15] sm:$0xff] }
 0x670   : > { %v3284_v38 = vsel %vm6279_vm0, %v3270_v22, 0.0  ;;  %vm3264_vm0 = vcmp.eq.s32.totalorder %v5857_v4, 0 }
 0x671   : > { %3285 = vadd.xlane.f32.xlu0 %v3284_v38  ;;  %vm3109_vm4 = vcmp.eq.s32.totalorder %v3031_v6, %v5642_v42 }
 0x672   : > { %vm3117_vm14 = vmand %vm3109_vm4, %vm2941_vm13 }
 0x673   : > { %v3685_v4 = vsel %vm3117_vm14, 1.0, %v6274_v34 }
 0x68b   : > { %v5839_v27 = vpop.xlane.xlu2 %3097 }
 0x68c   : > { %vm3099_vm1 = vcmp.eq.f32.partialorder %v5784_v7, %v5839_v27  ;;  %v5848_v7 = vpop.xlane.xlu0 %3297 }
 0x68d   : > { %v3100_v40 = vsel %vm3099_vm1, %v3095_v16, inf  ;;  %v3206_v16 = vmul.f32 0.6931472, %v3935_v10  ;;  %v3089_v10 = vcvt.f32.s32 %v5812_v61 }
 0x68e   : > { %3101 = vmin.xlane.f32.xlu1 %v3100_v40  ;;  %3288 = vadd.xlane.f32.xlu2 %v3287_v9  ;;  %v3232_v9 = vsub.f32 1.0, %v3680_v51  ;;  %v3132_v51 = vld [vmem:[%s5766_s24 + $0x8] sm:$0xff] }
 0x68f   : > { %v3216_v48 = vmax.f32 %v3206_v16, -100.0  ;;  %v3131_v16 = vld [vmem:[%s5766_s24] sm:$0xff] }
 0x691   : > { %v3240_v56 = vmul.f32 %v3232_v9, %v3216_v48  ;;  %v3187_v9 = vsub.f32 1.0, %v3123_v39 }
 0x693   : > { %v3248_v25 = vadd.f32 %v3240_v56, %v3224_v31  ;;  %v3962_v56 = vld [vmem:[%s5503_s22 + $0x30] sm:$0xff] }
 0x694   : > { %v5852_v46 = vpop.xlane.xlu0 %3294 }
 0x695   : > { %v3256_v53 = vsub.f32 0.0, %v3248_v25 }
 0x696   : > { %3282 = vadd.xlane.f32.xlu2 %v3281_v15 }
 0x697   : > { %v3272_v24 = vsel %vm3264_vm0, 0.0, %v3256_v53 }
 0x698   : > { %v3290_v21 = vsel %vm6280_vm5, %v3272_v24, 0.0  ;;  %vm3139_vm5 = vcmp.ne.s32.totalorder %v3131_v16, 1  ;;  %v3963_v24 = vld [vmem:[%s5503_s22 + $0x38] sm:$0xff] }
 0x699   : > { %3291 = vadd.xlane.f32.xlu1 %v3290_v21 }
 0x69c   : > { %v3072_v8 = vpop.xlane.xlu0 %3071 }
 0x69d   : > { %v3073_v45 = vcvt.f32.s32 %v3072_v8 }
 0x69f   : > { %v3076_v40 = vadd.s32 %v3075_v33, %v3073_v45  ;;  %v3090_v33 = vshll.u32 %v3089_v10, 16  ;;  %v3694_v10 = vsel %vm2942_vm10, 1.0, %v6274_v34 }
 0x6a1   : > { %vm3112_vm8 = vcmp.eq.s32.totalorder %v3076_v40, %v3960_v0  ;;  %v3104_v40 = vcvt.f32.s32 %v5839_v27 }
 0x6a2   : > { %vm3120_vm15 = vmand %vm3112_vm8, %vm2944_vm2 }
 0x6b0   : > { %v3012_v13 = vpop.xlane.xlu2 %3011 }
 0x6b1   : > { %v3013_v20 = vcvt.f32.s32 %v3012_v13 }
 0x6b3   : > { %v3016_v23 = vadd.s32 %v3015_v12, %v3013_v20  ;;  %v3688_v12 = vsel %vm3120_vm15, 1.0, %v6274_v34  ;;  %v3124_v20 = vld [vmem:[%s5759_s15 + $0x8] sm:$0xff]  ;;  %vm3260_vm15 = vcmp.eq.s32.totalorder %v3132_v51, 0 }
 0x6b4   : > { %3936 = vlog2.f32 %v3124_v20  ;;  %v3188_v45 = vsub.f32 1.0, %v3124_v20 }
 0x6b5   : > { %vm3108_vm12 = vcmp.eq.s32.totalorder %v3016_v23, %v5634_v18 }
 0x6b6   : > { %vm3116_vm1 = vmand %vm3108_vm12, %vm2940_vm11  ;;  %3938 = vlog2.f32 %v3188_v45 }
 0x6b7   : > { %v3684_v32 = vsel %vm3116_vm1, 1.0, %v6274_v34  ;;  %3940 = vlog2.f32 %v3123_v39 }
 0x6b8   : > { %v3042_v22 = vpop.xlane.xlu2 %3041  ;;  %v3057_v15 = vpop.xlane.xlu1 %3056  ;;  %v3820_v38 = vpack.i.bf16 %v3683_v1, %v3684_v32  ;;  %3942 = vlog2.f32 %v3187_v9 }
 0x6b9   : > { %v3043_v52 = vcvt.f32.s32 %v3042_v22  ;;  %v3058_v63 = vcvt.f32.s32 %v3057_v15 }
 0x6ba   : > { %3821 = vrot.lane.b32.xlu2 %v3820_v38, %s4009_s18  ;;  %v3937_v23 = vpop.eup %3936  ;;  %v3105_v38 = vshll.u32 %v3104_v40, 16  ;;  %v2914_v40 = vadd.f32 1e-12, %v5750_v29 }
 0x6bb   : > { %v3046_v58 = vadd.s32 %v3045_v59, %v3043_v52  ;;  %v3061_v36 = vadd.s32 %v3060_v3, %v3058_v63  ;;  %v3166_v2 = vmul.f32 0.6931472, %v3937_v23  ;;  %v3675_v52 = vsel %vm3139_vm5, 1.0, %v6274_v34 }
 0x6bc   : > { %v3939_v6 = vpop.eup %3938  ;;  %vm6283_vm5 = vcmp.ne.s32.totalorder %v5638_v35, 0 }
 0x6bd   : > { %vm3110_vm12 = vcmp.eq.s32.totalorder %v3046_v58, %v5645_v62  ;;  %vm3111_vm1 = vcmp.eq.s32.totalorder %v3061_v36, %v3961_v44  ;;  %v3180_v31 = vmax.f32 %v3166_v2, -100.0  ;;  %v3198_v61 = vmul.f32 0.6931472, %v3939_v6  ;;  %v3941_v15 = vpop.eup %3940 }
 0x6be   : > { %vm3118_vm9 = vmand %vm3110_vm12, %vm2942_vm10  ;;  %v3164_v0 = vmul.f32 0.6931472, %v3941_v15  ;;  %v3943_v27 = vpop.eup %3942  ;;  %v3227_v44 = vsub.f32 1.0, %v3675_v52  ;;  %v3691_v9 = vsel %vm6283_vm5, 1.0, %v6274_v34  ;;  %v2911_v6 = vadd.f32 1e-12, %v5738_v57 }
 0x6bf   : > { %v3686_v8 = vsel %vm3118_vm9, 1.0, %v6274_v34  ;;  %vm3119_vm4 = vmand %vm3111_vm1, %vm2943_vm3  ;;  %vm3140_vm9 = vcmp.ne.s32.totalorder %v3132_v51, 1  ;;  %v3212_v59 = vmax.f32 %v3198_v61, -100.0  ;;  %v3196_v53 = vmul.f32 0.6931472, %v3943_v27 }
 0x6c0   : > { %v3687_v13 = vsel %vm3119_vm4, 1.0, %v6274_v34  ;;  %v3800_v14 = vpack.i.bf16 %v3685_v4, %v3686_v8  ;;  %v3087_v5 = vpop.xlane.xlu2 %3086  ;;  %v3676_v49 = vsel %vm3140_vm9, 1.0, %v6274_v34  ;;  %v3179_v36 = vmax.f32 %v3164_v0, -100.0 }
 0x6c1   : > { %v3805_v26 = vpack.i.bf16 %v3687_v13, %v3688_v12  ;;  %v3088_v43 = vcvt.f32.s32 %v3087_v5  ;;  %v3228_v1 = vsub.f32 1.0, %v3676_v49  ;;  %v3220_v22 = vmul.f32 %v3676_v49, %v3180_v31 }
 0x6c2   : > { %3801 = vrot.lane.b32.xlu0 %v3800_v14, %s4009_s18  ;;  %v3211_v8 = vmax.f32 %v3196_v53, -100.0  ;;  %v3219_v21 = vmul.f32 %v3675_v52, %v3179_v36  ;;  %vm6281_vm1 = vcmask 64512   ;;  %v3693_v51 = vsel %vm2941_vm13, 1.0, %v6274_v34 }
 0x6c3   : > { %v3091_v48 = vadd.s32 %v3090_v33, %v3088_v43  ;;  %v3236_v63 = vmul.f32 %v3228_v1, %v3212_v59  ;;  %vm3259_vm4 = vcmp.eq.s32.totalorder %v3131_v16, 0  ;;  %v3815_v39 = vpack.i.bf16 %v3693_v51, %v3694_v10  ;;  %vm6282_vm9 = vmmov %vm6281_vm1 }
 0x6c4   : > { %v3235_v20 = vmul.f32 %v3227_v44, %v3211_v8  ;;  %v3692_v49 = vsel %vm2940_vm11, 1.0, %v6274_v34  ;;  %v2912_v31 = vadd.f32 1e-12, %v5742_v50  ;;  %3944 = vlog2.f32 %v2911_v6 }
 0x6c5   : > { %vm3113_vm8 = vcmp.eq.s32.totalorder %v3091_v48, %v3962_v56  ;;  %v3244_v58 = vadd.f32 %v3236_v63, %v3220_v22  ;;  %v3825_v2 = vpack.i.bf16 %v3691_v9, %v3692_v49  ;;  %v2913_v48 = vadd.f32 1e-12, %v5792_v41 }
 0x6c6   : > { %vm3121_vm0 = vmand %vm3113_vm8, %vm2945_vm6  ;;  %v3243_v5 = vadd.f32 %v3235_v20, %v3219_v21  ;;  %3946 = vlog2.f32 %v2914_v40  ;;  %v2910_v59 = vadd.f32 1e-12, %v5794_v54  ;;  %v2909_v57 = vadd.f32 1e-12, %v5850_v28 }
 0x6c7   : > { %v3252_v4 = vsub.f32 0.0, %v3244_v58  ;;  %v3689_v12 = vsel %vm3121_vm0, 1.0, %v6274_v34  ;;  %3948 = vlog2.f32 %v2913_v48  ;;  %v2908_v0 = vadd.f32 1e-12, %v5844_v37 }
 0x6c8   : > { %v3251_v43 = vsub.f32 0.0, %v3243_v5  ;;  %v5938_v61 = vpop.permute.xlu2 %3796  ;;  %3950 = vlog2.f32 %v2912_v31  ;;  %v2907_v54 = vadd.f32 1e-12, %v5828_v60  ;;  %v3794_v20 = vunpack.i.h.bf16 %v5835_v17 }
 0x6c9   : > { %3952 = vlog2.f32 %v2910_v59  ;;  %v3798_v30 = vunpack.i.l.bf16 %v5938_v61  ;;  %v3799_v9 = vunpack.i.h.bf16 %v5938_v61 }
 0x6ca   : > { %3806 = vrot.lane.b32.xlu0 %v3805_v26, %s4009_s18  ;;  %v3268_v26 = vsel %vm3260_vm15, 0.0, %v3252_v4  ;;  %v3267_v23 = vsel %vm3259_vm4, 0.0, %v3251_v43  ;;  %3954 = vlog2.f32 %v2909_v57  ;;  %vm3467_vm4 = vcmask 31744  }
 0x6cb   : > { %v3278_v45 = vsel %vm6281_vm1, %v3268_v26, 0.0  ;;  %v3275_v33 = vsel %vm6282_vm9, %v3267_v23, 0.0  ;;  %3956 = vlog2.f32 %v2908_v0  ;;  %vm6294_vm1 = vcmask 523264  }
 0x6cc   : > { %3958 = vlog2.f32 %v2907_v54 }
 0x6e4   : > { %v5932_v16 = vpop.xlane.xlu0 %3285 }
 0x6f4   : > { %3279 = vadd.xlane.f32.xlu0 %v3278_v45  ;;  %v3793_v45 = vunpack.i.l.bf16 %v5835_v17 }
 0x6fc   : > { %3276 = vadd.xlane.f32.xlu0 %v3275_v33 }
 0x701   : > { %v3102_v32 = vpop.xlane.xlu1 %3101  ;;  %v5944_v41 = vpop.xlane.xlu2 %3288 }
 0x702   : > { %v3103_v3 = vcvt.f32.s32 %v3102_v32  ;;  %v3945_v32 = vpop.eup %3944 }
 0x703   : > { %v3947_v22 = vpop.eup %3946 }
 0x704   : > { %v3106_v25 = vadd.s32 %v3105_v38, %v3103_v3  ;;  %v3949_v15 = vpop.eup %3948  ;;  %v2924_v38 = vmul.f32 0.6931472, %v3945_v32  ;;  %v2930_v50 = vmul.f32 0.6931472, %v3947_v22 }
 0x705   : > { %v3951_v29 = vpop.eup %3950  ;;  %v2928_v56 = vmul.f32 0.6931472, %v3949_v15 }
 0x706   : > { %vm3114_vm14 = vcmp.eq.s32.totalorder %v3106_v25, %v3963_v24  ;;  %v2926_v52 = vmul.f32 0.6931472, %v3951_v29  ;;  %v2935_v63 = vsub.f32 0.0, %v2924_v38  ;;  %v2938_v27 = vsub.f32 0.0, %v2930_v50  ;;  %v3953_v36 = vpop.eup %3952 }
 0x707   : > { %vm3122_vm12 = vmand %vm3114_vm14, %vm2946_vm7  ;;  %v2937_v25 = vsub.f32 0.0, %v2928_v56  ;;  %v3955_v53 = vpop.eup %3954  ;;  %v2922_v37 = vmul.f32 0.6931472, %v3953_v36 }
 0x708   : > { %v3690_v13 = vsel %vm3122_vm12, 1.0, %v6274_v34  ;;  %v2936_v28 = vsub.f32 0.0, %v2926_v52  ;;  %v3303_v44 = vsel %vm2943_vm3, %v2935_v63, 0.0  ;;  %v3306_v4 = vsel %vm2946_vm7, %v2938_v27, 0.0  ;;  %vm6290_vm14 = vmmov %vm6283_vm5 }
 0x709   : > { %v3810_v14 = vpack.i.bf16 %v3689_v12, %v3690_v13  ;;  %v3305_v8 = vsel %vm2945_vm6, %v2937_v25, 0.0  ;;  %v3283_v12 = vpop.xlane.xlu2 %3282  ;;  %v2920_v55 = vmul.f32 0.6931472, %v3955_v53  ;;  %vm3403_vm3 = vcmask 7168  }
 0x70a   : > { %v3304_v60 = vsel %vm2944_vm2, %v2936_v28, 0.0  ;;  %vm3412_vm7 = vcmask 15360   ;;  %v2934_v51 = vsub.f32 0.0, %v2922_v37  ;;  %vm6284_vm6 = vcmask 23552  }
 0x70b   : > { %3811 = vrot.lane.b32.xlu1 %v3810_v14, %s4009_s18  ;;  %v2933_v49 = vsub.f32 0.0, %v2920_v55  ;;  %vm6285_vm2 = vmmov %vm6284_vm6  ;;  %v3433_v25 = vand.u32 7, %v6258_v11 }
 0x70c   : > { %v3292_v3 = vpop.xlane.xlu1 %3291  ;;  %vm6286_vm8 = vmmov %vm6285_vm2 }
 0x70d   : > { %vm6287_vm0 = vmmov %vm6285_vm2 }
 0x70e   : > { %vm6292_vm12 = vmmov %vm6287_vm0 }
 0x713   : > { %3816 = vrot.lane.b32.xlu1 %v3815_v39, %s4008_s13  ;;  %v3957_v39 = vpop.eup %3956 }
 0x714   : > { %v3959_v33 = vpop.eup %3958  ;;  %v2918_v31 = vmul.f32 0.6931472, %v3957_v39  ;;  %v3822_v38 = vpop.permute.xlu2 %3821 }
 0x715   : > { %v2916_v22 = vmul.f32 0.6931472, %v3959_v33  ;;  %v3824_v0 = vunpack.i.h.bf16 %v3822_v38  ;;  %v3823_v27 = vunpack.i.l.bf16 %v3822_v38 }
 0x716   : > { %v2932_v63 = vsub.f32 0.0, %v2918_v31 }
 0x717   : > { %v2931_v42 = vsub.f32 0.0, %v2916_v22 }
 0x71b   : > { %3826 = vrot.lane.b32.xlu1 %v3825_v2, %s4008_s13 }
 0x734   : > { %v5940_v1 = vpop.permute.xlu0 %3801 }
 0x735   : > { %v3803_v2 = vunpack.i.l.bf16 %v5940_v1  ;;  %v3804_v40 = vunpack.i.h.bf16 %v5940_v1  ;;  %v3301_v1 = vsel %vm2941_vm13, %v2933_v49, 0.0  ;;  %vm6289_vm13 = vmmov %vm6287_vm0 }
 0x737   : > { %v3406_v56 = vsel %vm3403_vm3, %v3301_v1, %v3804_v40 }
 0x73c   : > { %v3807_v58 = vpop.permute.xlu0 %3806 }
 0x73d   : > { %v3808_v24 = vunpack.i.l.bf16 %v3807_v58  ;;  %v3809_v13 = vunpack.i.h.bf16 %v3807_v58  ;;  %v3300_v58 = vsel %vm2940_vm11, %v2932_v63, 0.0  ;;  %vm6293_vm11 = vmmov %vm6287_vm0 }
 0x73e   : > { %v3405_v53 = vsel %vm3403_vm3, %v3300_v58, %v3823_v27 }
 0x73f   : > { %v3409_v5 = vsel %vm3403_vm3, %v3304_v60, %v3808_v24  ;;  %v3408_v17 = vsel %vm3403_vm3, %v3303_v44, %v3809_v13  ;;  %v6291_v24 = vld [vmem:[#allocation7_spill] sm:$0xff] }
 0x740   : > { %v3418_v6 = vsel %vm3412_vm7, %v3409_v5, %v3798_v30  ;;  %v3417_v59 = vsel %vm3412_vm7, %v3408_v17, %v3799_v9  ;;  %vm3441_vm15 = vcmp.eq.s32.totalorder %v6291_v24, %v3433_v25 }
 0x741   : > { %v3426_v57 = vsel %vm6286_vm8, %v3418_v6, %v3292_v3  ;;  %v3425_v62 = vsel %vm6287_vm0, %v3417_v59, %v5944_v41  ;;  %v3699_v35 = vsel %vm3441_vm15, 1.0, %v6274_v34 }
 0x767   : > { %v3280_v29 = vpop.xlane.xlu0 %3279 }
 0x76f   : > { %v3277_v11 = vpop.xlane.xlu0 %3276 }
 0x77d   : > { %v3812_v21 = vpop.permute.xlu1 %3811 }
 0x77e   : > { %v3814_v14 = vunpack.i.h.bf16 %v3812_v21  ;;  %v3813_v26 = vunpack.i.l.bf16 %v3812_v21 }
 0x780   : > { %v3411_v19 = vsel %vm3403_vm3, %v3306_v4, %v3813_v26  ;;  %v3410_v47 = vsel %vm3403_vm3, %v3305_v8, %v3814_v14 }
 0x781   : > { %v3420_v10 = vsel %vm3412_vm7, %v3411_v19, %v3793_v45  ;;  %v3419_v43 = vsel %vm3412_vm7, %v3410_v47, %v3794_v20 }
 0x782   : > { %v3428_v23 = vsel %vm6284_vm6, %v3420_v10, %v5848_v7  ;;  %v3427_v48 = vsel %vm6285_vm2, %v3419_v43, %v5852_v46  ;;  %v3302_v7 = vsel %vm2942_vm10, %v2934_v51, 0.0  ;;  %vm6288_vm10 = vmmov %vm6287_vm0 }
 0x783   : > { %3455 = vmatpush.msrb.mxu3 %v3428_v23  ;;  %v3407_v46 = vsel %vm3403_vm3, %v3302_v7, %v3803_v2 }
 0x785   : > { %v3817_v32 = vpop.permute.xlu1 %3816  ;;  %3456 = vmatpush.msrb.mxu3 %v3427_v48 }
 0x786   : > { %v3819_v61 = vunpack.i.h.bf16 %v3817_v32  ;;  %v3818_v15 = vunpack.i.l.bf16 %v3817_v32 }
 0x787   : > { %3457 = vmatpush.msrb.mxu3 %v3426_v57 }
 0x788   : > { %v3416_v50 = vsel %vm3412_vm7, %v3407_v46, %v3818_v15  ;;  %v3415_v3 = vsel %vm3412_vm7, %v3406_v56, %v3819_v61 }
 0x789   : > { %3458 = vmatpush.msrb.mxu3 %v3425_v62  ;;  %v3424_v52 = vsel %vm6288_vm10, %v3416_v50, %v5932_v16  ;;  %v3423_v54 = vsel %vm6289_vm13, %v3415_v3, %v3283_v12  ;;  %v3299_v16 = vsel %vm6290_vm14, %v2931_v42, 0.0 }
 0x78a   : > { %v3404_v44 = vsel %vm3403_vm3, %v3299_v16, %v3824_v0 }
 0x78b   : > { %3459 = vmatpush.msrb.mxu3 %v3424_v52 }
 0x78d   : > { %v3827_v41 = vpop.permute.xlu1 %3826  ;;  %3460 = vmatpush.msrb.mxu3 %v3423_v54 }
 0x78e   : > { %v3829_v36 = vunpack.i.h.bf16 %v3827_v41  ;;  %v3828_v28 = vunpack.i.l.bf16 %v3827_v41 }
 0x790   : > { %v3414_v4 = vsel %vm3412_vm7, %v3405_v53, %v3828_v28  ;;  %v3413_v8 = vsel %vm3412_vm7, %v3404_v44, %v3829_v36 }
 0x791   : > { %v3422_v18 = vsel %vm6292_vm12, %v3414_v4, %v3280_v29  ;;  %v3421_v37 = vsel %vm6293_vm11, %v3413_v8, %v3277_v11 }
 0x792   : > { %3461 = vmatpush.msrb.mxu3 %v3422_v18 }
 0x794   : > { %3462 = vmatpush.msrb.mxu3 %v3421_v37 }
 0x795   : > { %3700 = vmatmul.msk.f32.vlgmr.msrb.gmra.mxu3 %vm6294_vm1, %v3699_v35 }
 0x818   : > { %v3464_v21 = vpop.f32.mrf.mxu3 }
 0x819   : > { %3468 = vst.msk [vmem:[%s774_s28] sm:$0xff] %vm3467_vm4, %v3464_v21 }
 0x81a PF: > { %p17_p10 = scmp.ge.s32.totalorder %s4084_s17, 4   ;;  %s6295_s13 = smov %s3982_s14 }
 0x81b   : > { %s6296_s14 = smov %s4093_s20  ;;  %s6297_s15 = smov %s4084_s17 }
 0x81c   :  { %19 = sbr.rel (!%p17_p10) target bundleno = 2 (0x2), region = 320 }

</bundles_post_ra>
